<compile_context>
chip_gen: v7x
topology: tpu7x:2x2x1
jax: 0.10.0
libtpu: 0.0.40
codegen_flags: <defaults>
</compile_context>

<pallas_src>
import math

import numpy as np

import jax
import jax.numpy as jnp
from jax.experimental import pallas as pl
from jax.experimental.pallas import tpu as pltpu

D_VOCAB = 23
D_MODEL = 16
D_FF = 8
NHEAD = 8            # nn.Transformer default
DHEAD = D_MODEL // NHEAD
N_ENC = 2
N_DEC = 2
BS = 2
EPS = 1e-5
WSLAB = 3 * D_MODEL  # 48: widest packed row (fused QKV weight / bias)

MHA_NAMES = ("enc0", "enc1", "dec0_self", "dec0_cross", "dec1_self", "dec1_cross")
FFN_NAMES = ("enc0", "enc1", "dec0", "dec1")
LN_NAMES = ("enc0_n1", "enc0_n2", "enc1_n1", "enc1_n2", "enc_final",
            "dec0_n1", "dec0_n2", "dec0_n3",
            "dec1_n1", "dec1_n2", "dec1_n3", "dec_final")

_VMEM = pl.BlockSpec(memory_space=pltpu.MemorySpace.VMEM)


def _align8(x):
    return (x + 7) // 8 * 8


def _build_layout():
    """Static row offsets of every parameter inside the single (rows, 48) slab."""
    E, F, V = D_MODEL, D_FF, D_VOCAB
    lay = {"mha": {}, "ffn": {}, "ln": {}}
    off = 0

    def take(nrows, align=1):
        nonlocal off
        if align > 1:
            off = _align8(off)
        start = off
        off += nrows
        return start

    for name in MHA_NAMES:          # [wqkv 16 | wout 16 | b_qkv row | b_out row]
        lay["mha"][name] = take(2 * E + 2, align=8)
    for name in FFN_NAMES:          # [w1 16 | w2 8 | (b1, b2) row]
        lay["ffn"][name] = take(E + F + 1, align=8)
    for name in LN_NAMES:           # [(gamma, beta) row]
        lay["ln"][name] = take(1)
    lay["embed"] = take(V, align=8)
    lay["src_bias"] = take(1)
    lay["out_b"] = take(1)
    lay["bn"] = take(BS, align=8)   # row = batch channel, col0 = gamma, col1 = beta
    lay["rows"] = _align8(off)
    return lay


LAYOUT = _build_layout()


# ------------------------------ fused kernel -------------------------------

def make_kernel(S, T):
    assert BS == 2, "kernel specializes the fixed bs=2 of the reference module"
    E, F, V, H, B, DH = D_MODEL, D_FF, D_VOCAB, NHEAD, BS, DHEAD
    f32 = jnp.float32
    lay = LAYOUT
    SRC_ROWS, TGT_ROWS = B * S, B * T
    TGT_OFF = _align8(SRC_ROWS)           # tgt ids start 8-aligned inside ids input
    iota = jax.lax.broadcasted_iota

    def kernel(ids_ref, th_ref, out_ref):
        # ============== hoisted constants (built ONCE per call) ==============
        def stacked_consts(Lk):
            """Constants for attention with per-batch key length Lk.

            Score lanes are H contiguous blocks of width B*Lk (one per head);
            k/v rows are replicated once per head and masked to that head's
            feature lanes, so all heads run in single full-width matmuls.
            """
            BLk = B * Lk
            N = H * BLk
            r_nh = iota(jnp.int32, (N, H), 0)
            c_nh = iota(jnp.int32, (N, H), 1)
            segT = ((r_nh >= c_nh * BLk) & (r_nh < (c_nh + 1) * BLk)).astype(f32)
            r_hn = iota(jnp.int32, (H, N), 0)
            c_hn = iota(jnp.int32, (H, N), 1)
            seg = ((c_hn >= r_hn * BLk) & (c_hn < (r_hn + 1) * BLk)).astype(f32)
            # block-diagonal ones: broadcasts per-head softmax denominators
            blockones = jnp.dot(segT, seg, preferred_element_type=f32)       # (N, N)
            # headmask[c, e] = 1 iff feature lane e belongs to head block(c)
            r_he = iota(jnp.int32, (H, E), 0)
            c_he = iota(jnp.int32, (H, E), 1)
            headlane = ((c_he >= r_he * DH) & (c_he < (r_he + 1) * DH)).astype(f32)
            headmask = jnp.dot(segT, headlane, preferred_element_type=f32)   # (N, E)
            # repmat[c, j] = 1 iff (c mod BLk) == j  (stack of H identities)
            hvals = iota(jnp.int32, (N, H), 1).astype(f32)
            blockidx = jnp.sum(segT * hvals, axis=-1, keepdims=True)         # (N, 1)
            colpos = iota(jnp.int32, (N, 1), 0).astype(f32) - blockidx * BLk
            repmat = (colpos == iota(jnp.int32, (N, BLk), 1).astype(f32)).astype(f32)
            # kb1[0, c] = 1 iff stacked key column c carries batch 1  (B == 2)
            b1 = ((c_hn >= r_hn * BLk + Lk) & (c_hn < (r_hn + 1) * BLk)).astype(f32)
            kb1 = jnp.sum(b1, axis=0, keepdims=True)                          # (1, N)
            return dict(headmask=headmask, blockones=blockones,
                        repmat=repmat, kb1=kb1)

        def batch_mask(Lq, kb1):
            # True where query row and stacked key column share a batch (B == 2).
            qb1 = (iota(jnp.int32, (B * Lq, 1), 0) >= Lq).astype(f32)
            same = qb1 * kb1 + (1.0 - qb1) * (1.0 - kb1)
            return same > 0.5

        cs = stacked_consts(S)               # encoder-length keys (enc self + cross)
        ct = stacked_consts(T)               # decoder-length keys (dec self)
        mask_ss = batch_mask(S, cs["kb1"])   # (B*S, H*B*S)
        mask_tt = batch_mask(T, ct["kb1"])   # (B*T, H*B*T)
        mask_ts = batch_mask(T, cs["kb1"])   # (B*T, H*B*S)
        oh_cols_s = iota(jnp.int32, (SRC_ROWS, V), 1)
        oh_cols_t = iota(jnp.int32, (TGT_ROWS, V), 1)
        # BatchNorm segment matrix (row = b*T + t  ->  channel b)
        r_bn = iota(jnp.int32, (B, TGT_ROWS), 0)
        c_bn = iota(jnp.int32, (B, TGT_ROWS), 1)
        seg_bn = ((c_bn >= r_bn * T) & (c_bn < (r_bn + 1) * T)).astype(f32)   # (B, B*T)
        ind0 = (iota(jnp.int32, (TGT_ROWS, 1), 0) < T).astype(f32)            # batch-0 rows

        embed = th_ref[lay["embed"]:lay["embed"] + V, 0:E]                    # (V, E)

        # =============================== helpers ==============================
        def layer_norm(x, name):
            r = lay["ln"][name]
            gb = th_ref[r:r + 1, 0:2 * E]
            mu = jnp.mean(x, axis=-1, keepdims=True)
            var = jnp.mean(jnp.square(x - mu), axis=-1, keepdims=True)
            return (x - mu) * jax.lax.rsqrt(var + EPS) * gb[:, 0:E] + gb[:, E:2 * E]

        def ffn(x, name):
            r = lay["ffn"][name]
            w1 = th_ref[r:r + E, 0:F]
            w2 = th_ref[r + E:r + E + F, 0:E]
            bias = th_ref[r + E + F:r + E + F + 1, :]
            h = jnp.maximum(jnp.dot(x, w1, preferred_element_type=f32)
                            + bias[:, 0:F], 0.0)
            return jnp.dot(h, w2, preferred_element_type=f32) + bias[:, F:F + E]

        def mha(name, xq, xkv, self_attn, cst, same):
            r = lay["mha"][name]
            wqkv = th_ref[r:r + E, :]                           # (E, 3E), q-scale folded
            wout = th_ref[r + E:r + 2 * E, 0:E]                 # (E, E)
            bqkv = th_ref[r + 2 * E:r + 2 * E + 1, :]           # (1, 3E)
            bout = th_ref[r + 2 * E + 1:r + 2 * E + 2, 0:E]     # (1, E)
            if self_attn:                                       # fused QKV: 1 matmul
                qkv = jnp.dot(xq, wqkv, preferred_element_type=f32) + bqkv
                q, kv = qkv[:, 0:E], qkv[:, E:3 * E]
            else:                                               # q + fused KV: 2 matmuls
                q = jnp.dot(xq, wqkv[:, 0:E],
                            preferred_element_type=f32) + bqkv[:, 0:E]
                kv = jnp.dot(xkv, wqkv[:, E:3 * E],
                             preferred_element_type=f32) + bqkv[:, E:3 * E]
            # replicate k/v rows once per head, mask each replica to its head lanes
            kv_rep = jnp.dot(cst["repmat"], kv, preferred_element_type=f32)  # (N, 2E)
            k_stack = kv_rep[:, 0:E] * cst["headmask"]
            v_stack = kv_rep[:, E:2 * E] * cst["headmask"]
            # all heads' scores in ONE matmul; lanes = H blocks of width B*Lk
            s = jax.lax.dot_general(q, k_stack, (((1,), (1,)), ((), ())),
                                    preferred_element_type=f32)              # (BLq, N)
            m = jnp.max(jnp.where(same, s, -1e30), axis=-1, keepdims=True)
            ex = jnp.where(same, jnp.exp(s - m), 0.0)
            den = jnp.dot(ex, cst["blockones"], preferred_element_type=f32)  # seg sums
            p = ex * pl.reciprocal(den, approx=True)
            attn = jnp.dot(p, v_stack, preferred_element_type=f32)           # (BLq, E)
            return jnp.dot(attn, wout, preferred_element_type=f32) + bout

        # ============================ embeddings ==============================
        src_oh = (ids_ref[0:SRC_ROWS, :] == oh_cols_s).astype(f32)
        tgt_oh = (ids_ref[TGT_OFF:TGT_OFF + TGT_ROWS, :] == oh_cols_t).astype(f32)
        src = (jnp.dot(src_oh, embed, preferred_element_type=f32)
               + th_ref[lay["src_bias"]:lay["src_bias"] + 1, 0:E])
        tgt = jnp.dot(tgt_oh, embed, preferred_element_type=f32)

        # ================= BatchNorm1d(bs): batch statistics ==================
        # TODO(synk): running-stat buffer updates are not modeled (batch stats only).
        inv_cnt = 1.0 / float(T * E)
        sum1 = jnp.dot(seg_bn, tgt, preferred_element_type=f32)               # (B, E)
        sum2 = jnp.dot(seg_bn, tgt * tgt, preferred_element_type=f32)         # (B, E)
        mu = jnp.sum(sum1, axis=-1, keepdims=True) * inv_cnt                  # (B, 1)
        var = jnp.sum(sum2, axis=-1, keepdims=True) * inv_cnt - mu * mu
        bn = th_ref[lay["bn"]:lay["bn"] + B, 0:2]                             # (B, 2)
        scale = bn[:, 0:1] * jax.lax.rsqrt(var + EPS)                         # (B, 1)
        shift = bn[:, 1:2] - mu * scale
        scale_rows = ind0 * scale[0:1, :] + (1.0 - ind0) * scale[1:2, :]      # (B*T, 1)
        shift_rows = ind0 * shift[0:1, :] + (1.0 - ind0) * shift[1:2, :]
        tgt = tgt * scale_rows + shift_rows

        # ============================== encoder ===============================
        # TODO(synk): dropout(p=0.1) omitted (eval-mode forward).
        mem = src
        for li in range(N_ENC):
            mem = layer_norm(mem + mha(f"enc{li}", mem, mem, True, cs, mask_ss),
                             f"enc{li}_n1")
            mem = layer_norm(mem + ffn(mem, f"enc{li}"), f"enc{li}_n2")
        mem = layer_norm(mem, "enc_final")

        # ============================== decoder ===============================
        x = tgt
        for li in range(N_DEC):
            x = layer_norm(x + mha(f"dec{li}_self", x, x, True, ct, mask_tt),
                           f"dec{li}_n1")
            x = layer_norm(x + mha(f"dec{li}_cross", x, mem, False, cs, mask_ts),
                           f"dec{li}_n2")
            x = layer_norm(x + ffn(x, f"dec{li}"), f"dec{li}_n3")
        x = layer_norm(x, "dec_final")

        # ============== tied output projection: x @ embed.T + bias ============
        out_ref[...] = (jax.lax.dot_general(x, embed, (((1,), (1,)), ((), ())),
                                            preferred_element_type=f32)
                        + th_ref[lay["out_b"]:lay["out_b"] + 1, 0:V])

    return kernel


# ------------------------------ forward wrapper -----------------------------

def forward(theta, src_ids, tgt_ids):
    S, b1 = src_ids.shape
    T, b2 = tgt_ids.shape
    assert b1 == BS and b2 == BS
    tgt_off = _align8(BS * S)
    # Batch-major flattening of the token ids (row = b*L + l), tgt 8-aligned.
    ids = jnp.zeros((tgt_off + BS * T, 1), jnp.int32)
    ids = ids.at[0:BS * S, 0].set(
        jnp.transpose(src_ids).reshape(-1).astype(jnp.int32))
    ids = ids.at[tgt_off:tgt_off + BS * T, 0].set(
        jnp.transpose(tgt_ids).reshape(-1).astype(jnp.int32))

    out2d = pl.pallas_call(
        make_kernel(S, T),
        out_shape=jax.ShapeDtypeStruct((BS * T, D_VOCAB), jnp.float32),
        in_specs=[_VMEM, _VMEM],
        out_specs=_VMEM,
    )(ids, theta)

    # (B*T, V) batch-major -> (T, B, V) sequence-first like nn.Transformer.
    return out2d.reshape(BS, T, D_VOCAB).transpose(1, 0, 2)


# ------------------------- parameter init & packing -------------------------

def init_params(key):
    keys = iter(jax.random.split(key, 256))

    def nrm(shape, scale=0.1):
        return jax.random.normal(next(keys), shape, jnp.float32) * scale

    def mha_p():
        return dict(in_w=nrm((3 * D_MODEL, D_MODEL)), in_b=nrm((3 * D_MODEL,)),
                    out_w=nrm((D_MODEL, D_MODEL)), out_b=nrm((D_MODEL,)))

    def ln_p():
        return dict(g=jnp.ones((D_MODEL,), jnp.float32),
                    b=jnp.zeros((D_MODEL,), jnp.float32))

    def enc_layer():
        return dict(self_attn=mha_p(),
                    lin1_w=nrm((D_FF, D_MODEL)), lin1_b=nrm((D_FF,)),
                    lin2_w=nrm((D_MODEL, D_FF)), lin2_b=nrm((D_MODEL,)),
                    norm1=ln_p(), norm2=ln_p())

    def dec_layer():
        return dict(self_attn=mha_p(), cross_attn=mha_p(),
                    lin1_w=nrm((D_FF, D_MODEL)), lin1_b=nrm((D_FF,)),
                    lin2_w=nrm((D_MODEL, D_FF)), lin2_b=nrm((D_MODEL,)),
                    norm1=ln_p(), norm2=ln_p(), norm3=ln_p())

    return dict(
        embed=jax.random.normal(next(keys), (D_VOCAB, D_MODEL), jnp.float32),
        enc_layers=[enc_layer() for _ in range(N_ENC)],
        enc_norm=ln_p(),
        dec_layers=[dec_layer() for _ in range(N_DEC)],
        dec_norm=ln_p(),
        out_b=nrm((D_VOCAB,)),
        bn_g=jnp.ones((BS,), jnp.float32),
        bn_b=jnp.zeros((BS,), jnp.float32),
        vocab_bias=jnp.ones((D_MODEL,), jnp.float32),
        long_buffer=jnp.zeros((D_MODEL,), jnp.int32),
    )


def pack_params(params):
    """Pack every weight into one (rows, 48) f32 slab (single VMEM input).

    Weight matrices are pre-transposed to (in, out) layout, Q/K/V are packed
    as one fused (E, 3E) block, and the 1/sqrt(d_head) query scale is folded
    into the Q weight/bias columns.
    """
    E, F, V = D_MODEL, D_FF, D_VOCAB
    lay = LAYOUT
    th = np.zeros((lay["rows"], WSLAB), np.float32)
    scale = 1.0 / math.sqrt(DHEAD)

    def put_mha(name, p):
        r = lay["mha"][name]
        w = np.asarray(p["in_w"], np.float32)          # (3E, E) torch layout
        bias = np.asarray(p["in_b"], np.float32)       # (3E,)
        th[r:r + E, 0:E] = w[0:E].T * scale
        th[r:r + E, E:2 * E] = w[E:2 * E].T
        th[r:r + E, 2 * E:3 * E] = w[2 * E:3 * E].T
        th[r + E:r + 2 * E, 0:E] = np.asarray(p["out_w"], np.float32).T
        th[r + 2 * E, 0:E] = bias[0:E] * scale
        th[r + 2 * E, E:3 * E] = bias[E:3 * E]
        th[r + 2 * E + 1, 0:E] = np.asarray(p["out_b"], np.float32)

    def put_ffn(name, p):
        r = lay["ffn"][name]
        th[r:r + E, 0:F] = np.asarray(p["lin1_w"], np.float32).T
        th[r + E:r + E + F, 0:E] = np.asarray(p["lin2_w"], np.float32).T
        th[r + E + F, 0:F] = np.asarray(p["lin1_b"], np.float32)
        th[r + E + F, F:F + E] = np.asarray(p["lin2_b"], np.float32)

    def put_ln(name, p):
        r = lay["ln"][name]
        th[r, 0:E] = np.asarray(p["g"], np.float32)
        th[r, E:2 * E] = np.asarray(p["b"], np.float32)

    for li in range(N_ENC):
        lp = params["enc_layers"][li]
        put_mha(f"enc{li}", lp["self_attn"])
        put_ffn(f"enc{li}", lp)
        put_ln(f"enc{li}_n1", lp["norm1"])
        put_ln(f"enc{li}_n2", lp["norm2"])
    put_ln("enc_final", params["enc_norm"])
    for li in range(N_DEC):
        lp = params["dec_layers"][li]
        put_mha(f"dec{li}_self", lp["self_attn"])
        put_mha(f"dec{li}_cross", lp["cross_attn"])
        put_ffn(f"dec{li}", lp)
        put_ln(f"dec{li}_n1", lp["norm1"])
        put_ln(f"dec{li}_n2", lp["norm2"])
        put_ln(f"dec{li}_n3", lp["norm3"])
    put_ln("dec_final", params["dec_norm"])

    r = lay["embed"]
    th[r:r + V, 0:E] = np.asarray(params["embed"], np.float32)
    th[lay["src_bias"], 0:E] = (np.asarray(params["vocab_bias"], np.float32)
                                + np.asarray(params["long_buffer"], np.float32))
    th[lay["out_b"], 0:V] = np.asarray(params["out_b"], np.float32)
    r = lay["bn"]
    th[r:r + BS, 0] = np.asarray(params["bn_g"], np.float32)
    th[r:r + BS, 1] = np.asarray(params["bn_b"], np.float32)
    return jnp.asarray(th)


# ---------------------------------- main ------------------------------------

if __name__ == "__main__":
    params = init_params(jax.random.PRNGKey(0))
    theta = pack_params(params)

    # Same inputs as TransformerWithSharedParams.get_input():
    src_ids = jnp.arange(12, dtype=jnp.int32).reshape(6, BS)        # (6, 2)
    tgt_ids = jnp.arange(BS * 4, dtype=jnp.int32).reshape(4, BS)    # (4, 2)

    out = jax.jit(forward)(theta, src_ids, tgt_ids)
    out = jax.block_until_ready(out)

    assert out.shape == (4, BS, D_VOCAB), out.shape
    assert bool(jnp.all(jnp.isfinite(out)))
    print("KERNEL_OK")
</pallas_src>

<mosaic_0001>
module attributes {stable_mosaic.version = 11 : i64} {
  func.func @kernel(%arg0: memref<24x1xi32, #tpu.memory_space<vmem>>, %arg1: memref<416x48xf32, #tpu.memory_space<vmem>>, %arg2: memref<8x23xf32, #tpu.memory_space<vmem>>) attributes {dimension_semantics = [], scalar_prefetch = 0 : i64, scratch_operands = 0 : i64, tpu.core_type = #tpu.core_type<tc>} {
    %0 = tpu.iota {dimensions = array<i32: 0>} : vector<96x8xi32>
    %1 = tpu.iota {dimensions = array<i32: 1>} : vector<96x8xi32>
    %c12_i32 = arith.constant 12 : i32
    %2 = vector.broadcast %c12_i32 : i32 to vector<96x8xi32>
    %3 = arith.muli %1, %2 : vector<96x8xi32>
    %4 = arith.cmpi sge, %0, %3 : vector<96x8xi32>
    %c1_i32 = arith.constant 1 : i32
    %5 = vector.broadcast %c1_i32 : i32 to vector<96x8xi32>
    %6 = arith.addi %1, %5 : vector<96x8xi32>
    %c12_i32_0 = arith.constant 12 : i32
    %7 = vector.broadcast %c12_i32_0 : i32 to vector<96x8xi32>
    %8 = arith.muli %6, %7 : vector<96x8xi32>
    %9 = arith.cmpi slt, %0, %8 : vector<96x8xi32>
    %10 = arith.andi %4, %9 : vector<96x8xi1>
    %11 = arith.extui %10 : vector<96x8xi1> to vector<96x8xi32>
    %12 = arith.sitofp %11 : vector<96x8xi32> to vector<96x8xf32>
    %13 = tpu.iota {dimensions = array<i32: 0>} : vector<8x96xi32>
    %14 = tpu.iota {dimensions = array<i32: 1>} : vector<8x96xi32>
    %c12_i32_1 = arith.constant 12 : i32
    %15 = vector.broadcast %c12_i32_1 : i32 to vector<8x96xi32>
    %16 = arith.muli %13, %15 : vector<8x96xi32>
    %17 = arith.cmpi sge, %14, %16 : vector<8x96xi32>
    %c1_i32_2 = arith.constant 1 : i32
    %18 = vector.broadcast %c1_i32_2 : i32 to vector<8x96xi32>
    %19 = arith.addi %13, %18 : vector<8x96xi32>
    %c12_i32_3 = arith.constant 12 : i32
    %20 = vector.broadcast %c12_i32_3 : i32 to vector<8x96xi32>
    %21 = arith.muli %19, %20 : vector<8x96xi32>
    %22 = arith.cmpi slt, %14, %21 : vector<8x96xi32>
    %23 = arith.andi %17, %22 : vector<8x96xi1>
    %24 = arith.extui %23 : vector<8x96xi1> to vector<8x96xi32>
    %25 = arith.sitofp %24 : vector<8x96xi32> to vector<8x96xf32>
    %cst = arith.constant dense<0.000000e+00> : vector<96x96xf32>
    %26 = tpu.matmul %12, %25, %cst {dimension_numbers = #tpu.dot_dimension_numbers<[1], [0], [0], [1], [0, 0, 1, 1], [], []>} : vector<96x8xf32>, vector<8x96xf32>, vector<96x96xf32> -> vector<96x96xf32>
    %27 = tpu.iota {dimensions = array<i32: 0>} : vector<8x16xi32>
    %28 = tpu.iota {dimensions = array<i32: 1>} : vector<8x16xi32>
    %c2_i32 = arith.constant 2 : i32
    %29 = vector.broadcast %c2_i32 : i32 to vector<8x16xi32>
    %30 = arith.muli %27, %29 : vector<8x16xi32>
    %31 = arith.cmpi sge, %28, %30 : vector<8x16xi32>
    %c1_i32_4 = arith.constant 1 : i32
    %32 = vector.broadcast %c1_i32_4 : i32 to vector<8x16xi32>
    %33 = arith.addi %27, %32 : vector<8x16xi32>
    %c2_i32_5 = arith.constant 2 : i32
    %34 = vector.broadcast %c2_i32_5 : i32 to vector<8x16xi32>
    %35 = arith.muli %33, %34 : vector<8x16xi32>
    %36 = arith.cmpi slt, %28, %35 : vector<8x16xi32>
    %37 = arith.andi %31, %36 : vector<8x16xi1>
    %38 = arith.extui %37 : vector<8x16xi1> to vector<8x16xi32>
    %39 = arith.sitofp %38 : vector<8x16xi32> to vector<8x16xf32>
    %cst_6 = arith.constant dense<0.000000e+00> : vector<96x16xf32>
    %40 = tpu.matmul %12, %39, %cst_6 {dimension_numbers = #tpu.dot_dimension_numbers<[1], [0], [0], [1], [0, 0, 1, 1], [], []>} : vector<96x8xf32>, vector<8x16xf32>, vector<96x16xf32> -> vector<96x16xf32>
    %41 = tpu.iota {dimensions = array<i32: 1>} : vector<96x8xi32>
    %42 = arith.sitofp %41 : vector<96x8xi32> to vector<96x8xf32>
    %43 = arith.mulf %12, %42 : vector<96x8xf32>
    %cst_7 = arith.constant dense<0.000000e+00> : vector<96xf32>
    %44 = vector.multi_reduction <add>, %43, %cst_7 [1] : vector<96x8xf32> to vector<96xf32>
    %45 = vector.shape_cast %44 : vector<96xf32> to vector<96x1xf32>
    %46 = tpu.iota {dimensions = array<i32: 0>} : vector<96x1xi32>
    %47 = arith.sitofp %46 : vector<96x1xi32> to vector<96x1xf32>
    %cst_8 = arith.constant 1.200000e+01 : f32
    %48 = vector.broadcast %cst_8 : f32 to vector<96x1xf32>
    %49 = arith.mulf %45, %48 : vector<96x1xf32>
    %50 = arith.subf %47, %49 : vector<96x1xf32>
    %51 = tpu.iota {dimensions = array<i32: 1>} : vector<96x12xi32>
    %52 = arith.sitofp %51 : vector<96x12xi32> to vector<96x12xf32>
    %53 = vector.broadcast %50 : vector<96x1xf32> to vector<96x12xf32>
    %54 = arith.cmpf oeq, %53, %52 : vector<96x12xf32>
    %55 = arith.extui %54 : vector<96x12xi1> to vector<96x12xi32>
    %56 = arith.sitofp %55 : vector<96x12xi32> to vector<96x12xf32>
    %c12_i32_9 = arith.constant 12 : i32
    %57 = vector.broadcast %c12_i32_9 : i32 to vector<8x96xi32>
    %58 = arith.muli %13, %57 : vector<8x96xi32>
    %c6_i32 = arith.constant 6 : i32
    %59 = vector.broadcast %c6_i32 : i32 to vector<8x96xi32>
    %60 = arith.addi %58, %59 : vector<8x96xi32>
    %61 = arith.cmpi sge, %14, %60 : vector<8x96xi32>
    %c1_i32_10 = arith.constant 1 : i32
    %62 = vector.broadcast %c1_i32_10 : i32 to vector<8x96xi32>
    %63 = arith.addi %13, %62 : vector<8x96xi32>
    %c12_i32_11 = arith.constant 12 : i32
    %64 = vector.broadcast %c12_i32_11 : i32 to vector<8x96xi32>
    %65 = arith.muli %63, %64 : vector<8x96xi32>
    %66 = arith.cmpi slt, %14, %65 : vector<8x96xi32>
    %67 = arith.andi %61, %66 : vector<8x96xi1>
    %68 = arith.extui %67 : vector<8x96xi1> to vector<8x96xi32>
    %69 = arith.sitofp %68 : vector<8x96xi32> to vector<8x96xf32>
    %cst_12 = arith.constant dense<0.000000e+00> : vector<96xf32>
    %70 = vector.multi_reduction <add>, %69, %cst_12 [0] : vector<8x96xf32> to vector<96xf32>
    %71 = vector.shape_cast %70 : vector<96xf32> to vector<1x96xf32>
    %72 = tpu.iota {dimensions = array<i32: 0>} : vector<64x8xi32>
    %73 = tpu.iota {dimensions = array<i32: 1>} : vector<64x8xi32>
    %c8_i32 = arith.constant 8 : i32
    %74 = vector.broadcast %c8_i32 : i32 to vector<64x8xi32>
    %75 = arith.muli %73, %74 : vector<64x8xi32>
    %76 = arith.cmpi sge, %72, %75 : vector<64x8xi32>
    %c1_i32_13 = arith.constant 1 : i32
    %77 = vector.broadcast %c1_i32_13 : i32 to vector<64x8xi32>
    %78 = arith.addi %73, %77 : vector<64x8xi32>
    %c8_i32_14 = arith.constant 8 : i32
    %79 = vector.broadcast %c8_i32_14 : i32 to vector<64x8xi32>
    %80 = arith.muli %78, %79 : vector<64x8xi32>
    %81 = arith.cmpi slt, %72, %80 : vector<64x8xi32>
    %82 = arith.andi %76, %81 : vector<64x8xi1>
    %83 = arith.extui %82 : vector<64x8xi1> to vector<64x8xi32>
    %84 = arith.sitofp %83 : vector<64x8xi32> to vector<64x8xf32>
    %85 = tpu.iota {dimensions = array<i32: 0>} : vector<8x64xi32>
    %86 = tpu.iota {dimensions = array<i32: 1>} : vector<8x64xi32>
    %c8_i32_15 = arith.constant 8 : i32
    %87 = vector.broadcast %c8_i32_15 : i32 to vector<8x64xi32>
    %88 = arith.muli %85, %87 : vector<8x64xi32>
    %89 = arith.cmpi sge, %86, %88 : vector<8x64xi32>
    %c1_i32_16 = arith.constant 1 : i32
    %90 = vector.broadcast %c1_i32_16 : i32 to vector<8x64xi32>
    %91 = arith.addi %85, %90 : vector<8x64xi32>
    %c8_i32_17 = arith.constant 8 : i32
    %92 = vector.broadcast %c8_i32_17 : i32 to vector<8x64xi32>
    %93 = arith.muli %91, %92 : vector<8x64xi32>
    %94 = arith.cmpi slt, %86, %93 : vector<8x64xi32>
    %95 = arith.andi %89, %94 : vector<8x64xi1>
    %96 = arith.extui %95 : vector<8x64xi1> to vector<8x64xi32>
    %97 = arith.sitofp %96 : vector<8x64xi32> to vector<8x64xf32>
    %cst_18 = arith.constant dense<0.000000e+00> : vector<64x64xf32>
    %98 = tpu.matmul %84, %97, %cst_18 {dimension_numbers = #tpu.dot_dimension_numbers<[1], [0], [0], [1], [0, 0, 1, 1], [], []>} : vector<64x8xf32>, vector<8x64xf32>, vector<64x64xf32> -> vector<64x64xf32>
    %99 = tpu.iota {dimensions = array<i32: 0>} : vector<8x16xi32>
    %100 = tpu.iota {dimensions = array<i32: 1>} : vector<8x16xi32>
    %c2_i32_19 = arith.constant 2 : i32
    %101 = vector.broadcast %c2_i32_19 : i32 to vector<8x16xi32>
    %102 = arith.muli %99, %101 : vector<8x16xi32>
    %103 = arith.cmpi sge, %100, %102 : vector<8x16xi32>
    %c1_i32_20 = arith.constant 1 : i32
    %104 = vector.broadcast %c1_i32_20 : i32 to vector<8x16xi32>
    %105 = arith.addi %99, %104 : vector<8x16xi32>
    %c2_i32_21 = arith.constant 2 : i32
    %106 = vector.broadcast %c2_i32_21 : i32 to vector<8x16xi32>
    %107 = arith.muli %105, %106 : vector<8x16xi32>
    %108 = arith.cmpi slt, %100, %107 : vector<8x16xi32>
    %109 = arith.andi %103, %108 : vector<8x16xi1>
    %110 = arith.extui %109 : vector<8x16xi1> to vector<8x16xi32>
    %111 = arith.sitofp %110 : vector<8x16xi32> to vector<8x16xf32>
    %cst_22 = arith.constant dense<0.000000e+00> : vector<64x16xf32>
    %112 = tpu.matmul %84, %111, %cst_22 {dimension_numbers = #tpu.dot_dimension_numbers<[1], [0], [0], [1], [0, 0, 1, 1], [], []>} : vector<64x8xf32>, vector<8x16xf32>, vector<64x16xf32> -> vector<64x16xf32>
    %113 = tpu.iota {dimensions = array<i32: 1>} : vector<64x8xi32>
    %114 = arith.sitofp %113 : vector<64x8xi32> to vector<64x8xf32>
    %115 = arith.mulf %84, %114 : vector<64x8xf32>
    %cst_23 = arith.constant dense<0.000000e+00> : vector<64xf32>
    %116 = vector.multi_reduction <add>, %115, %cst_23 [1] : vector<64x8xf32> to vector<64xf32>
    %117 = vector.shape_cast %116 : vector<64xf32> to vector<64x1xf32>
    %118 = tpu.iota {dimensions = array<i32: 0>} : vector<64x1xi32>
    %119 = arith.sitofp %118 : vector<64x1xi32> to vector<64x1xf32>
    %cst_24 = arith.constant 8.000000e+00 : f32
    %120 = vector.broadcast %cst_24 : f32 to vector<64x1xf32>
    %121 = arith.mulf %117, %120 : vector<64x1xf32>
    %122 = arith.subf %119, %121 : vector<64x1xf32>
    %123 = tpu.iota {dimensions = array<i32: 1>} : vector<64x8xi32>
    %124 = arith.sitofp %123 : vector<64x8xi32> to vector<64x8xf32>
    %125 = vector.broadcast %122 : vector<64x1xf32> to vector<64x8xf32>
    %126 = arith.cmpf oeq, %125, %124 : vector<64x8xf32>
    %127 = arith.extui %126 : vector<64x8xi1> to vector<64x8xi32>
    %128 = arith.sitofp %127 : vector<64x8xi32> to vector<64x8xf32>
    %c8_i32_25 = arith.constant 8 : i32
    %129 = vector.broadcast %c8_i32_25 : i32 to vector<8x64xi32>
    %130 = arith.muli %85, %129 : vector<8x64xi32>
    %c4_i32 = arith.constant 4 : i32
    %131 = vector.broadcast %c4_i32 : i32 to vector<8x64xi32>
    %132 = arith.addi %130, %131 : vector<8x64xi32>
    %133 = arith.cmpi sge, %86, %132 : vector<8x64xi32>
    %c1_i32_26 = arith.constant 1 : i32
    %134 = vector.broadcast %c1_i32_26 : i32 to vector<8x64xi32>
    %135 = arith.addi %85, %134 : vector<8x64xi32>
    %c8_i32_27 = arith.constant 8 : i32
    %136 = vector.broadcast %c8_i32_27 : i32 to vector<8x64xi32>
    %137 = arith.muli %135, %136 : vector<8x64xi32>
    %138 = arith.cmpi slt, %86, %137 : vector<8x64xi32>
    %139 = arith.andi %133, %138 : vector<8x64xi1>
    %140 = arith.extui %139 : vector<8x64xi1> to vector<8x64xi32>
    %141 = arith.sitofp %140 : vector<8x64xi32> to vector<8x64xf32>
    %cst_28 = arith.constant dense<0.000000e+00> : vector<64xf32>
    %142 = vector.multi_reduction <add>, %141, %cst_28 [0] : vector<8x64xf32> to vector<64xf32>
    %143 = vector.shape_cast %142 : vector<64xf32> to vector<1x64xf32>
    %144 = tpu.iota {dimensions = array<i32: 0>} : vector<12x1xi32>
    %c6_i32_29 = arith.constant 6 : i32
    %145 = vector.broadcast %c6_i32_29 : i32 to vector<12x1xi32>
    %146 = arith.cmpi sge, %144, %145 : vector<12x1xi32>
    %147 = arith.extui %146 : vector<12x1xi1> to vector<12x1xi32>
    %148 = arith.sitofp %147 : vector<12x1xi32> to vector<12x1xf32>
    %149 = vector.broadcast %148 : vector<12x1xf32> to vector<12x96xf32>
    %150 = vector.broadcast %71 : vector<1x96xf32> to vector<12x96xf32>
    %151 = arith.mulf %149, %150 : vector<12x96xf32>
    %cst_30 = arith.constant 1.000000e+00 : f32
    %152 = vector.broadcast %cst_30 : f32 to vector<12x1xf32>
    %153 = arith.subf %152, %148 : vector<12x1xf32>
    %cst_31 = arith.constant 1.000000e+00 : f32
    %154 = vector.broadcast %cst_31 : f32 to vector<1x96xf32>
    %155 = arith.subf %154, %71 : vector<1x96xf32>
    %156 = vector.broadcast %153 : vector<12x1xf32> to vector<12x96xf32>
    %157 = vector.broadcast %155 : vector<1x96xf32> to vector<12x96xf32>
    %158 = arith.mulf %156, %157 : vector<12x96xf32>
    %159 = arith.addf %151, %158 : vector<12x96xf32>
    %cst_32 = arith.constant 5.000000e-01 : f32
    %160 = vector.broadcast %cst_32 : f32 to vector<12x96xf32>
    %161 = arith.cmpf ogt, %159, %160 : vector<12x96xf32>
    %162 = tpu.iota {dimensions = array<i32: 0>} : vector<8x1xi32>
    %c4_i32_33 = arith.constant 4 : i32
    %163 = vector.broadcast %c4_i32_33 : i32 to vector<8x1xi32>
    %164 = arith.cmpi sge, %162, %163 : vector<8x1xi32>
    %165 = arith.extui %164 : vector<8x1xi1> to vector<8x1xi32>
    %166 = arith.sitofp %165 : vector<8x1xi32> to vector<8x1xf32>
    %167 = vector.broadcast %166 : vector<8x1xf32> to vector<8x64xf32>
    %168 = vector.broadcast %143 : vector<1x64xf32> to vector<8x64xf32>
    %169 = arith.mulf %167, %168 : vector<8x64xf32>
    %cst_34 = arith.constant 1.000000e+00 : f32
    %170 = vector.broadcast %cst_34 : f32 to vector<8x1xf32>
    %171 = arith.subf %170, %166 : vector<8x1xf32>
    %cst_35 = arith.constant 1.000000e+00 : f32
    %172 = vector.broadcast %cst_35 : f32 to vector<1x64xf32>
    %173 = arith.subf %172, %143 : vector<1x64xf32>
    %174 = vector.broadcast %171 : vector<8x1xf32> to vector<8x64xf32>
    %175 = vector.broadcast %173 : vector<1x64xf32> to vector<8x64xf32>
    %176 = arith.mulf %174, %175 : vector<8x64xf32>
    %177 = arith.addf %169, %176 : vector<8x64xf32>
    %cst_36 = arith.constant 5.000000e-01 : f32
    %178 = vector.broadcast %cst_36 : f32 to vector<8x64xf32>
    %179 = arith.cmpf ogt, %177, %178 : vector<8x64xf32>
    %180 = tpu.iota {dimensions = array<i32: 0>} : vector<8x1xi32>
    %c4_i32_37 = arith.constant 4 : i32
    %181 = vector.broadcast %c4_i32_37 : i32 to vector<8x1xi32>
    %182 = arith.cmpi sge, %180, %181 : vector<8x1xi32>
    %183 = arith.extui %182 : vector<8x1xi1> to vector<8x1xi32>
    %184 = arith.sitofp %183 : vector<8x1xi32> to vector<8x1xf32>
    %185 = vector.broadcast %184 : vector<8x1xf32> to vector<8x96xf32>
    %186 = vector.broadcast %71 : vector<1x96xf32> to vector<8x96xf32>
    %187 = arith.mulf %185, %186 : vector<8x96xf32>
    %cst_38 = arith.constant 1.000000e+00 : f32
    %188 = vector.broadcast %cst_38 : f32 to vector<8x1xf32>
    %189 = arith.subf %188, %184 : vector<8x1xf32>
    %cst_39 = arith.constant 1.000000e+00 : f32
    %190 = vector.broadcast %cst_39 : f32 to vector<1x96xf32>
    %191 = arith.subf %190, %71 : vector<1x96xf32>
    %192 = vector.broadcast %189 : vector<8x1xf32> to vector<8x96xf32>
    %193 = vector.broadcast %191 : vector<1x96xf32> to vector<8x96xf32>
    %194 = arith.mulf %192, %193 : vector<8x96xf32>
    %195 = arith.addf %187, %194 : vector<8x96xf32>
    %cst_40 = arith.constant 5.000000e-01 : f32
    %196 = vector.broadcast %cst_40 : f32 to vector<8x96xf32>
    %197 = arith.cmpf ogt, %195, %196 : vector<8x96xf32>
    %198 = tpu.iota {dimensions = array<i32: 1>} : vector<12x23xi32>
    %199 = tpu.iota {dimensions = array<i32: 1>} : vector<8x23xi32>
    %200 = tpu.iota {dimensions = array<i32: 0>} : vector<2x8xi32>
    %201 = tpu.iota {dimensions = array<i32: 1>} : vector<2x8xi32>
    %c4_i32_41 = arith.constant 4 : i32
    %202 = vector.broadcast %c4_i32_41 : i32 to vector<2x8xi32>
    %203 = arith.muli %200, %202 : vector<2x8xi32>
    %204 = arith.cmpi sge, %201, %203 : vector<2x8xi32>
    %c1_i32_42 = arith.constant 1 : i32
    %205 = vector.broadcast %c1_i32_42 : i32 to vector<2x8xi32>
    %206 = arith.addi %200, %205 : vector<2x8xi32>
    %c4_i32_43 = arith.constant 4 : i32
    %207 = vector.broadcast %c4_i32_43 : i32 to vector<2x8xi32>
    %208 = arith.muli %206, %207 : vector<2x8xi32>
    %209 = arith.cmpi slt, %201, %208 : vector<2x8xi32>
    %210 = arith.andi %204, %209 : vector<2x8xi1>
    %211 = arith.extui %210 : vector<2x8xi1> to vector<2x8xi32>
    %212 = arith.sitofp %211 : vector<2x8xi32> to vector<2x8xf32>
    %213 = tpu.iota {dimensions = array<i32: 0>} : vector<8x1xi32>
    %c4_i32_44 = arith.constant 4 : i32
    %214 = vector.broadcast %c4_i32_44 : i32 to vector<8x1xi32>
    %215 = arith.cmpi slt, %213, %214 : vector<8x1xi32>
    %216 = arith.extui %215 : vector<8x1xi1> to vector<8x1xi32>
    %217 = arith.sitofp %216 : vector<8x1xi32> to vector<8x1xf32>
    %c376 = arith.constant 376 : index
    %c0 = arith.constant 0 : index
    %218 = vector.load %arg1[%c376, %c0] : memref<416x48xf32, #tpu.memory_space<vmem>>, vector<23x16xf32>
    %c0_45 = arith.constant 0 : index
    %c0_46 = arith.constant 0 : index
    %219 = vector.load %arg0[%c0_45, %c0_46] : memref<24x1xi32, #tpu.memory_space<vmem>>, vector<12x1xi32>
    %220 = vector.broadcast %219 : vector<12x1xi32> to vector<12x23xi32>
    %221 = arith.cmpi eq, %220, %198 : vector<12x23xi32>
    %222 = arith.extui %221 : vector<12x23xi1> to vector<12x23xi32>
    %223 = arith.sitofp %222 : vector<12x23xi32> to vector<12x23xf32>
    %c16 = arith.constant 16 : index
    %c0_47 = arith.constant 0 : index
    %224 = vector.load %arg0[%c16, %c0_47] : memref<24x1xi32, #tpu.memory_space<vmem>>, vector<8x1xi32>
    %225 = vector.broadcast %224 : vector<8x1xi32> to vector<8x23xi32>
    %226 = arith.cmpi eq, %225, %199 : vector<8x23xi32>
    %227 = arith.extui %226 : vector<8x23xi1> to vector<8x23xi32>
    %228 = arith.sitofp %227 : vector<8x23xi32> to vector<8x23xf32>
    %cst_48 = arith.constant dense<0.000000e+00> : vector<12x16xf32>
    %229 = tpu.matmul %223, %218, %cst_48 {dimension_numbers = #tpu.dot_dimension_numbers<[1], [0], [0], [1], [0, 0, 1, 1], [], []>} : vector<12x23xf32>, vector<23x16xf32>, vector<12x16xf32> -> vector<12x16xf32>
    %c399 = arith.constant 399 : index
    %c0_49 = arith.constant 0 : index
    %230 = vector.load %arg1[%c399, %c0_49] : memref<416x48xf32, #tpu.memory_space<vmem>>, vector<1x16xf32>
    %231 = vector.broadcast %230 : vector<1x16xf32> to vector<12x16xf32>
    %232 = arith.addf %229, %231 : vector<12x16xf32>
    %cst_50 = arith.constant dense<0.000000e+00> : vector<8x16xf32>
    %233 = tpu.matmul %228, %218, %cst_50 {dimension_numbers = #tpu.dot_dimension_numbers<[1], [0], [0], [1], [0, 0, 1, 1], [], []>} : vector<8x23xf32>, vector<23x16xf32>, vector<8x16xf32> -> vector<8x16xf32>
    %cst_51 = arith.constant dense<0.000000e+00> : vector<2x16xf32>
    %234 = tpu.matmul %212, %233, %cst_51 {dimension_numbers = #tpu.dot_dimension_numbers<[1], [0], [0], [1], [0, 0, 1, 1], [], []>} : vector<2x8xf32>, vector<8x16xf32>, vector<2x16xf32> -> vector<2x16xf32>
    %235 = arith.mulf %233, %233 : vector<8x16xf32>
    %cst_52 = arith.constant dense<0.000000e+00> : vector<2x16xf32>
    %236 = tpu.matmul %212, %235, %cst_52 {dimension_numbers = #tpu.dot_dimension_numbers<[1], [0], [0], [1], [0, 0, 1, 1], [], []>} : vector<2x8xf32>, vector<8x16xf32>, vector<2x16xf32> -> vector<2x16xf32>
    %cst_53 = arith.constant dense<0.000000e+00> : vector<2xf32>
    %237 = vector.multi_reduction <add>, %234, %cst_53 [1] : vector<2x16xf32> to vector<2xf32>
    %238 = vector.shape_cast %237 : vector<2xf32> to vector<2x1xf32>
    %cst_54 = arith.constant 1.562500e-02 : f32
    %239 = vector.broadcast %cst_54 : f32 to vector<2x1xf32>
    %240 = arith.mulf %238, %239 : vector<2x1xf32>
    %cst_55 = arith.constant dense<0.000000e+00> : vector<2xf32>
    %241 = vector.multi_reduction <add>, %236, %cst_55 [1] : vector<2x16xf32> to vector<2xf32>
    %242 = vector.shape_cast %241 : vector<2xf32> to vector<2x1xf32>
    %cst_56 = arith.constant 1.562500e-02 : f32
    %243 = vector.broadcast %cst_56 : f32 to vector<2x1xf32>
    %244 = arith.mulf %242, %243 : vector<2x1xf32>
    %245 = arith.mulf %240, %240 : vector<2x1xf32>
    %246 = arith.subf %244, %245 : vector<2x1xf32>
    %c408 = arith.constant 408 : index
    %c0_57 = arith.constant 0 : index
    %247 = vector.load %arg1[%c408, %c0_57] : memref<416x48xf32, #tpu.memory_space<vmem>>, vector<2x2xf32>
    %248 = vector.extract_strided_slice %247 {offsets = [0, 0], sizes = [2, 1], strides = [1, 1]} : vector<2x2xf32> to vector<2x1xf32>
    %cst_58 = arith.constant 9.99999974E-6 : f32
    %249 = vector.broadcast %cst_58 : f32 to vector<2x1xf32>
    %250 = arith.addf %246, %249 : vector<2x1xf32>
    %251 = math.rsqrt %250 : vector<2x1xf32>
    %252 = arith.mulf %248, %251 : vector<2x1xf32>
    %253 = vector.extract_strided_slice %247 {offsets = [0, 1], sizes = [2, 1], strides = [1, 1]} : vector<2x2xf32> to vector<2x1xf32>
    %254 = arith.mulf %240, %252 : vector<2x1xf32>
    %255 = arith.subf %253, %254 : vector<2x1xf32>
    %256 = vector.extract_strided_slice %252 {offsets = [0, 0], sizes = [1, 1], strides = [1, 1]} : vector<2x1xf32> to vector<1x1xf32>
    %257 = vector.broadcast %256 : vector<1x1xf32> to vector<8x1xf32>
    %258 = arith.mulf %217, %257 : vector<8x1xf32>
    %cst_59 = arith.constant 1.000000e+00 : f32
    %259 = vector.broadcast %cst_59 : f32 to vector<8x1xf32>
    %260 = arith.subf %259, %217 : vector<8x1xf32>
    %261 = vector.extract_strided_slice %252 {offsets = [1, 0], sizes = [1, 1], strides = [1, 1]} : vector<2x1xf32> to vector<1x1xf32>
    %262 = vector.broadcast %261 : vector<1x1xf32> to vector<8x1xf32>
    %263 = arith.mulf %260, %262 : vector<8x1xf32>
    %264 = arith.addf %258, %263 : vector<8x1xf32>
    %265 = vector.extract_strided_slice %255 {offsets = [0, 0], sizes = [1, 1], strides = [1, 1]} : vector<2x1xf32> to vector<1x1xf32>
    %266 = vector.broadcast %265 : vector<1x1xf32> to vector<8x1xf32>
    %267 = arith.mulf %217, %266 : vector<8x1xf32>
    %cst_60 = arith.constant 1.000000e+00 : f32
    %268 = vector.broadcast %cst_60 : f32 to vector<8x1xf32>
    %269 = arith.subf %268, %217 : vector<8x1xf32>
    %270 = vector.extract_strided_slice %255 {offsets = [1, 0], sizes = [1, 1], strides = [1, 1]} : vector<2x1xf32> to vector<1x1xf32>
    %271 = vector.broadcast %270 : vector<1x1xf32> to vector<8x1xf32>
    %272 = arith.mulf %269, %271 : vector<8x1xf32>
    %273 = arith.addf %267, %272 : vector<8x1xf32>
    %274 = vector.broadcast %264 : vector<8x1xf32> to vector<8x16xf32>
    %275 = arith.mulf %233, %274 : vector<8x16xf32>
    %276 = vector.broadcast %273 : vector<8x1xf32> to vector<8x16xf32>
    %277 = arith.addf %275, %276 : vector<8x16xf32>
    %c0_61 = arith.constant 0 : index
    %c0_62 = arith.constant 0 : index
    %278 = vector.load %arg1[%c0_61, %c0_62] : memref<416x48xf32, #tpu.memory_space<vmem>>, vector<16x48xf32>
    %c16_63 = arith.constant 16 : index
    %c0_64 = arith.constant 0 : index
    %279 = vector.load %arg1[%c16_63, %c0_64] : memref<416x48xf32, #tpu.memory_space<vmem>>, vector<16x16xf32>
    %c32 = arith.constant 32 : index
    %c0_65 = arith.constant 0 : index
    %280 = vector.load %arg1[%c32, %c0_65] : memref<416x48xf32, #tpu.memory_space<vmem>>, vector<1x48xf32>
    %c33 = arith.constant 33 : index
    %c0_66 = arith.constant 0 : index
    %281 = vector.load %arg1[%c33, %c0_66] : memref<416x48xf32, #tpu.memory_space<vmem>>, vector<1x16xf32>
    %cst_67 = arith.constant dense<0.000000e+00> : vector<12x48xf32>
    %282 = tpu.matmul %232, %278, %cst_67 {dimension_numbers = #tpu.dot_dimension_numbers<[1], [0], [0], [1], [0, 0, 1, 1], [], []>} : vector<12x16xf32>, vector<16x48xf32>, vector<12x48xf32> -> vector<12x48xf32>
    %283 = vector.broadcast %280 : vector<1x48xf32> to vector<12x48xf32>
    %284 = arith.addf %282, %283 : vector<12x48xf32>
    %285 = vector.extract_strided_slice %284 {offsets = [0, 0], sizes = [12, 16], strides = [1, 1]} : vector<12x48xf32> to vector<12x16xf32>
    %286 = vector.extract_strided_slice %284 {offsets = [0, 16], sizes = [12, 32], strides = [1, 1]} : vector<12x48xf32> to vector<12x32xf32>
    %cst_68 = arith.constant dense<0.000000e+00> : vector<96x32xf32>
    %287 = tpu.matmul %56, %286, %cst_68 {dimension_numbers = #tpu.dot_dimension_numbers<[1], [0], [0], [1], [0, 0, 1, 1], [], []>} : vector<96x12xf32>, vector<12x32xf32>, vector<96x32xf32> -> vector<96x32xf32>
    %288 = vector.extract_strided_slice %287 {offsets = [0, 0], sizes = [96, 16], strides = [1, 1]} : vector<96x32xf32> to vector<96x16xf32>
    %289 = arith.mulf %288, %40 : vector<96x16xf32>
    %290 = vector.extract_strided_slice %287 {offsets = [0, 16], sizes = [96, 16], strides = [1, 1]} : vector<96x32xf32> to vector<96x16xf32>
    %291 = arith.mulf %290, %40 : vector<96x16xf32>
    %cst_69 = arith.constant dense<0.000000e+00> : vector<12x96xf32>
    %292 = tpu.matmul %285, %289, %cst_69 {dimension_numbers = #tpu.dot_dimension_numbers<[1], [1], [0], [0], [0, 0, 1, 0], [], []>} : vector<12x16xf32>, vector<96x16xf32>, vector<12x96xf32> -> vector<12x96xf32>
    %cst_70 = arith.constant -1.000000e+30 : f32
    %293 = vector.broadcast %cst_70 : f32 to vector<12x96xf32>
    %294 = arith.select %161, %292, %293 : vector<12x96xi1>, vector<12x96xf32>
    %cst_71 = arith.constant dense<0xFF800000> : vector<12xf32>
    %295 = vector.multi_reduction <maximumf>, %294, %cst_71 [1] : vector<12x96xf32> to vector<12xf32>
    %296 = vector.shape_cast %295 : vector<12xf32> to vector<12x1xf32>
    %297 = vector.broadcast %296 : vector<12x1xf32> to vector<12x96xf32>
    %298 = arith.subf %292, %297 : vector<12x96xf32>
    %299 = math.exp %298 : vector<12x96xf32>
    %cst_72 = arith.constant 0.000000e+00 : f32
    %300 = vector.broadcast %cst_72 : f32 to vector<12x96xf32>
    %301 = arith.select %161, %299, %300 : vector<12x96xi1>, vector<12x96xf32>
    %cst_73 = arith.constant dense<0.000000e+00> : vector<12x96xf32>
    %302 = tpu.matmul %301, %26, %cst_73 {dimension_numbers = #tpu.dot_dimension_numbers<[1], [0], [0], [1], [0, 0, 1, 1], [], []>} : vector<12x96xf32>, vector<96x96xf32>, vector<12x96xf32> -> vector<12x96xf32>
    %303 = tpu.reciprocal %302 {approx = true} : vector<12x96xf32> -> vector<12x96xf32>
    %304 = arith.mulf %301, %303 : vector<12x96xf32>
    %cst_74 = arith.constant dense<0.000000e+00> : vector<12x16xf32>
    %305 = tpu.matmul %304, %291, %cst_74 {dimension_numbers = #tpu.dot_dimension_numbers<[1], [0], [0], [1], [0, 0, 1, 1], [], []>} : vector<12x96xf32>, vector<96x16xf32>, vector<12x16xf32> -> vector<12x16xf32>
    %cst_75 = arith.constant dense<0.000000e+00> : vector<12x16xf32>
    %306 = tpu.matmul %305, %279, %cst_75 {dimension_numbers = #tpu.dot_dimension_numbers<[1], [0], [0], [1], [0, 0, 1, 1], [], []>} : vector<12x16xf32>, vector<16x16xf32>, vector<12x16xf32> -> vector<12x16xf32>
    %307 = vector.broadcast %281 : vector<1x16xf32> to vector<12x16xf32>
    %308 = arith.addf %306, %307 : vector<12x16xf32>
    %309 = arith.addf %232, %308 : vector<12x16xf32>
    %c361 = arith.constant 361 : index
    %c0_76 = arith.constant 0 : index
    %310 = vector.load %arg1[%c361, %c0_76] : memref<416x48xf32, #tpu.memory_space<vmem>>, vector<1x32xf32>
    %cst_77 = arith.constant dense<0.000000e+00> : vector<12xf32>
    %311 = vector.multi_reduction <add>, %309, %cst_77 [1] : vector<12x16xf32> to vector<12xf32>
    %312 = vector.shape_cast %311 : vector<12xf32> to vector<12x1xf32>
    %cst_78 = arith.constant 1.600000e+01 : f32
    %313 = vector.broadcast %cst_78 : f32 to vector<12x1xf32>
    %314 = arith.divf %312, %313 : vector<12x1xf32>
    %315 = vector.broadcast %314 : vector<12x1xf32> to vector<12x16xf32>
    %316 = arith.subf %309, %315 : vector<12x16xf32>
    %317 = arith.mulf %316, %316 : vector<12x16xf32>
    %cst_79 = arith.constant dense<0.000000e+00> : vector<12xf32>
    %318 = vector.multi_reduction <add>, %317, %cst_79 [1] : vector<12x16xf32> to vector<12xf32>
    %319 = vector.shape_cast %318 : vector<12xf32> to vector<12x1xf32>
    %cst_80 = arith.constant 1.600000e+01 : f32
    %320 = vector.broadcast %cst_80 : f32 to vector<12x1xf32>
    %321 = arith.divf %319, %320 : vector<12x1xf32>
    %322 = vector.broadcast %314 : vector<12x1xf32> to vector<12x16xf32>
    %323 = arith.subf %309, %322 : vector<12x16xf32>
    %cst_81 = arith.constant 9.99999974E-6 : f32
    %324 = vector.broadcast %cst_81 : f32 to vector<12x1xf32>
    %325 = arith.addf %321, %324 : vector<12x1xf32>
    %326 = math.rsqrt %325 : vector<12x1xf32>
    %327 = vector.broadcast %326 : vector<12x1xf32> to vector<12x16xf32>
    %328 = arith.mulf %323, %327 : vector<12x16xf32>
    %329 = vector.extract_strided_slice %310 {offsets = [0, 0], sizes = [1, 16], strides = [1, 1]} : vector<1x32xf32> to vector<1x16xf32>
    %330 = vector.broadcast %329 : vector<1x16xf32> to vector<12x16xf32>
    %331 = arith.mulf %328, %330 : vector<12x16xf32>
    %332 = vector.extract_strided_slice %310 {offsets = [0, 16], sizes = [1, 16], strides = [1, 1]} : vector<1x32xf32> to vector<1x16xf32>
    %333 = vector.broadcast %332 : vector<1x16xf32> to vector<12x16xf32>
    %334 = arith.addf %331, %333 : vector<12x16xf32>
    %c240 = arith.constant 240 : index
    %c0_82 = arith.constant 0 : index
    %335 = vector.load %arg1[%c240, %c0_82] : memref<416x48xf32, #tpu.memory_space<vmem>>, vector<16x8xf32>
    %c256 = arith.constant 256 : index
    %c0_83 = arith.constant 0 : index
    %336 = vector.load %arg1[%c256, %c0_83] : memref<416x48xf32, #tpu.memory_space<vmem>>, vector<8x16xf32>
    %c264 = arith.constant 264 : index
    %c0_84 = arith.constant 0 : index
    %337 = vector.load %arg1[%c264, %c0_84] : memref<416x48xf32, #tpu.memory_space<vmem>>, vector<1x48xf32>
    %cst_85 = arith.constant dense<0.000000e+00> : vector<12x8xf32>
    %338 = tpu.matmul %334, %335, %cst_85 {dimension_numbers = #tpu.dot_dimension_numbers<[1], [0], [0], [1], [0, 0, 1, 1], [], []>} : vector<12x16xf32>, vector<16x8xf32>, vector<12x8xf32> -> vector<12x8xf32>
    %339 = vector.extract_strided_slice %337 {offsets = [0, 0], sizes = [1, 8], strides = [1, 1]} : vector<1x48xf32> to vector<1x8xf32>
    %340 = vector.broadcast %339 : vector<1x8xf32> to vector<12x8xf32>
    %341 = arith.addf %338, %340 : vector<12x8xf32>
    %cst_86 = arith.constant 0.000000e+00 : f32
    %342 = vector.broadcast %cst_86 : f32 to vector<12x8xf32>
    %343 = arith.maximumf %341, %342 : vector<12x8xf32>
    %cst_87 = arith.constant dense<0.000000e+00> : vector<12x16xf32>
    %344 = tpu.matmul %343, %336, %cst_87 {dimension_numbers = #tpu.dot_dimension_numbers<[1], [0], [0], [1], [0, 0, 1, 1], [], []>} : vector<12x8xf32>, vector<8x16xf32>, vector<12x16xf32> -> vector<12x16xf32>
    %345 = vector.extract_strided_slice %337 {offsets = [0, 8], sizes = [1, 16], strides = [1, 1]} : vector<1x48xf32> to vector<1x16xf32>
    %346 = vector.broadcast %345 : vector<1x16xf32> to vector<12x16xf32>
    %347 = arith.addf %344, %346 : vector<12x16xf32>
    %348 = arith.addf %334, %347 : vector<12x16xf32>
    %c362 = arith.constant 362 : index
    %c0_88 = arith.constant 0 : index
    %349 = vector.load %arg1[%c362, %c0_88] : memref<416x48xf32, #tpu.memory_space<vmem>>, vector<1x32xf32>
    %cst_89 = arith.constant dense<0.000000e+00> : vector<12xf32>
    %350 = vector.multi_reduction <add>, %348, %cst_89 [1] : vector<12x16xf32> to vector<12xf32>
    %351 = vector.shape_cast %350 : vector<12xf32> to vector<12x1xf32>
    %cst_90 = arith.constant 1.600000e+01 : f32
    %352 = vector.broadcast %cst_90 : f32 to vector<12x1xf32>
    %353 = arith.divf %351, %352 : vector<12x1xf32>
    %354 = vector.broadcast %353 : vector<12x1xf32> to vector<12x16xf32>
    %355 = arith.subf %348, %354 : vector<12x16xf32>
    %356 = arith.mulf %355, %355 : vector<12x16xf32>
    %cst_91 = arith.constant dense<0.000000e+00> : vector<12xf32>
    %357 = vector.multi_reduction <add>, %356, %cst_91 [1] : vector<12x16xf32> to vector<12xf32>
    %358 = vector.shape_cast %357 : vector<12xf32> to vector<12x1xf32>
    %cst_92 = arith.constant 1.600000e+01 : f32
    %359 = vector.broadcast %cst_92 : f32 to vector<12x1xf32>
    %360 = arith.divf %358, %359 : vector<12x1xf32>
    %361 = vector.broadcast %353 : vector<12x1xf32> to vector<12x16xf32>
    %362 = arith.subf %348, %361 : vector<12x16xf32>
    %cst_93 = arith.constant 9.99999974E-6 : f32
    %363 = vector.broadcast %cst_93 : f32 to vector<12x1xf32>
    %364 = arith.addf %360, %363 : vector<12x1xf32>
    %365 = math.rsqrt %364 : vector<12x1xf32>
    %366 = vector.broadcast %365 : vector<12x1xf32> to vector<12x16xf32>
    %367 = arith.mulf %362, %366 : vector<12x16xf32>
    %368 = vector.extract_strided_slice %349 {offsets = [0, 0], sizes = [1, 16], strides = [1, 1]} : vector<1x32xf32> to vector<1x16xf32>
    %369 = vector.broadcast %368 : vector<1x16xf32> to vector<12x16xf32>
    %370 = arith.mulf %367, %369 : vector<12x16xf32>
    %371 = vector.extract_strided_slice %349 {offsets = [0, 16], sizes = [1, 16], strides = [1, 1]} : vector<1x32xf32> to vector<1x16xf32>
    %372 = vector.broadcast %371 : vector<1x16xf32> to vector<12x16xf32>
    %373 = arith.addf %370, %372 : vector<12x16xf32>
    %c40 = arith.constant 40 : index
    %c0_94 = arith.constant 0 : index
    %374 = vector.load %arg1[%c40, %c0_94] : memref<416x48xf32, #tpu.memory_space<vmem>>, vector<16x48xf32>
    %c56 = arith.constant 56 : index
    %c0_95 = arith.constant 0 : index
    %375 = vector.load %arg1[%c56, %c0_95] : memref<416x48xf32, #tpu.memory_space<vmem>>, vector<16x16xf32>
    %c72 = arith.constant 72 : index
    %c0_96 = arith.constant 0 : index
    %376 = vector.load %arg1[%c72, %c0_96] : memref<416x48xf32, #tpu.memory_space<vmem>>, vector<1x48xf32>
    %c73 = arith.constant 73 : index
    %c0_97 = arith.constant 0 : index
    %377 = vector.load %arg1[%c73, %c0_97] : memref<416x48xf32, #tpu.memory_space<vmem>>, vector<1x16xf32>
    %cst_98 = arith.constant dense<0.000000e+00> : vector<12x48xf32>
    %378 = tpu.matmul %373, %374, %cst_98 {dimension_numbers = #tpu.dot_dimension_numbers<[1], [0], [0], [1], [0, 0, 1, 1], [], []>} : vector<12x16xf32>, vector<16x48xf32>, vector<12x48xf32> -> vector<12x48xf32>
    %379 = vector.broadcast %376 : vector<1x48xf32> to vector<12x48xf32>
    %380 = arith.addf %378, %379 : vector<12x48xf32>
    %381 = vector.extract_strided_slice %380 {offsets = [0, 0], sizes = [12, 16], strides = [1, 1]} : vector<12x48xf32> to vector<12x16xf32>
    %382 = vector.extract_strided_slice %380 {offsets = [0, 16], sizes = [12, 32], strides = [1, 1]} : vector<12x48xf32> to vector<12x32xf32>
    %cst_99 = arith.constant dense<0.000000e+00> : vector<96x32xf32>
    %383 = tpu.matmul %56, %382, %cst_99 {dimension_numbers = #tpu.dot_dimension_numbers<[1], [0], [0], [1], [0, 0, 1, 1], [], []>} : vector<96x12xf32>, vector<12x32xf32>, vector<96x32xf32> -> vector<96x32xf32>
    %384 = vector.extract_strided_slice %383 {offsets = [0, 0], sizes = [96, 16], strides = [1, 1]} : vector<96x32xf32> to vector<96x16xf32>
    %385 = arith.mulf %384, %40 : vector<96x16xf32>
    %386 = vector.extract_strided_slice %383 {offsets = [0, 16], sizes = [96, 16], strides = [1, 1]} : vector<96x32xf32> to vector<96x16xf32>
    %387 = arith.mulf %386, %40 : vector<96x16xf32>
    %cst_100 = arith.constant dense<0.000000e+00> : vector<12x96xf32>
    %388 = tpu.matmul %381, %385, %cst_100 {dimension_numbers = #tpu.dot_dimension_numbers<[1], [1], [0], [0], [0, 0, 1, 0], [], []>} : vector<12x16xf32>, vector<96x16xf32>, vector<12x96xf32> -> vector<12x96xf32>
    %cst_101 = arith.constant -1.000000e+30 : f32
    %389 = vector.broadcast %cst_101 : f32 to vector<12x96xf32>
    %390 = arith.select %161, %388, %389 : vector<12x96xi1>, vector<12x96xf32>
    %cst_102 = arith.constant dense<0xFF800000> : vector<12xf32>
    %391 = vector.multi_reduction <maximumf>, %390, %cst_102 [1] : vector<12x96xf32> to vector<12xf32>
    %392 = vector.shape_cast %391 : vector<12xf32> to vector<12x1xf32>
    %393 = vector.broadcast %392 : vector<12x1xf32> to vector<12x96xf32>
    %394 = arith.subf %388, %393 : vector<12x96xf32>
    %395 = math.exp %394 : vector<12x96xf32>
    %cst_103 = arith.constant 0.000000e+00 : f32
    %396 = vector.broadcast %cst_103 : f32 to vector<12x96xf32>
    %397 = arith.select %161, %395, %396 : vector<12x96xi1>, vector<12x96xf32>
    %cst_104 = arith.constant dense<0.000000e+00> : vector<12x96xf32>
    %398 = tpu.matmul %397, %26, %cst_104 {dimension_numbers = #tpu.dot_dimension_numbers<[1], [0], [0], [1], [0, 0, 1, 1], [], []>} : vector<12x96xf32>, vector<96x96xf32>, vector<12x96xf32> -> vector<12x96xf32>
    %399 = tpu.reciprocal %398 {approx = true} : vector<12x96xf32> -> vector<12x96xf32>
    %400 = arith.mulf %397, %399 : vector<12x96xf32>
    %cst_105 = arith.constant dense<0.000000e+00> : vector<12x16xf32>
    %401 = tpu.matmul %400, %387, %cst_105 {dimension_numbers = #tpu.dot_dimension_numbers<[1], [0], [0], [1], [0, 0, 1, 1], [], []>} : vector<12x96xf32>, vector<96x16xf32>, vector<12x16xf32> -> vector<12x16xf32>
    %cst_106 = arith.constant dense<0.000000e+00> : vector<12x16xf32>
    %402 = tpu.matmul %401, %375, %cst_106 {dimension_numbers = #tpu.dot_dimension_numbers<[1], [0], [0], [1], [0, 0, 1, 1], [], []>} : vector<12x16xf32>, vector<16x16xf32>, vector<12x16xf32> -> vector<12x16xf32>
    %403 = vector.broadcast %377 : vector<1x16xf32> to vector<12x16xf32>
    %404 = arith.addf %402, %403 : vector<12x16xf32>
    %405 = arith.addf %373, %404 : vector<12x16xf32>
    %c363 = arith.constant 363 : index
    %c0_107 = arith.constant 0 : index
    %406 = vector.load %arg1[%c363, %c0_107] : memref<416x48xf32, #tpu.memory_space<vmem>>, vector<1x32xf32>
    %cst_108 = arith.constant dense<0.000000e+00> : vector<12xf32>
    %407 = vector.multi_reduction <add>, %405, %cst_108 [1] : vector<12x16xf32> to vector<12xf32>
    %408 = vector.shape_cast %407 : vector<12xf32> to vector<12x1xf32>
    %cst_109 = arith.constant 1.600000e+01 : f32
    %409 = vector.broadcast %cst_109 : f32 to vector<12x1xf32>
    %410 = arith.divf %408, %409 : vector<12x1xf32>
    %411 = vector.broadcast %410 : vector<12x1xf32> to vector<12x16xf32>
    %412 = arith.subf %405, %411 : vector<12x16xf32>
    %413 = arith.mulf %412, %412 : vector<12x16xf32>
    %cst_110 = arith.constant dense<0.000000e+00> : vector<12xf32>
    %414 = vector.multi_reduction <add>, %413, %cst_110 [1] : vector<12x16xf32> to vector<12xf32>
    %415 = vector.shape_cast %414 : vector<12xf32> to vector<12x1xf32>
    %cst_111 = arith.constant 1.600000e+01 : f32
    %416 = vector.broadcast %cst_111 : f32 to vector<12x1xf32>
    %417 = arith.divf %415, %416 : vector<12x1xf32>
    %418 = vector.broadcast %410 : vector<12x1xf32> to vector<12x16xf32>
    %419 = arith.subf %405, %418 : vector<12x16xf32>
    %cst_112 = arith.constant 9.99999974E-6 : f32
    %420 = vector.broadcast %cst_112 : f32 to vector<12x1xf32>
    %421 = arith.addf %417, %420 : vector<12x1xf32>
    %422 = math.rsqrt %421 : vector<12x1xf32>
    %423 = vector.broadcast %422 : vector<12x1xf32> to vector<12x16xf32>
    %424 = arith.mulf %419, %423 : vector<12x16xf32>
    %425 = vector.extract_strided_slice %406 {offsets = [0, 0], sizes = [1, 16], strides = [1, 1]} : vector<1x32xf32> to vector<1x16xf32>
    %426 = vector.broadcast %425 : vector<1x16xf32> to vector<12x16xf32>
    %427 = arith.mulf %424, %426 : vector<12x16xf32>
    %428 = vector.extract_strided_slice %406 {offsets = [0, 16], sizes = [1, 16], strides = [1, 1]} : vector<1x32xf32> to vector<1x16xf32>
    %429 = vector.broadcast %428 : vector<1x16xf32> to vector<12x16xf32>
    %430 = arith.addf %427, %429 : vector<12x16xf32>
    %c272 = arith.constant 272 : index
    %c0_113 = arith.constant 0 : index
    %431 = vector.load %arg1[%c272, %c0_113] : memref<416x48xf32, #tpu.memory_space<vmem>>, vector<16x8xf32>
    %c288 = arith.constant 288 : index
    %c0_114 = arith.constant 0 : index
    %432 = vector.load %arg1[%c288, %c0_114] : memref<416x48xf32, #tpu.memory_space<vmem>>, vector<8x16xf32>
    %c296 = arith.constant 296 : index
    %c0_115 = arith.constant 0 : index
    %433 = vector.load %arg1[%c296, %c0_115] : memref<416x48xf32, #tpu.memory_space<vmem>>, vector<1x48xf32>
    %cst_116 = arith.constant dense<0.000000e+00> : vector<12x8xf32>
    %434 = tpu.matmul %430, %431, %cst_116 {dimension_numbers = #tpu.dot_dimension_numbers<[1], [0], [0], [1], [0, 0, 1, 1], [], []>} : vector<12x16xf32>, vector<16x8xf32>, vector<12x8xf32> -> vector<12x8xf32>
    %435 = vector.extract_strided_slice %433 {offsets = [0, 0], sizes = [1, 8], strides = [1, 1]} : vector<1x48xf32> to vector<1x8xf32>
    %436 = vector.broadcast %435 : vector<1x8xf32> to vector<12x8xf32>
    %437 = arith.addf %434, %436 : vector<12x8xf32>
    %cst_117 = arith.constant 0.000000e+00 : f32
    %438 = vector.broadcast %cst_117 : f32 to vector<12x8xf32>
    %439 = arith.maximumf %437, %438 : vector<12x8xf32>
    %cst_118 = arith.constant dense<0.000000e+00> : vector<12x16xf32>
    %440 = tpu.matmul %439, %432, %cst_118 {dimension_numbers = #tpu.dot_dimension_numbers<[1], [0], [0], [1], [0, 0, 1, 1], [], []>} : vector<12x8xf32>, vector<8x16xf32>, vector<12x16xf32> -> vector<12x16xf32>
    %441 = vector.extract_strided_slice %433 {offsets = [0, 8], sizes = [1, 16], strides = [1, 1]} : vector<1x48xf32> to vector<1x16xf32>
    %442 = vector.broadcast %441 : vector<1x16xf32> to vector<12x16xf32>
    %443 = arith.addf %440, %442 : vector<12x16xf32>
    %444 = arith.addf %430, %443 : vector<12x16xf32>
    %c364 = arith.constant 364 : index
    %c0_119 = arith.constant 0 : index
    %445 = vector.load %arg1[%c364, %c0_119] : memref<416x48xf32, #tpu.memory_space<vmem>>, vector<1x32xf32>
    %cst_120 = arith.constant dense<0.000000e+00> : vector<12xf32>
    %446 = vector.multi_reduction <add>, %444, %cst_120 [1] : vector<12x16xf32> to vector<12xf32>
    %447 = vector.shape_cast %446 : vector<12xf32> to vector<12x1xf32>
    %cst_121 = arith.constant 1.600000e+01 : f32
    %448 = vector.broadcast %cst_121 : f32 to vector<12x1xf32>
    %449 = arith.divf %447, %448 : vector<12x1xf32>
    %450 = vector.broadcast %449 : vector<12x1xf32> to vector<12x16xf32>
    %451 = arith.subf %444, %450 : vector<12x16xf32>
    %452 = arith.mulf %451, %451 : vector<12x16xf32>
    %cst_122 = arith.constant dense<0.000000e+00> : vector<12xf32>
    %453 = vector.multi_reduction <add>, %452, %cst_122 [1] : vector<12x16xf32> to vector<12xf32>
    %454 = vector.shape_cast %453 : vector<12xf32> to vector<12x1xf32>
    %cst_123 = arith.constant 1.600000e+01 : f32
    %455 = vector.broadcast %cst_123 : f32 to vector<12x1xf32>
    %456 = arith.divf %454, %455 : vector<12x1xf32>
    %457 = vector.broadcast %449 : vector<12x1xf32> to vector<12x16xf32>
    %458 = arith.subf %444, %457 : vector<12x16xf32>
    %cst_124 = arith.constant 9.99999974E-6 : f32
    %459 = vector.broadcast %cst_124 : f32 to vector<12x1xf32>
    %460 = arith.addf %456, %459 : vector<12x1xf32>
    %461 = math.rsqrt %460 : vector<12x1xf32>
    %462 = vector.broadcast %461 : vector<12x1xf32> to vector<12x16xf32>
    %463 = arith.mulf %458, %462 : vector<12x16xf32>
    %464 = vector.extract_strided_slice %445 {offsets = [0, 0], sizes = [1, 16], strides = [1, 1]} : vector<1x32xf32> to vector<1x16xf32>
    %465 = vector.broadcast %464 : vector<1x16xf32> to vector<12x16xf32>
    %466 = arith.mulf %463, %465 : vector<12x16xf32>
    %467 = vector.extract_strided_slice %445 {offsets = [0, 16], sizes = [1, 16], strides = [1, 1]} : vector<1x32xf32> to vector<1x16xf32>
    %468 = vector.broadcast %467 : vector<1x16xf32> to vector<12x16xf32>
    %469 = arith.addf %466, %468 : vector<12x16xf32>
    %c365 = arith.constant 365 : index
    %c0_125 = arith.constant 0 : index
    %470 = vector.load %arg1[%c365, %c0_125] : memref<416x48xf32, #tpu.memory_space<vmem>>, vector<1x32xf32>
    %cst_126 = arith.constant dense<0.000000e+00> : vector<12xf32>
    %471 = vector.multi_reduction <add>, %469, %cst_126 [1] : vector<12x16xf32> to vector<12xf32>
    %472 = vector.shape_cast %471 : vector<12xf32> to vector<12x1xf32>
    %cst_127 = arith.constant 1.600000e+01 : f32
    %473 = vector.broadcast %cst_127 : f32 to vector<12x1xf32>
    %474 = arith.divf %472, %473 : vector<12x1xf32>
    %475 = vector.broadcast %474 : vector<12x1xf32> to vector<12x16xf32>
    %476 = arith.subf %469, %475 : vector<12x16xf32>
    %477 = arith.mulf %476, %476 : vector<12x16xf32>
    %cst_128 = arith.constant dense<0.000000e+00> : vector<12xf32>
    %478 = vector.multi_reduction <add>, %477, %cst_128 [1] : vector<12x16xf32> to vector<12xf32>
    %479 = vector.shape_cast %478 : vector<12xf32> to vector<12x1xf32>
    %cst_129 = arith.constant 1.600000e+01 : f32
    %480 = vector.broadcast %cst_129 : f32 to vector<12x1xf32>
    %481 = arith.divf %479, %480 : vector<12x1xf32>
    %482 = vector.broadcast %474 : vector<12x1xf32> to vector<12x16xf32>
    %483 = arith.subf %469, %482 : vector<12x16xf32>
    %cst_130 = arith.constant 9.99999974E-6 : f32
    %484 = vector.broadcast %cst_130 : f32 to vector<12x1xf32>
    %485 = arith.addf %481, %484 : vector<12x1xf32>
    %486 = math.rsqrt %485 : vector<12x1xf32>
    %487 = vector.broadcast %486 : vector<12x1xf32> to vector<12x16xf32>
    %488 = arith.mulf %483, %487 : vector<12x16xf32>
    %489 = vector.extract_strided_slice %470 {offsets = [0, 0], sizes = [1, 16], strides = [1, 1]} : vector<1x32xf32> to vector<1x16xf32>
    %490 = vector.broadcast %489 : vector<1x16xf32> to vector<12x16xf32>
    %491 = arith.mulf %488, %490 : vector<12x16xf32>
    %492 = vector.extract_strided_slice %470 {offsets = [0, 16], sizes = [1, 16], strides = [1, 1]} : vector<1x32xf32> to vector<1x16xf32>
    %493 = vector.broadcast %492 : vector<1x16xf32> to vector<12x16xf32>
    %494 = arith.addf %491, %493 : vector<12x16xf32>
    %c80 = arith.constant 80 : index
    %c0_131 = arith.constant 0 : index
    %495 = vector.load %arg1[%c80, %c0_131] : memref<416x48xf32, #tpu.memory_space<vmem>>, vector<16x48xf32>
    %c96 = arith.constant 96 : index
    %c0_132 = arith.constant 0 : index
    %496 = vector.load %arg1[%c96, %c0_132] : memref<416x48xf32, #tpu.memory_space<vmem>>, vector<16x16xf32>
    %c112 = arith.constant 112 : index
    %c0_133 = arith.constant 0 : index
    %497 = vector.load %arg1[%c112, %c0_133] : memref<416x48xf32, #tpu.memory_space<vmem>>, vector<1x48xf32>
    %c113 = arith.constant 113 : index
    %c0_134 = arith.constant 0 : index
    %498 = vector.load %arg1[%c113, %c0_134] : memref<416x48xf32, #tpu.memory_space<vmem>>, vector<1x16xf32>
    %cst_135 = arith.constant dense<0.000000e+00> : vector<8x48xf32>
    %499 = tpu.matmul %277, %495, %cst_135 {dimension_numbers = #tpu.dot_dimension_numbers<[1], [0], [0], [1], [0, 0, 1, 1], [], []>} : vector<8x16xf32>, vector<16x48xf32>, vector<8x48xf32> -> vector<8x48xf32>
    %500 = vector.broadcast %497 : vector<1x48xf32> to vector<8x48xf32>
    %501 = arith.addf %499, %500 : vector<8x48xf32>
    %502 = vector.extract_strided_slice %501 {offsets = [0, 0], sizes = [8, 16], strides = [1, 1]} : vector<8x48xf32> to vector<8x16xf32>
    %503 = vector.extract_strided_slice %501 {offsets = [0, 16], sizes = [8, 32], strides = [1, 1]} : vector<8x48xf32> to vector<8x32xf32>
    %cst_136 = arith.constant dense<0.000000e+00> : vector<64x32xf32>
    %504 = tpu.matmul %128, %503, %cst_136 {dimension_numbers = #tpu.dot_dimension_numbers<[1], [0], [0], [1], [0, 0, 1, 1], [], []>} : vector<64x8xf32>, vector<8x32xf32>, vector<64x32xf32> -> vector<64x32xf32>
    %505 = vector.extract_strided_slice %504 {offsets = [0, 0], sizes = [64, 16], strides = [1, 1]} : vector<64x32xf32> to vector<64x16xf32>
    %506 = arith.mulf %505, %112 : vector<64x16xf32>
    %507 = vector.extract_strided_slice %504 {offsets = [0, 16], sizes = [64, 16], strides = [1, 1]} : vector<64x32xf32> to vector<64x16xf32>
    %508 = arith.mulf %507, %112 : vector<64x16xf32>
    %cst_137 = arith.constant dense<0.000000e+00> : vector<8x64xf32>
    %509 = tpu.matmul %502, %506, %cst_137 {dimension_numbers = #tpu.dot_dimension_numbers<[1], [1], [0], [0], [0, 0, 1, 0], [], []>} : vector<8x16xf32>, vector<64x16xf32>, vector<8x64xf32> -> vector<8x64xf32>
    %cst_138 = arith.constant -1.000000e+30 : f32
    %510 = vector.broadcast %cst_138 : f32 to vector<8x64xf32>
    %511 = arith.select %179, %509, %510 : vector<8x64xi1>, vector<8x64xf32>
    %cst_139 = arith.constant dense<0xFF800000> : vector<8xf32>
    %512 = vector.multi_reduction <maximumf>, %511, %cst_139 [1] : vector<8x64xf32> to vector<8xf32>
    %513 = vector.shape_cast %512 : vector<8xf32> to vector<8x1xf32>
    %514 = vector.broadcast %513 : vector<8x1xf32> to vector<8x64xf32>
    %515 = arith.subf %509, %514 : vector<8x64xf32>
    %516 = math.exp %515 : vector<8x64xf32>
    %cst_140 = arith.constant 0.000000e+00 : f32
    %517 = vector.broadcast %cst_140 : f32 to vector<8x64xf32>
    %518 = arith.select %179, %516, %517 : vector<8x64xi1>, vector<8x64xf32>
    %cst_141 = arith.constant dense<0.000000e+00> : vector<8x64xf32>
    %519 = tpu.matmul %518, %98, %cst_141 {dimension_numbers = #tpu.dot_dimension_numbers<[1], [0], [0], [1], [0, 0, 1, 1], [], []>} : vector<8x64xf32>, vector<64x64xf32>, vector<8x64xf32> -> vector<8x64xf32>
    %520 = tpu.reciprocal %519 {approx = true} : vector<8x64xf32> -> vector<8x64xf32>
    %521 = arith.mulf %518, %520 : vector<8x64xf32>
    %cst_142 = arith.constant dense<0.000000e+00> : vector<8x16xf32>
    %522 = tpu.matmul %521, %508, %cst_142 {dimension_numbers = #tpu.dot_dimension_numbers<[1], [0], [0], [1], [0, 0, 1, 1], [], []>} : vector<8x64xf32>, vector<64x16xf32>, vector<8x16xf32> -> vector<8x16xf32>
    %cst_143 = arith.constant dense<0.000000e+00> : vector<8x16xf32>
    %523 = tpu.matmul %522, %496, %cst_143 {dimension_numbers = #tpu.dot_dimension_numbers<[1], [0], [0], [1], [0, 0, 1, 1], [], []>} : vector<8x16xf32>, vector<16x16xf32>, vector<8x16xf32> -> vector<8x16xf32>
    %524 = vector.broadcast %498 : vector<1x16xf32> to vector<8x16xf32>
    %525 = arith.addf %523, %524 : vector<8x16xf32>
    %526 = arith.addf %277, %525 : vector<8x16xf32>
    %c366 = arith.constant 366 : index
    %c0_144 = arith.constant 0 : index
    %527 = vector.load %arg1[%c366, %c0_144] : memref<416x48xf32, #tpu.memory_space<vmem>>, vector<1x32xf32>
    %cst_145 = arith.constant dense<0.000000e+00> : vector<8xf32>
    %528 = vector.multi_reduction <add>, %526, %cst_145 [1] : vector<8x16xf32> to vector<8xf32>
    %529 = vector.shape_cast %528 : vector<8xf32> to vector<8x1xf32>
    %cst_146 = arith.constant 1.600000e+01 : f32
    %530 = vector.broadcast %cst_146 : f32 to vector<8x1xf32>
    %531 = arith.divf %529, %530 : vector<8x1xf32>
    %532 = vector.broadcast %531 : vector<8x1xf32> to vector<8x16xf32>
    %533 = arith.subf %526, %532 : vector<8x16xf32>
    %534 = arith.mulf %533, %533 : vector<8x16xf32>
    %cst_147 = arith.constant dense<0.000000e+00> : vector<8xf32>
    %535 = vector.multi_reduction <add>, %534, %cst_147 [1] : vector<8x16xf32> to vector<8xf32>
    %536 = vector.shape_cast %535 : vector<8xf32> to vector<8x1xf32>
    %cst_148 = arith.constant 1.600000e+01 : f32
    %537 = vector.broadcast %cst_148 : f32 to vector<8x1xf32>
    %538 = arith.divf %536, %537 : vector<8x1xf32>
    %539 = vector.broadcast %531 : vector<8x1xf32> to vector<8x16xf32>
    %540 = arith.subf %526, %539 : vector<8x16xf32>
    %cst_149 = arith.constant 9.99999974E-6 : f32
    %541 = vector.broadcast %cst_149 : f32 to vector<8x1xf32>
    %542 = arith.addf %538, %541 : vector<8x1xf32>
    %543 = math.rsqrt %542 : vector<8x1xf32>
    %544 = vector.broadcast %543 : vector<8x1xf32> to vector<8x16xf32>
    %545 = arith.mulf %540, %544 : vector<8x16xf32>
    %546 = vector.extract_strided_slice %527 {offsets = [0, 0], sizes = [1, 16], strides = [1, 1]} : vector<1x32xf32> to vector<1x16xf32>
    %547 = vector.broadcast %546 : vector<1x16xf32> to vector<8x16xf32>
    %548 = arith.mulf %545, %547 : vector<8x16xf32>
    %549 = vector.extract_strided_slice %527 {offsets = [0, 16], sizes = [1, 16], strides = [1, 1]} : vector<1x32xf32> to vector<1x16xf32>
    %550 = vector.broadcast %549 : vector<1x16xf32> to vector<8x16xf32>
    %551 = arith.addf %548, %550 : vector<8x16xf32>
    %c120 = arith.constant 120 : index
    %c0_150 = arith.constant 0 : index
    %552 = vector.load %arg1[%c120, %c0_150] : memref<416x48xf32, #tpu.memory_space<vmem>>, vector<16x48xf32>
    %c136 = arith.constant 136 : index
    %c0_151 = arith.constant 0 : index
    %553 = vector.load %arg1[%c136, %c0_151] : memref<416x48xf32, #tpu.memory_space<vmem>>, vector<16x16xf32>
    %c152 = arith.constant 152 : index
    %c0_152 = arith.constant 0 : index
    %554 = vector.load %arg1[%c152, %c0_152] : memref<416x48xf32, #tpu.memory_space<vmem>>, vector<1x48xf32>
    %c153 = arith.constant 153 : index
    %c0_153 = arith.constant 0 : index
    %555 = vector.load %arg1[%c153, %c0_153] : memref<416x48xf32, #tpu.memory_space<vmem>>, vector<1x16xf32>
    %556 = vector.extract_strided_slice %552 {offsets = [0, 0], sizes = [16, 16], strides = [1, 1]} : vector<16x48xf32> to vector<16x16xf32>
    %cst_154 = arith.constant dense<0.000000e+00> : vector<8x16xf32>
    %557 = tpu.matmul %551, %556, %cst_154 {dimension_numbers = #tpu.dot_dimension_numbers<[1], [0], [0], [1], [0, 0, 1, 1], [], []>} : vector<8x16xf32>, vector<16x16xf32>, vector<8x16xf32> -> vector<8x16xf32>
    %558 = vector.extract_strided_slice %554 {offsets = [0, 0], sizes = [1, 16], strides = [1, 1]} : vector<1x48xf32> to vector<1x16xf32>
    %559 = vector.broadcast %558 : vector<1x16xf32> to vector<8x16xf32>
    %560 = arith.addf %557, %559 : vector<8x16xf32>
    %561 = vector.extract_strided_slice %552 {offsets = [0, 16], sizes = [16, 32], strides = [1, 1]} : vector<16x48xf32> to vector<16x32xf32>
    %cst_155 = arith.constant dense<0.000000e+00> : vector<12x32xf32>
    %562 = tpu.matmul %494, %561, %cst_155 {dimension_numbers = #tpu.dot_dimension_numbers<[1], [0], [0], [1], [0, 0, 1, 1], [], []>} : vector<12x16xf32>, vector<16x32xf32>, vector<12x32xf32> -> vector<12x32xf32>
    %563 = vector.extract_strided_slice %554 {offsets = [0, 16], sizes = [1, 32], strides = [1, 1]} : vector<1x48xf32> to vector<1x32xf32>
    %564 = vector.broadcast %563 : vector<1x32xf32> to vector<12x32xf32>
    %565 = arith.addf %562, %564 : vector<12x32xf32>
    %cst_156 = arith.constant dense<0.000000e+00> : vector<96x32xf32>
    %566 = tpu.matmul %56, %565, %cst_156 {dimension_numbers = #tpu.dot_dimension_numbers<[1], [0], [0], [1], [0, 0, 1, 1], [], []>} : vector<96x12xf32>, vector<12x32xf32>, vector<96x32xf32> -> vector<96x32xf32>
    %567 = vector.extract_strided_slice %566 {offsets = [0, 0], sizes = [96, 16], strides = [1, 1]} : vector<96x32xf32> to vector<96x16xf32>
    %568 = arith.mulf %567, %40 : vector<96x16xf32>
    %569 = vector.extract_strided_slice %566 {offsets = [0, 16], sizes = [96, 16], strides = [1, 1]} : vector<96x32xf32> to vector<96x16xf32>
    %570 = arith.mulf %569, %40 : vector<96x16xf32>
    %cst_157 = arith.constant dense<0.000000e+00> : vector<8x96xf32>
    %571 = tpu.matmul %560, %568, %cst_157 {dimension_numbers = #tpu.dot_dimension_numbers<[1], [1], [0], [0], [0, 0, 1, 0], [], []>} : vector<8x16xf32>, vector<96x16xf32>, vector<8x96xf32> -> vector<8x96xf32>
    %cst_158 = arith.constant -1.000000e+30 : f32
    %572 = vector.broadcast %cst_158 : f32 to vector<8x96xf32>
    %573 = arith.select %197, %571, %572 : vector<8x96xi1>, vector<8x96xf32>
    %cst_159 = arith.constant dense<0xFF800000> : vector<8xf32>
    %574 = vector.multi_reduction <maximumf>, %573, %cst_159 [1] : vector<8x96xf32> to vector<8xf32>
    %575 = vector.shape_cast %574 : vector<8xf32> to vector<8x1xf32>
    %576 = vector.broadcast %575 : vector<8x1xf32> to vector<8x96xf32>
    %577 = arith.subf %571, %576 : vector<8x96xf32>
    %578 = math.exp %577 : vector<8x96xf32>
    %cst_160 = arith.constant 0.000000e+00 : f32
    %579 = vector.broadcast %cst_160 : f32 to vector<8x96xf32>
    %580 = arith.select %197, %578, %579 : vector<8x96xi1>, vector<8x96xf32>
    %cst_161 = arith.constant dense<0.000000e+00> : vector<8x96xf32>
    %581 = tpu.matmul %580, %26, %cst_161 {dimension_numbers = #tpu.dot_dimension_numbers<[1], [0], [0], [1], [0, 0, 1, 1], [], []>} : vector<8x96xf32>, vector<96x96xf32>, vector<8x96xf32> -> vector<8x96xf32>
    %582 = tpu.reciprocal %581 {approx = true} : vector<8x96xf32> -> vector<8x96xf32>
    %583 = arith.mulf %580, %582 : vector<8x96xf32>
    %cst_162 = arith.constant dense<0.000000e+00> : vector<8x16xf32>
    %584 = tpu.matmul %583, %570, %cst_162 {dimension_numbers = #tpu.dot_dimension_numbers<[1], [0], [0], [1], [0, 0, 1, 1], [], []>} : vector<8x96xf32>, vector<96x16xf32>, vector<8x16xf32> -> vector<8x16xf32>
    %cst_163 = arith.constant dense<0.000000e+00> : vector<8x16xf32>
    %585 = tpu.matmul %584, %553, %cst_163 {dimension_numbers = #tpu.dot_dimension_numbers<[1], [0], [0], [1], [0, 0, 1, 1], [], []>} : vector<8x16xf32>, vector<16x16xf32>, vector<8x16xf32> -> vector<8x16xf32>
    %586 = vector.broadcast %555 : vector<1x16xf32> to vector<8x16xf32>
    %587 = arith.addf %585, %586 : vector<8x16xf32>
    %588 = arith.addf %551, %587 : vector<8x16xf32>
    %c367 = arith.constant 367 : index
    %c0_164 = arith.constant 0 : index
    %589 = vector.load %arg1[%c367, %c0_164] : memref<416x48xf32, #tpu.memory_space<vmem>>, vector<1x32xf32>
    %cst_165 = arith.constant dense<0.000000e+00> : vector<8xf32>
    %590 = vector.multi_reduction <add>, %588, %cst_165 [1] : vector<8x16xf32> to vector<8xf32>
    %591 = vector.shape_cast %590 : vector<8xf32> to vector<8x1xf32>
    %cst_166 = arith.constant 1.600000e+01 : f32
    %592 = vector.broadcast %cst_166 : f32 to vector<8x1xf32>
    %593 = arith.divf %591, %592 : vector<8x1xf32>
    %594 = vector.broadcast %593 : vector<8x1xf32> to vector<8x16xf32>
    %595 = arith.subf %588, %594 : vector<8x16xf32>
    %596 = arith.mulf %595, %595 : vector<8x16xf32>
    %cst_167 = arith.constant dense<0.000000e+00> : vector<8xf32>
    %597 = vector.multi_reduction <add>, %596, %cst_167 [1] : vector<8x16xf32> to vector<8xf32>
    %598 = vector.shape_cast %597 : vector<8xf32> to vector<8x1xf32>
    %cst_168 = arith.constant 1.600000e+01 : f32
    %599 = vector.broadcast %cst_168 : f32 to vector<8x1xf32>
    %600 = arith.divf %598, %599 : vector<8x1xf32>
    %601 = vector.broadcast %593 : vector<8x1xf32> to vector<8x16xf32>
    %602 = arith.subf %588, %601 : vector<8x16xf32>
    %cst_169 = arith.constant 9.99999974E-6 : f32
    %603 = vector.broadcast %cst_169 : f32 to vector<8x1xf32>
    %604 = arith.addf %600, %603 : vector<8x1xf32>
    %605 = math.rsqrt %604 : vector<8x1xf32>
    %606 = vector.broadcast %605 : vector<8x1xf32> to vector<8x16xf32>
    %607 = arith.mulf %602, %606 : vector<8x16xf32>
    %608 = vector.extract_strided_slice %589 {offsets = [0, 0], sizes = [1, 16], strides = [1, 1]} : vector<1x32xf32> to vector<1x16xf32>
    %609 = vector.broadcast %608 : vector<1x16xf32> to vector<8x16xf32>
    %610 = arith.mulf %607, %609 : vector<8x16xf32>
    %611 = vector.extract_strided_slice %589 {offsets = [0, 16], sizes = [1, 16], strides = [1, 1]} : vector<1x32xf32> to vector<1x16xf32>
    %612 = vector.broadcast %611 : vector<1x16xf32> to vector<8x16xf32>
    %613 = arith.addf %610, %612 : vector<8x16xf32>
    %c304 = arith.constant 304 : index
    %c0_170 = arith.constant 0 : index
    %614 = vector.load %arg1[%c304, %c0_170] : memref<416x48xf32, #tpu.memory_space<vmem>>, vector<16x8xf32>
    %c320 = arith.constant 320 : index
    %c0_171 = arith.constant 0 : index
    %615 = vector.load %arg1[%c320, %c0_171] : memref<416x48xf32, #tpu.memory_space<vmem>>, vector<8x16xf32>
    %c328 = arith.constant 328 : index
    %c0_172 = arith.constant 0 : index
    %616 = vector.load %arg1[%c328, %c0_172] : memref<416x48xf32, #tpu.memory_space<vmem>>, vector<1x48xf32>
    %cst_173 = arith.constant dense<0.000000e+00> : vector<8x8xf32>
    %617 = tpu.matmul %613, %614, %cst_173 {dimension_numbers = #tpu.dot_dimension_numbers<[1], [0], [0], [1], [0, 0, 1, 1], [], []>} : vector<8x16xf32>, vector<16x8xf32>, vector<8x8xf32> -> vector<8x8xf32>
    %618 = vector.extract_strided_slice %616 {offsets = [0, 0], sizes = [1, 8], strides = [1, 1]} : vector<1x48xf32> to vector<1x8xf32>
    %619 = vector.broadcast %618 : vector<1x8xf32> to vector<8x8xf32>
    %620 = arith.addf %617, %619 : vector<8x8xf32>
    %cst_174 = arith.constant 0.000000e+00 : f32
    %621 = vector.broadcast %cst_174 : f32 to vector<8x8xf32>
    %622 = arith.maximumf %620, %621 : vector<8x8xf32>
    %cst_175 = arith.constant dense<0.000000e+00> : vector<8x16xf32>
    %623 = tpu.matmul %622, %615, %cst_175 {dimension_numbers = #tpu.dot_dimension_numbers<[1], [0], [0], [1], [0, 0, 1, 1], [], []>} : vector<8x8xf32>, vector<8x16xf32>, vector<8x16xf32> -> vector<8x16xf32>
    %624 = vector.extract_strided_slice %616 {offsets = [0, 8], sizes = [1, 16], strides = [1, 1]} : vector<1x48xf32> to vector<1x16xf32>
    %625 = vector.broadcast %624 : vector<1x16xf32> to vector<8x16xf32>
    %626 = arith.addf %623, %625 : vector<8x16xf32>
    %627 = arith.addf %613, %626 : vector<8x16xf32>
    %c368 = arith.constant 368 : index
    %c0_176 = arith.constant 0 : index
    %628 = vector.load %arg1[%c368, %c0_176] : memref<416x48xf32, #tpu.memory_space<vmem>>, vector<1x32xf32>
    %cst_177 = arith.constant dense<0.000000e+00> : vector<8xf32>
    %629 = vector.multi_reduction <add>, %627, %cst_177 [1] : vector<8x16xf32> to vector<8xf32>
    %630 = vector.shape_cast %629 : vector<8xf32> to vector<8x1xf32>
    %cst_178 = arith.constant 1.600000e+01 : f32
    %631 = vector.broadcast %cst_178 : f32 to vector<8x1xf32>
    %632 = arith.divf %630, %631 : vector<8x1xf32>
    %633 = vector.broadcast %632 : vector<8x1xf32> to vector<8x16xf32>
    %634 = arith.subf %627, %633 : vector<8x16xf32>
    %635 = arith.mulf %634, %634 : vector<8x16xf32>
    %cst_179 = arith.constant dense<0.000000e+00> : vector<8xf32>
    %636 = vector.multi_reduction <add>, %635, %cst_179 [1] : vector<8x16xf32> to vector<8xf32>
    %637 = vector.shape_cast %636 : vector<8xf32> to vector<8x1xf32>
    %cst_180 = arith.constant 1.600000e+01 : f32
    %638 = vector.broadcast %cst_180 : f32 to vector<8x1xf32>
    %639 = arith.divf %637, %638 : vector<8x1xf32>
    %640 = vector.broadcast %632 : vector<8x1xf32> to vector<8x16xf32>
    %641 = arith.subf %627, %640 : vector<8x16xf32>
    %cst_181 = arith.constant 9.99999974E-6 : f32
    %642 = vector.broadcast %cst_181 : f32 to vector<8x1xf32>
    %643 = arith.addf %639, %642 : vector<8x1xf32>
    %644 = math.rsqrt %643 : vector<8x1xf32>
    %645 = vector.broadcast %644 : vector<8x1xf32> to vector<8x16xf32>
    %646 = arith.mulf %641, %645 : vector<8x16xf32>
    %647 = vector.extract_strided_slice %628 {offsets = [0, 0], sizes = [1, 16], strides = [1, 1]} : vector<1x32xf32> to vector<1x16xf32>
    %648 = vector.broadcast %647 : vector<1x16xf32> to vector<8x16xf32>
    %649 = arith.mulf %646, %648 : vector<8x16xf32>
    %650 = vector.extract_strided_slice %628 {offsets = [0, 16], sizes = [1, 16], strides = [1, 1]} : vector<1x32xf32> to vector<1x16xf32>
    %651 = vector.broadcast %650 : vector<1x16xf32> to vector<8x16xf32>
    %652 = arith.addf %649, %651 : vector<8x16xf32>
    %c160 = arith.constant 160 : index
    %c0_182 = arith.constant 0 : index
    %653 = vector.load %arg1[%c160, %c0_182] : memref<416x48xf32, #tpu.memory_space<vmem>>, vector<16x48xf32>
    %c176 = arith.constant 176 : index
    %c0_183 = arith.constant 0 : index
    %654 = vector.load %arg1[%c176, %c0_183] : memref<416x48xf32, #tpu.memory_space<vmem>>, vector<16x16xf32>
    %c192 = arith.constant 192 : index
    %c0_184 = arith.constant 0 : index
    %655 = vector.load %arg1[%c192, %c0_184] : memref<416x48xf32, #tpu.memory_space<vmem>>, vector<1x48xf32>
    %c193 = arith.constant 193 : index
    %c0_185 = arith.constant 0 : index
    %656 = vector.load %arg1[%c193, %c0_185] : memref<416x48xf32, #tpu.memory_space<vmem>>, vector<1x16xf32>
    %cst_186 = arith.constant dense<0.000000e+00> : vector<8x48xf32>
    %657 = tpu.matmul %652, %653, %cst_186 {dimension_numbers = #tpu.dot_dimension_numbers<[1], [0], [0], [1], [0, 0, 1, 1], [], []>} : vector<8x16xf32>, vector<16x48xf32>, vector<8x48xf32> -> vector<8x48xf32>
    %658 = vector.broadcast %655 : vector<1x48xf32> to vector<8x48xf32>
    %659 = arith.addf %657, %658 : vector<8x48xf32>
    %660 = vector.extract_strided_slice %659 {offsets = [0, 0], sizes = [8, 16], strides = [1, 1]} : vector<8x48xf32> to vector<8x16xf32>
    %661 = vector.extract_strided_slice %659 {offsets = [0, 16], sizes = [8, 32], strides = [1, 1]} : vector<8x48xf32> to vector<8x32xf32>
    %cst_187 = arith.constant dense<0.000000e+00> : vector<64x32xf32>
    %662 = tpu.matmul %128, %661, %cst_187 {dimension_numbers = #tpu.dot_dimension_numbers<[1], [0], [0], [1], [0, 0, 1, 1], [], []>} : vector<64x8xf32>, vector<8x32xf32>, vector<64x32xf32> -> vector<64x32xf32>
    %663 = vector.extract_strided_slice %662 {offsets = [0, 0], sizes = [64, 16], strides = [1, 1]} : vector<64x32xf32> to vector<64x16xf32>
    %664 = arith.mulf %663, %112 : vector<64x16xf32>
    %665 = vector.extract_strided_slice %662 {offsets = [0, 16], sizes = [64, 16], strides = [1, 1]} : vector<64x32xf32> to vector<64x16xf32>
    %666 = arith.mulf %665, %112 : vector<64x16xf32>
    %cst_188 = arith.constant dense<0.000000e+00> : vector<8x64xf32>
    %667 = tpu.matmul %660, %664, %cst_188 {dimension_numbers = #tpu.dot_dimension_numbers<[1], [1], [0], [0], [0, 0, 1, 0], [], []>} : vector<8x16xf32>, vector<64x16xf32>, vector<8x64xf32> -> vector<8x64xf32>
    %cst_189 = arith.constant -1.000000e+30 : f32
    %668 = vector.broadcast %cst_189 : f32 to vector<8x64xf32>
    %669 = arith.select %179, %667, %668 : vector<8x64xi1>, vector<8x64xf32>
    %cst_190 = arith.constant dense<0xFF800000> : vector<8xf32>
    %670 = vector.multi_reduction <maximumf>, %669, %cst_190 [1] : vector<8x64xf32> to vector<8xf32>
    %671 = vector.shape_cast %670 : vector<8xf32> to vector<8x1xf32>
    %672 = vector.broadcast %671 : vector<8x1xf32> to vector<8x64xf32>
    %673 = arith.subf %667, %672 : vector<8x64xf32>
    %674 = math.exp %673 : vector<8x64xf32>
    %cst_191 = arith.constant 0.000000e+00 : f32
    %675 = vector.broadcast %cst_191 : f32 to vector<8x64xf32>
    %676 = arith.select %179, %674, %675 : vector<8x64xi1>, vector<8x64xf32>
    %cst_192 = arith.constant dense<0.000000e+00> : vector<8x64xf32>
    %677 = tpu.matmul %676, %98, %cst_192 {dimension_numbers = #tpu.dot_dimension_numbers<[1], [0], [0], [1], [0, 0, 1, 1], [], []>} : vector<8x64xf32>, vector<64x64xf32>, vector<8x64xf32> -> vector<8x64xf32>
    %678 = tpu.reciprocal %677 {approx = true} : vector<8x64xf32> -> vector<8x64xf32>
    %679 = arith.mulf %676, %678 : vector<8x64xf32>
    %cst_193 = arith.constant dense<0.000000e+00> : vector<8x16xf32>
    %680 = tpu.matmul %679, %666, %cst_193 {dimension_numbers = #tpu.dot_dimension_numbers<[1], [0], [0], [1], [0, 0, 1, 1], [], []>} : vector<8x64xf32>, vector<64x16xf32>, vector<8x16xf32> -> vector<8x16xf32>
    %cst_194 = arith.constant dense<0.000000e+00> : vector<8x16xf32>
    %681 = tpu.matmul %680, %654, %cst_194 {dimension_numbers = #tpu.dot_dimension_numbers<[1], [0], [0], [1], [0, 0, 1, 1], [], []>} : vector<8x16xf32>, vector<16x16xf32>, vector<8x16xf32> -> vector<8x16xf32>
    %682 = vector.broadcast %656 : vector<1x16xf32> to vector<8x16xf32>
    %683 = arith.addf %681, %682 : vector<8x16xf32>
    %684 = arith.addf %652, %683 : vector<8x16xf32>
    %c369 = arith.constant 369 : index
    %c0_195 = arith.constant 0 : index
    %685 = vector.load %arg1[%c369, %c0_195] : memref<416x48xf32, #tpu.memory_space<vmem>>, vector<1x32xf32>
    %cst_196 = arith.constant dense<0.000000e+00> : vector<8xf32>
    %686 = vector.multi_reduction <add>, %684, %cst_196 [1] : vector<8x16xf32> to vector<8xf32>
    %687 = vector.shape_cast %686 : vector<8xf32> to vector<8x1xf32>
    %cst_197 = arith.constant 1.600000e+01 : f32
    %688 = vector.broadcast %cst_197 : f32 to vector<8x1xf32>
    %689 = arith.divf %687, %688 : vector<8x1xf32>
    %690 = vector.broadcast %689 : vector<8x1xf32> to vector<8x16xf32>
    %691 = arith.subf %684, %690 : vector<8x16xf32>
    %692 = arith.mulf %691, %691 : vector<8x16xf32>
    %cst_198 = arith.constant dense<0.000000e+00> : vector<8xf32>
    %693 = vector.multi_reduction <add>, %692, %cst_198 [1] : vector<8x16xf32> to vector<8xf32>
    %694 = vector.shape_cast %693 : vector<8xf32> to vector<8x1xf32>
    %cst_199 = arith.constant 1.600000e+01 : f32
    %695 = vector.broadcast %cst_199 : f32 to vector<8x1xf32>
    %696 = arith.divf %694, %695 : vector<8x1xf32>
    %697 = vector.broadcast %689 : vector<8x1xf32> to vector<8x16xf32>
    %698 = arith.subf %684, %697 : vector<8x16xf32>
    %cst_200 = arith.constant 9.99999974E-6 : f32
    %699 = vector.broadcast %cst_200 : f32 to vector<8x1xf32>
    %700 = arith.addf %696, %699 : vector<8x1xf32>
    %701 = math.rsqrt %700 : vector<8x1xf32>
    %702 = vector.broadcast %701 : vector<8x1xf32> to vector<8x16xf32>
    %703 = arith.mulf %698, %702 : vector<8x16xf32>
    %704 = vector.extract_strided_slice %685 {offsets = [0, 0], sizes = [1, 16], strides = [1, 1]} : vector<1x32xf32> to vector<1x16xf32>
    %705 = vector.broadcast %704 : vector<1x16xf32> to vector<8x16xf32>
    %706 = arith.mulf %703, %705 : vector<8x16xf32>
    %707 = vector.extract_strided_slice %685 {offsets = [0, 16], sizes = [1, 16], strides = [1, 1]} : vector<1x32xf32> to vector<1x16xf32>
    %708 = vector.broadcast %707 : vector<1x16xf32> to vector<8x16xf32>
    %709 = arith.addf %706, %708 : vector<8x16xf32>
    %c200 = arith.constant 200 : index
    %c0_201 = arith.constant 0 : index
    %710 = vector.load %arg1[%c200, %c0_201] : memref<416x48xf32, #tpu.memory_space<vmem>>, vector<16x48xf32>
    %c216 = arith.constant 216 : index
    %c0_202 = arith.constant 0 : index
    %711 = vector.load %arg1[%c216, %c0_202] : memref<416x48xf32, #tpu.memory_space<vmem>>, vector<16x16xf32>
    %c232 = arith.constant 232 : index
    %c0_203 = arith.constant 0 : index
    %712 = vector.load %arg1[%c232, %c0_203] : memref<416x48xf32, #tpu.memory_space<vmem>>, vector<1x48xf32>
    %c233 = arith.constant 233 : index
    %c0_204 = arith.constant 0 : index
    %713 = vector.load %arg1[%c233, %c0_204] : memref<416x48xf32, #tpu.memory_space<vmem>>, vector<1x16xf32>
    %714 = vector.extract_strided_slice %710 {offsets = [0, 0], sizes = [16, 16], strides = [1, 1]} : vector<16x48xf32> to vector<16x16xf32>
    %cst_205 = arith.constant dense<0.000000e+00> : vector<8x16xf32>
    %715 = tpu.matmul %709, %714, %cst_205 {dimension_numbers = #tpu.dot_dimension_numbers<[1], [0], [0], [1], [0, 0, 1, 1], [], []>} : vector<8x16xf32>, vector<16x16xf32>, vector<8x16xf32> -> vector<8x16xf32>
    %716 = vector.extract_strided_slice %712 {offsets = [0, 0], sizes = [1, 16], strides = [1, 1]} : vector<1x48xf32> to vector<1x16xf32>
    %717 = vector.broadcast %716 : vector<1x16xf32> to vector<8x16xf32>
    %718 = arith.addf %715, %717 : vector<8x16xf32>
    %719 = vector.extract_strided_slice %710 {offsets = [0, 16], sizes = [16, 32], strides = [1, 1]} : vector<16x48xf32> to vector<16x32xf32>
    %cst_206 = arith.constant dense<0.000000e+00> : vector<12x32xf32>
    %720 = tpu.matmul %494, %719, %cst_206 {dimension_numbers = #tpu.dot_dimension_numbers<[1], [0], [0], [1], [0, 0, 1, 1], [], []>} : vector<12x16xf32>, vector<16x32xf32>, vector<12x32xf32> -> vector<12x32xf32>
    %721 = vector.extract_strided_slice %712 {offsets = [0, 16], sizes = [1, 32], strides = [1, 1]} : vector<1x48xf32> to vector<1x32xf32>
    %722 = vector.broadcast %721 : vector<1x32xf32> to vector<12x32xf32>
    %723 = arith.addf %720, %722 : vector<12x32xf32>
    %cst_207 = arith.constant dense<0.000000e+00> : vector<96x32xf32>
    %724 = tpu.matmul %56, %723, %cst_207 {dimension_numbers = #tpu.dot_dimension_numbers<[1], [0], [0], [1], [0, 0, 1, 1], [], []>} : vector<96x12xf32>, vector<12x32xf32>, vector<96x32xf32> -> vector<96x32xf32>
    %725 = vector.extract_strided_slice %724 {offsets = [0, 0], sizes = [96, 16], strides = [1, 1]} : vector<96x32xf32> to vector<96x16xf32>
    %726 = arith.mulf %725, %40 : vector<96x16xf32>
    %727 = vector.extract_strided_slice %724 {offsets = [0, 16], sizes = [96, 16], strides = [1, 1]} : vector<96x32xf32> to vector<96x16xf32>
    %728 = arith.mulf %727, %40 : vector<96x16xf32>
    %cst_208 = arith.constant dense<0.000000e+00> : vector<8x96xf32>
    %729 = tpu.matmul %718, %726, %cst_208 {dimension_numbers = #tpu.dot_dimension_numbers<[1], [1], [0], [0], [0, 0, 1, 0], [], []>} : vector<8x16xf32>, vector<96x16xf32>, vector<8x96xf32> -> vector<8x96xf32>
    %cst_209 = arith.constant -1.000000e+30 : f32
    %730 = vector.broadcast %cst_209 : f32 to vector<8x96xf32>
    %731 = arith.select %197, %729, %730 : vector<8x96xi1>, vector<8x96xf32>
    %cst_210 = arith.constant dense<0xFF800000> : vector<8xf32>
    %732 = vector.multi_reduction <maximumf>, %731, %cst_210 [1] : vector<8x96xf32> to vector<8xf32>
    %733 = vector.shape_cast %732 : vector<8xf32> to vector<8x1xf32>
    %734 = vector.broadcast %733 : vector<8x1xf32> to vector<8x96xf32>
    %735 = arith.subf %729, %734 : vector<8x96xf32>
    %736 = math.exp %735 : vector<8x96xf32>
    %cst_211 = arith.constant 0.000000e+00 : f32
    %737 = vector.broadcast %cst_211 : f32 to vector<8x96xf32>
    %738 = arith.select %197, %736, %737 : vector<8x96xi1>, vector<8x96xf32>
    %cst_212 = arith.constant dense<0.000000e+00> : vector<8x96xf32>
    %739 = tpu.matmul %738, %26, %cst_212 {dimension_numbers = #tpu.dot_dimension_numbers<[1], [0], [0], [1], [0, 0, 1, 1], [], []>} : vector<8x96xf32>, vector<96x96xf32>, vector<8x96xf32> -> vector<8x96xf32>
    %740 = tpu.reciprocal %739 {approx = true} : vector<8x96xf32> -> vector<8x96xf32>
    %741 = arith.mulf %738, %740 : vector<8x96xf32>
    %cst_213 = arith.constant dense<0.000000e+00> : vector<8x16xf32>
    %742 = tpu.matmul %741, %728, %cst_213 {dimension_numbers = #tpu.dot_dimension_numbers<[1], [0], [0], [1], [0, 0, 1, 1], [], []>} : vector<8x96xf32>, vector<96x16xf32>, vector<8x16xf32> -> vector<8x16xf32>
    %cst_214 = arith.constant dense<0.000000e+00> : vector<8x16xf32>
    %743 = tpu.matmul %742, %711, %cst_214 {dimension_numbers = #tpu.dot_dimension_numbers<[1], [0], [0], [1], [0, 0, 1, 1], [], []>} : vector<8x16xf32>, vector<16x16xf32>, vector<8x16xf32> -> vector<8x16xf32>
    %744 = vector.broadcast %713 : vector<1x16xf32> to vector<8x16xf32>
    %745 = arith.addf %743, %744 : vector<8x16xf32>
    %746 = arith.addf %709, %745 : vector<8x16xf32>
    %c370 = arith.constant 370 : index
    %c0_215 = arith.constant 0 : index
    %747 = vector.load %arg1[%c370, %c0_215] : memref<416x48xf32, #tpu.memory_space<vmem>>, vector<1x32xf32>
    %cst_216 = arith.constant dense<0.000000e+00> : vector<8xf32>
    %748 = vector.multi_reduction <add>, %746, %cst_216 [1] : vector<8x16xf32> to vector<8xf32>
    %749 = vector.shape_cast %748 : vector<8xf32> to vector<8x1xf32>
    %cst_217 = arith.constant 1.600000e+01 : f32
    %750 = vector.broadcast %cst_217 : f32 to vector<8x1xf32>
    %751 = arith.divf %749, %750 : vector<8x1xf32>
    %752 = vector.broadcast %751 : vector<8x1xf32> to vector<8x16xf32>
    %753 = arith.subf %746, %752 : vector<8x16xf32>
    %754 = arith.mulf %753, %753 : vector<8x16xf32>
    %cst_218 = arith.constant dense<0.000000e+00> : vector<8xf32>
    %755 = vector.multi_reduction <add>, %754, %cst_218 [1] : vector<8x16xf32> to vector<8xf32>
    %756 = vector.shape_cast %755 : vector<8xf32> to vector<8x1xf32>
    %cst_219 = arith.constant 1.600000e+01 : f32
    %757 = vector.broadcast %cst_219 : f32 to vector<8x1xf32>
    %758 = arith.divf %756, %757 : vector<8x1xf32>
    %759 = vector.broadcast %751 : vector<8x1xf32> to vector<8x16xf32>
    %760 = arith.subf %746, %759 : vector<8x16xf32>
    %cst_220 = arith.constant 9.99999974E-6 : f32
    %761 = vector.broadcast %cst_220 : f32 to vector<8x1xf32>
    %762 = arith.addf %758, %761 : vector<8x1xf32>
    %763 = math.rsqrt %762 : vector<8x1xf32>
    %764 = vector.broadcast %763 : vector<8x1xf32> to vector<8x16xf32>
    %765 = arith.mulf %760, %764 : vector<8x16xf32>
    %766 = vector.extract_strided_slice %747 {offsets = [0, 0], sizes = [1, 16], strides = [1, 1]} : vector<1x32xf32> to vector<1x16xf32>
    %767 = vector.broadcast %766 : vector<1x16xf32> to vector<8x16xf32>
    %768 = arith.mulf %765, %767 : vector<8x16xf32>
    %769 = vector.extract_strided_slice %747 {offsets = [0, 16], sizes = [1, 16], strides = [1, 1]} : vector<1x32xf32> to vector<1x16xf32>
    %770 = vector.broadcast %769 : vector<1x16xf32> to vector<8x16xf32>
    %771 = arith.addf %768, %770 : vector<8x16xf32>
    %c336 = arith.constant 336 : index
    %c0_221 = arith.constant 0 : index
    %772 = vector.load %arg1[%c336, %c0_221] : memref<416x48xf32, #tpu.memory_space<vmem>>, vector<16x8xf32>
    %c352 = arith.constant 352 : index
    %c0_222 = arith.constant 0 : index
    %773 = vector.load %arg1[%c352, %c0_222] : memref<416x48xf32, #tpu.memory_space<vmem>>, vector<8x16xf32>
    %c360 = arith.constant 360 : index
    %c0_223 = arith.constant 0 : index
    %774 = vector.load %arg1[%c360, %c0_223] : memref<416x48xf32, #tpu.memory_space<vmem>>, vector<1x48xf32>
    %cst_224 = arith.constant dense<0.000000e+00> : vector<8x8xf32>
    %775 = tpu.matmul %771, %772, %cst_224 {dimension_numbers = #tpu.dot_dimension_numbers<[1], [0], [0], [1], [0, 0, 1, 1], [], []>} : vector<8x16xf32>, vector<16x8xf32>, vector<8x8xf32> -> vector<8x8xf32>
    %776 = vector.extract_strided_slice %774 {offsets = [0, 0], sizes = [1, 8], strides = [1, 1]} : vector<1x48xf32> to vector<1x8xf32>
    %777 = vector.broadcast %776 : vector<1x8xf32> to vector<8x8xf32>
    %778 = arith.addf %775, %777 : vector<8x8xf32>
    %cst_225 = arith.constant 0.000000e+00 : f32
    %779 = vector.broadcast %cst_225 : f32 to vector<8x8xf32>
    %780 = arith.maximumf %778, %779 : vector<8x8xf32>
    %cst_226 = arith.constant dense<0.000000e+00> : vector<8x16xf32>
    %781 = tpu.matmul %780, %773, %cst_226 {dimension_numbers = #tpu.dot_dimension_numbers<[1], [0], [0], [1], [0, 0, 1, 1], [], []>} : vector<8x8xf32>, vector<8x16xf32>, vector<8x16xf32> -> vector<8x16xf32>
    %782 = vector.extract_strided_slice %774 {offsets = [0, 8], sizes = [1, 16], strides = [1, 1]} : vector<1x48xf32> to vector<1x16xf32>
    %783 = vector.broadcast %782 : vector<1x16xf32> to vector<8x16xf32>
    %784 = arith.addf %781, %783 : vector<8x16xf32>
    %785 = arith.addf %771, %784 : vector<8x16xf32>
    %c371 = arith.constant 371 : index
    %c0_227 = arith.constant 0 : index
    %786 = vector.load %arg1[%c371, %c0_227] : memref<416x48xf32, #tpu.memory_space<vmem>>, vector<1x32xf32>
    %cst_228 = arith.constant dense<0.000000e+00> : vector<8xf32>
    %787 = vector.multi_reduction <add>, %785, %cst_228 [1] : vector<8x16xf32> to vector<8xf32>
    %788 = vector.shape_cast %787 : vector<8xf32> to vector<8x1xf32>
    %cst_229 = arith.constant 1.600000e+01 : f32
    %789 = vector.broadcast %cst_229 : f32 to vector<8x1xf32>
    %790 = arith.divf %788, %789 : vector<8x1xf32>
    %791 = vector.broadcast %790 : vector<8x1xf32> to vector<8x16xf32>
    %792 = arith.subf %785, %791 : vector<8x16xf32>
    %793 = arith.mulf %792, %792 : vector<8x16xf32>
    %cst_230 = arith.constant dense<0.000000e+00> : vector<8xf32>
    %794 = vector.multi_reduction <add>, %793, %cst_230 [1] : vector<8x16xf32> to vector<8xf32>
    %795 = vector.shape_cast %794 : vector<8xf32> to vector<8x1xf32>
    %cst_231 = arith.constant 1.600000e+01 : f32
    %796 = vector.broadcast %cst_231 : f32 to vector<8x1xf32>
    %797 = arith.divf %795, %796 : vector<8x1xf32>
    %798 = vector.broadcast %790 : vector<8x1xf32> to vector<8x16xf32>
    %799 = arith.subf %785, %798 : vector<8x16xf32>
    %cst_232 = arith.constant 9.99999974E-6 : f32
    %800 = vector.broadcast %cst_232 : f32 to vector<8x1xf32>
    %801 = arith.addf %797, %800 : vector<8x1xf32>
    %802 = math.rsqrt %801 : vector<8x1xf32>
    %803 = vector.broadcast %802 : vector<8x1xf32> to vector<8x16xf32>
    %804 = arith.mulf %799, %803 : vector<8x16xf32>
    %805 = vector.extract_strided_slice %786 {offsets = [0, 0], sizes = [1, 16], strides = [1, 1]} : vector<1x32xf32> to vector<1x16xf32>
    %806 = vector.broadcast %805 : vector<1x16xf32> to vector<8x16xf32>
    %807 = arith.mulf %804, %806 : vector<8x16xf32>
    %808 = vector.extract_strided_slice %786 {offsets = [0, 16], sizes = [1, 16], strides = [1, 1]} : vector<1x32xf32> to vector<1x16xf32>
    %809 = vector.broadcast %808 : vector<1x16xf32> to vector<8x16xf32>
    %810 = arith.addf %807, %809 : vector<8x16xf32>
    %c372 = arith.constant 372 : index
    %c0_233 = arith.constant 0 : index
    %811 = vector.load %arg1[%c372, %c0_233] : memref<416x48xf32, #tpu.memory_space<vmem>>, vector<1x32xf32>
    %cst_234 = arith.constant dense<0.000000e+00> : vector<8xf32>
    %812 = vector.multi_reduction <add>, %810, %cst_234 [1] : vector<8x16xf32> to vector<8xf32>
    %813 = vector.shape_cast %812 : vector<8xf32> to vector<8x1xf32>
    %cst_235 = arith.constant 1.600000e+01 : f32
    %814 = vector.broadcast %cst_235 : f32 to vector<8x1xf32>
    %815 = arith.divf %813, %814 : vector<8x1xf32>
    %816 = vector.broadcast %815 : vector<8x1xf32> to vector<8x16xf32>
    %817 = arith.subf %810, %816 : vector<8x16xf32>
    %818 = arith.mulf %817, %817 : vector<8x16xf32>
    %cst_236 = arith.constant dense<0.000000e+00> : vector<8xf32>
    %819 = vector.multi_reduction <add>, %818, %cst_236 [1] : vector<8x16xf32> to vector<8xf32>
    %820 = vector.shape_cast %819 : vector<8xf32> to vector<8x1xf32>
    %cst_237 = arith.constant 1.600000e+01 : f32
    %821 = vector.broadcast %cst_237 : f32 to vector<8x1xf32>
    %822 = arith.divf %820, %821 : vector<8x1xf32>
    %823 = vector.broadcast %815 : vector<8x1xf32> to vector<8x16xf32>
    %824 = arith.subf %810, %823 : vector<8x16xf32>
    %cst_238 = arith.constant 9.99999974E-6 : f32
    %825 = vector.broadcast %cst_238 : f32 to vector<8x1xf32>
    %826 = arith.addf %822, %825 : vector<8x1xf32>
    %827 = math.rsqrt %826 : vector<8x1xf32>
    %828 = vector.broadcast %827 : vector<8x1xf32> to vector<8x16xf32>
    %829 = arith.mulf %824, %828 : vector<8x16xf32>
    %830 = vector.extract_strided_slice %811 {offsets = [0, 0], sizes = [1, 16], strides = [1, 1]} : vector<1x32xf32> to vector<1x16xf32>
    %831 = vector.broadcast %830 : vector<1x16xf32> to vector<8x16xf32>
    %832 = arith.mulf %829, %831 : vector<8x16xf32>
    %833 = vector.extract_strided_slice %811 {offsets = [0, 16], sizes = [1, 16], strides = [1, 1]} : vector<1x32xf32> to vector<1x16xf32>
    %834 = vector.broadcast %833 : vector<1x16xf32> to vector<8x16xf32>
    %835 = arith.addf %832, %834 : vector<8x16xf32>
    %cst_239 = arith.constant dense<0.000000e+00> : vector<8x23xf32>
    %836 = tpu.matmul %835, %218, %cst_239 {dimension_numbers = #tpu.dot_dimension_numbers<[1], [1], [0], [0], [0, 0, 1, 0], [], []>} : vector<8x16xf32>, vector<23x16xf32>, vector<8x23xf32> -> vector<8x23xf32>
    %c400 = arith.constant 400 : index
    %c0_240 = arith.constant 0 : index
    %837 = vector.load %arg1[%c400, %c0_240] : memref<416x48xf32, #tpu.memory_space<vmem>>, vector<1x23xf32>
    %838 = vector.broadcast %837 : vector<1x23xf32> to vector<8x23xf32>
    %839 = arith.addf %836, %838 : vector<8x23xf32>
    %c0_241 = arith.constant 0 : index
    %c0_242 = arith.constant 0 : index
    %840 = vector.load %arg2[%c0_241, %c0_242] : memref<8x23xf32, #tpu.memory_space<vmem>>, vector<8x23xf32>
    tpu.vector_store %arg2[%c0_241, %c0_242], %839 {strides = array<i32>} : memref<8x23xf32, #tpu.memory_space<vmem>>, vector<8x23xf32>,
    return
  }
}

</mosaic_0001>

<bundles_post_ra>
// kernel: forward.1
= control target key start
LH: loop header
LB: loop body
LE: loop exit
PB: predicated region body
PF: predicated region fallthrough
CT: control target
= control target key end

     0   :  { %v11_v0 = vlaneseq  ;;  %v8814_v1 = vmov 0   ;;  %vm97_vm4 = vcmask 64512   ;;  %v8815_v20 = vmov 1.0   ;;  %s8819_s28 = smov 112   ;;  %s8820_s29 = smov 16   ;;  %s10807_s0 = inlined_call_operand.vmem [shape: s32[24,1], index: 0, kind: input, shape index: {}]   ;;  %s10808_s1 = inlined_call_operand.vmem [shape: f32[416,48], index: 1, kind: input, shape index: {}]   ;;  %s10809_s2 = inlined_call_operand.vmem [shape: f32[8,23], index: 2, kind: output, shape index: {}]  }
   0x1   :  { %8562 = vset.pattern.permute.xlu0 %v8814_v1  ;;  %v936_v2 = vld [vmem:[%s10807_s0] sm:$0xff]  ;;  %8563 = vset.pattern.permute.xlu1 %v8814_v1  ;;  %v937_v3 = vld [vmem:[%s10807_s0 + $0x8] sm:$0xf]  ;;  %v950_v6 = vld [vmem:[%s10807_s0 + $0x10] sm:$0xff]  ;;  %v10812_v28 = vmov 0.0   ;;  %v10810_v49 = vmov 0.0|0.0  }
   0x2   :  { %939 = vperm.xlu0 %8562, %v936_v2   ;;  %942 = vperm.xlu1 %8563, %v937_v3   ;;  %v8846_v4 = vshrl.u32 %v11_v0, 7  ;;  %v8848_v5 = vand.u32 127, %v11_v0  ;;  %v933_v42 = vld [vmem:[%s10808_s1 + $0x178] sm:$0xff]  ;;  %v934_v43 = vld [vmem:[%s10808_s1 + $0x180] sm:$0xff]  ;;  %v10946_v51 = vmov 0  ;;  %s8822_s17 = smov 120  }
   0x3   :  { %v9101_v50 = vpack.c.bf16 %v934_v43, %v933_v42  ;;  %v935_v62 = vld [vmem:[%s10808_s1 + $0x188] sm:$0x7f]  ;;  %s8823_s8 = smov 1  }
   0x4   :  { %10921 = vst [vmem:[#allocation2_spill] sm:$0xff] %v8846_v4  ;;  %v89_v7 = vmul.u32 12, %v8846_v4  ;;  %v8855_v8 = vadd.s32 1, %v8846_v4  ;;  %v8858_v9 = vadd.s32 80, %v8846_v4  ;;  %v8861_v10 = vmul.u32 12, %v8848_v5 }
   0x5   :  { %v8864_v11 = vadd.s32 1, %v8848_v5  ;;  %v8867_v12 = vadd.s32 88, %v8846_v4  ;;  %v259_v13 = vmul.u32 2, %v8846_v4  ;;  %v8891_v19 = vadd.s32 8, %v8846_v4  ;;  %10945 = vst [vmem:[#allocation10_spill] sm:$0xff] %v9101_v50 }
   0x6   :  { %952 = vperm.xlu0 %8562, %v950_v6   ;;  %vm90_vm0 = vcmp.ge.s32.totalorder %v8848_v5, %v89_v7  ;;  %v92_v14 = vmul.u32 12, %v8855_v8  ;;  %v512_v15 = vadd.s32 6, %v89_v7  ;;  %v261_v16 = vmul.u32 2, %v8855_v8 }
   0x7   :  { %v8874_v17 = vmul.u32 12, %v8864_v11  ;;  %vm37_vm3 = vcmp.ge.s32.totalorder %v8858_v9, %v8861_v10  ;;  %vm38_vm7 = vcmp.ge.s32.totalorder %v8867_v12, %v8861_v10  ;;  %10924 = vst [vmem:[#allocation3_spill] sm:$0xff] %v8891_v19  ;;  %vm8901_vm10 = vcmp.ge.s32.totalorder %v8848_v5, %v259_v13 }
   0x8   :  { %vm93_vm1 = vcmp.lt.s32.totalorder %v8848_v5, %v92_v14  ;;  %vm513_vm2 = vcmp.ge.s32.totalorder %v8848_v5, %v512_v15  ;;  %vm8906_vm11 = vcmp.lt.s32.totalorder %v8848_v5, %v261_v16  ;;  %v8914_v24 = vadd.s32 16, %v8846_v4 }
   0x9   :  { %vm8880_vm5 = vmand %vm90_vm0, %vm93_vm1  ;;  %vm51_vm6 = vcmp.lt.s32.totalorder %v8858_v9, %v8874_v17  ;;  %vm52_vm8 = vcmp.lt.s32.totalorder %v8867_v12, %v8874_v17  ;;  %v8917_v25 = vadd.s32 24, %v8846_v4  ;;  %vm27_vm13 = vcmp.ge.s32.totalorder %v8846_v4, %v8861_v10 }
   0xa   :  { %8549 = vmatprep.subr.msk.mxu1 %vm8880_vm5, %v8815_v20  ;;  %vm8896_vm9 = vmand %vm513_vm2, %vm93_vm1  ;;  %7279 = vmatprep.subr.msk.mxu0 %vm8880_vm5, %v8815_v20  ;;  %10931 = vst [vmem:[#allocation4_spill] sm:$0xff] %v8914_v24  ;;  %vm41_vm14 = vcmp.lt.s32.totalorder %v8846_v4, %v8874_v17  ;;  %v8933_v26 = vadd.s32 32, %v8846_v4  ;;  %v8936_v27 = vadd.s32 40, %v8846_v4  ;;  %vm28_vm0 = vcmp.ge.s32.totalorder %v8891_v19, %v8861_v10 }
   0xb   :  { %10932 = vst [vmem:[#allocation5_spill] sm:$0xff] %v8917_v25  ;;  %8550 = vmatpush3.msk.msra.mxu1 %vm8880_vm5, %v8815_v20  ;;  %vm63_vm12 = vmand %vm37_vm3, %vm51_vm6  ;;  %7280 = vmatpush3.msk.msra.mxu0 %vm8880_vm5, %v8815_v20  ;;  %vm42_vm1 = vcmp.lt.s32.totalorder %v8891_v19, %v8874_v17  ;;  %vm29_vm3 = vcmp.ge.s32.totalorder %v8914_v24, %v8861_v10  ;;  %v567_v32 = vmul.u32 8, %v8846_v4  ;;  %v569_v33 = vmul.u32 8, %v8855_v8 }
   0xc   :  { %10933 = vst [vmem:[#allocation6_spill] sm:$0xff] %v8933_v26  ;;  %10934 = vst [vmem:[#allocation7_spill] sm:$0xff] %v8936_v27  ;;  %v8939_v29 = vsel %vm63_vm12, 1.0, %v10812_v28  ;;  %vm43_vm5 = vcmp.lt.s32.totalorder %v8914_v24, %v8874_v17  ;;  %vm45_vm12 = vcmp.lt.s32.totalorder %v8933_v26, %v8874_v17  ;;  %v9019_v37 = vadd.s32 48, %v8846_v4 }
   0xd   :  { %vm64_vm15 = vmand %vm38_vm7, %vm52_vm8  ;;  %7296 = vmatprep.mubr.msk.f32.mxu1 %vm97_vm4, %v8939_v29  ;;  %vm30_vm7 = vcmp.ge.s32.totalorder %v8917_v25, %v8861_v10  ;;  %vm44_vm8 = vcmp.lt.s32.totalorder %v8917_v25, %v8874_v17  ;;  %v880_v36 = vadd.s32 4, %v567_v32  ;;  %v9046_v41 = vadd.s32 56, %v8846_v4 }
   0xe   :  { %v8954_v30 = vsel %vm64_vm15, 1.0, %v10812_v28  ;;  %vm8960_vm2 = vmand %vm8901_vm10, %vm8906_vm11  ;;  %vm31_vm11 = vcmp.ge.s32.totalorder %v8933_v26, %v8861_v10  ;;  %vm46_vm15 = vcmp.lt.s32.totalorder %v8936_v27, %v8874_v17  ;;  %10937 = vst [vmem:[#allocation8_spill] sm:$0xff] %v9019_v37  ;;  %v9066_v44 = vadd.s32 64, %v8846_v4 }
   0xf   :  { %7297 = vmatmul.mubr.msk.f32.vlgmr.msra.gmra.mrb[0].mxu1 %vm97_vm4, %v8954_v30  ;;  %7299 = vmatprep.subr.msk.mxu1 %vm8960_vm2, %v8815_v20  ;;  %vm53_vm6 = vmand %vm27_vm13, %vm41_vm14  ;;  %vm32_vm13 = vcmp.ge.s32.totalorder %v8936_v27, %v8861_v10  ;;  %10942 = vst [vmem:[#allocation9_spill] sm:$0xff] %v9046_v41  ;;  %v9098_v48 = vadd.s32 72, %v8846_v4  ;;  %v9119_v52 = vmul.u32 8, %v8848_v5  ;;  %v9122_v53 = vmul.u32 8, %v8864_v11 }
  0x10   :  { %7300 = vmatpush3.msk.msra.mxu1 %vm8960_vm2, %v8815_v20  ;;  %v8989_v34 = vsel %vm53_vm6, 1.0, %v10812_v28  ;;  %vm54_vm10 = vmand %vm28_vm0, %vm42_vm1  ;;  %vm9036_vm1 = vcmp.ge.s32.totalorder %v8848_v5, %v567_v32  ;;  %vm881_vm6 = vcmp.ge.s32.totalorder %v8848_v5, %v880_v36  ;;  %v9302_v15 = vcvt.s32.f32 %v8848_v5 }
  0x11   :  { %7301 = vmatprep.mubr.msk.f32.mxu1 %vm97_vm4, %v8989_v34  ;;  %v9006_v35 = vsel %vm54_vm10, 1.0, %v10812_v28  ;;  %7281 = vmatprep.mubr.msk.f32.mxu0 %vm97_vm4, %v8989_v34  ;;  %vm55_vm14 = vmand %vm29_vm3, %vm43_vm5  ;;  %vm9041_vm3 = vcmp.lt.s32.totalorder %v8848_v5, %v569_v33  ;;  %vm47_vm10 = vcmp.lt.s32.totalorder %v9019_v37, %v8874_v17 }
  0x12   :  { %v9022_v38 = vsel %vm55_vm14, 1.0, %v10812_v28  ;;  %7333 = vmatprep.subr.msk.mxu1 %vm8960_vm2, %v8815_v20  ;;  %7282 = vmatmul.mubr.msk.f32.vlgmr.msra.gmra.mrb[0].mxu0 %vm97_vm4, %v9006_v35  ;;  %vm56_vm0 = vmand %vm30_vm7, %vm44_vm8  ;;  %vm33_vm8 = vcmp.ge.s32.totalorder %v9019_v37, %v8861_v10  ;;  %10957 = vst [vmem:[#allocation20_spill] sm:$0xff] %v9302_v15  ;;  %v393_v18 = vmul.f32 %v9006_v35, %v9302_v15 }
  0x13   :  { %7302 = vmatmul.mubr.msk.f32.vlgmr.msra.gmra.mrb[2].mxu1 %vm97_vm4, %v9006_v35  ;;  %7284 = vmatprep.mubr.msk.f32.mxu0 %vm97_vm4, %v9022_v38  ;;  %vm57_vm5 = vmand %vm31_vm11, %vm45_vm12  ;;  %v9071_v45 = vsel %vm56_vm0, 1.0, %v10812_v28  ;;  %vm34_vm12 = vcmp.ge.s32.totalorder %v9046_v41, %v8861_v10  ;;  %vm49_vm0 = vcmp.lt.s32.totalorder %v9066_v44, %v8874_v17  ;;  %v394_v22 = vmul.f32 %v9022_v38, %v9302_v15 }
  0x14   :  { %7304 = vmatprep.mubr.msk.f32.mxu1 %vm97_vm4, %v9022_v38  ;;  %7334 = vmatpush3.msk.msra.mxu1 %vm8960_vm2, %v8815_v20  ;;  %vm9082_vm7 = vmand %vm32_vm13, %vm46_vm15  ;;  %v9091_v47 = vsel %vm57_vm5, 1.0, %v10812_v28  ;;  %vm48_vm13 = vcmp.lt.s32.totalorder %v9046_v41, %v8874_v17  ;;  %vm35_vm15 = vcmp.ge.s32.totalorder %v9066_v44, %v8861_v10  ;;  %vm50_vm5 = vcmp.lt.s32.totalorder %v9098_v48, %v8874_v17 }
  0x15   :  { %vm571_vm2 = vmand %vm9036_vm1, %vm9041_vm3  ;;  %8088 = vmatprep.subr.bf16.mxu1 %v10810_v49  ;;  %v9142_v54 = vsel %vm9082_vm7, 1.0, %v10812_v28  ;;  %vm526_vm7 = vcmp.ge.s32.totalorder %v8846_v4, %v9119_v52  ;;  %v392_v17 = vmul.f32 %v8989_v34, %v9302_v15  ;;  %v407_v33 = vsel %vm97_vm4, %v393_v18, 0.0 }
  0x16   :  { %7285 = vmatmul.mubr.msk.f32.gmra.mrb[2].mxu0 %vm97_vm4, %v9071_v45  ;;  %7319 = vmatprep.subr.msk.mxu0 %vm571_vm2, %v8815_v20  ;;  %vm9110_vm11 = vmand %vm881_vm6, %vm9041_vm3  ;;  %vm36_vm3 = vcmp.ge.s32.totalorder %v9098_v48, %v8861_v10  ;;  %v410_v40 = vsel %vm97_vm4, %v394_v22, 0.0  ;;  %v396_v38 = vmul.f32 %v9091_v47, %v9302_v15 }
  0x17   :  { %v10947_v51 = vsel %vm9110_vm11, 4294967295, %v10946_v51  ;;  %7305 = vmatmul.mubr.msk.f32.gmra.mrb[4].mxu1 %vm97_vm4, %v9071_v45  ;;  %7320 = vmatpush3.msk.msra.mxu0 %vm571_vm2, %v8815_v20  ;;  %vm59_vm14 = vmand %vm33_vm8, %vm47_vm10  ;;  %vm535_vm8 = vcmp.lt.s32.totalorder %v8846_v4, %v9122_v53  ;;  %v395_v20 = vmul.f32 %v9071_v45, %v9302_v15  ;;  %v404_v32 = vsel %vm97_vm4, %v392_v17, 0.0 }
  0x18   :  { %10948 = vst [vmem:[#allocation11_spill] sm:$0xff] %v10947_v51  ;;  %7307 = vmatprep.mubr.msk.f32.mxu1 %vm97_vm4, %v9091_v47  ;;  %7287 = vmatprep.mubr.msk.f32.mxu0 %vm97_vm4, %v9091_v47  ;;  %v9147_v55 = vsel %vm59_vm14, 1.0, %v10812_v28  ;;  %vm60_vm1 = vmand %vm34_vm12, %vm48_vm13  ;;  %vm527_vm12 = vcmp.ge.s32.totalorder %v8891_v19, %v9119_v52  ;;  %vm536_vm13 = vcmp.lt.s32.totalorder %v8891_v19, %v9122_v53 }
  0x19   :  { %8085 = vmatprep.subr.bf16.mxu0 %v9101_v50  ;;  %vm61_vm6 = vmand %vm35_vm15, %vm49_vm0  ;;  %v9167_v56 = vsel %vm60_vm1, 1.0, %v10812_v28  ;;  %vm528_vm14 = vcmp.ge.s32.totalorder %v8914_v24, %v9119_v52  ;;  %vm537_vm15 = vcmp.lt.s32.totalorder %v8914_v24, %v9122_v53  ;;  %v413_v35 = vsel %vm97_vm4, %v395_v20, 0.0 }
  0x1a   :  { %7288 = vmatmul.mubr.msk.f32.gmra.mrb[4].mxu0 %vm97_vm4, %v9142_v54  ;;  %vm62_vm10 = vmand %vm36_vm3, %vm50_vm5  ;;  %v9170_v57 = vsel %vm61_vm6, 1.0, %v10812_v28  ;;  %vm529_vm3 = vcmp.ge.s32.totalorder %v8917_v25, %v9119_v52  ;;  %vm538_vm5 = vcmp.lt.s32.totalorder %v8917_v25, %v9122_v53  ;;  %vm530_vm6 = vcmp.ge.s32.totalorder %v8933_v26, %v9119_v52 }
  0x1b   :  { %7308 = vmatmul.mubr.msk.f32.gmra.mrb[6].mxu1 %vm97_vm4, %v9142_v54  ;;  %7290 = vmatprep.mubr.msk.f32.mxu0 %vm97_vm4, %v9147_v55  ;;  %vm543_vm2 = vmand %vm526_vm7, %vm535_vm8  ;;  %v9189_v58 = vsel %vm62_vm10, 1.0, %v10812_v28  ;;  %vm539_vm7 = vcmp.lt.s32.totalorder %v8933_v26, %v9122_v53 }
  0x1c   :  { %7310 = vmatprep.mubr.msk.f32.mxu1 %vm97_vm4, %v9147_v55  ;;  %v9192_v59 = vsel %vm543_vm2, 1.0, %v10812_v28  ;;  %vm544_vm0 = vmand %vm527_vm12, %vm536_vm13  ;;  %vm531_vm2 = vcmp.ge.s32.totalorder %v8936_v27, %v9119_v52  ;;  %vm540_vm12 = vcmp.lt.s32.totalorder %v8936_v27, %v9122_v53  ;;  %vm532_vm13 = vcmp.ge.s32.totalorder %v9019_v37, %v9119_v52 }
  0x1d   :  { %10949 = vst [vmem:[#allocation12_spill] sm:$0xff] %v9192_v59  ;;  %vm545_vm1 = vmand %vm528_vm14, %vm537_vm15  ;;  %v9209_v60 = vsel %vm544_vm0, 1.0, %v10812_v28  ;;  %vm541_vm14 = vcmp.lt.s32.totalorder %v9019_v37, %v9122_v53  ;;  %vm969_vm15 = vcmask 1046528  }
  0x1e   :  { %7291 = vmatmul.mubr.msk.f32.gmra.mrb[6].mxu0 %vm97_vm4, %v9167_v56  ;;  %10950 = vst [vmem:[#allocation13_spill] sm:$0xff] %v9209_v60  ;;  %v9214_v61 = vsel %vm545_vm1, 1.0, %v10812_v28  ;;  %vm546_vm8 = vmand %vm529_vm3, %vm538_vm5  ;;  %vm533_vm3 = vcmp.ge.s32.totalorder %v9046_v41, %v9119_v52  ;;  %vm542_vm5 = vcmp.lt.s32.totalorder %v9046_v41, %v9122_v53  ;;  %v416_v53 = vsel %vm97_vm4, %v396_v38, 0.0 }
  0x1f   :  { %7311 = vmatmul.mubr.msk.f32.gmra.mrb[8].mxu1 %vm97_vm4, %v9167_v56  ;;  %7293 = vmatprep.mubr.msk.f32.mxu0 %vm97_vm4, %v9170_v57  ;;  %10951 = vst [vmem:[#allocation14_spill] sm:$0xff] %v9214_v61  ;;  %vm547_vm10 = vmand %vm530_vm6, %vm539_vm7  ;;  %v9234_v63 = vsel %vm546_vm8, 1.0, %v10812_v28  ;;  %vm8818_vm7 = vmmov 0   ;;  %vm962_vm8 = vcmask 187392  }
  0x20   :  { %7313 = vmatprep.mubr.msk.f32.mxu1 %vm97_vm4, %v9170_v57  ;;  %10952 = vst [vmem:[#allocation15_spill] sm:$0xff] %v9234_v63  ;;  %v9240_v0 = vsel %vm547_vm10, 1.0, %v10812_v28  ;;  %vm548_vm0 = vmand %vm531_vm2, %vm540_vm12 }
  0x21   :  { %10953 = vst [vmem:[#allocation16_spill] sm:$0xff] %v9240_v0  ;;  %vm549_vm1 = vmand %vm532_vm13, %vm541_vm14  ;;  %v9254_v1 = vsel %vm548_vm0, 1.0, %v10812_v28  ;;  %vm1331_vm0 = vcmask 130048  }
  0x22   :  { %7294 = vmatmul.mubr.msk.f32.gmra.mrb[8].mxu0 %vm97_vm4, %v9189_v58  ;;  %10954 = vst [vmem:[#allocation17_spill] sm:$0xff] %v9254_v1  ;;  %v9260_v2 = vsel %vm549_vm1, 1.0, %v10812_v28  ;;  %vm550_vm6 = vmand %vm533_vm3, %vm542_vm5  ;;  %vm1420_vm3 = vcmask 97280   ;;  %vm1457_vm5 = vcmask 1043456  }
  0x23   :  { %7314 = vmatmul.mubr.msk.f32.gmra.mrb[10].mxu1 %vm97_vm4, %v9189_v58  ;;  %7321 = vmatprep.mubr.msk.f32.mxu0 %vm97_vm4, %v9192_v59  ;;  %10955 = vst [vmem:[#allocation18_spill] sm:$0xff] %v9260_v2  ;;  %v9272_v3 = vsel %vm550_vm6, 1.0, %v10812_v28 }
  0x24   :  { %7316 = vmatprep.mubr.msk.f32.mxu1 %vm97_vm4, %v8939_v29  ;;  %10956 = vst [vmem:[#allocation19_spill] sm:$0xff] %v9272_v3 }
  0x25   :  { %408 = vadd.xlane.f32.xlu0 %v407_v33 }
  0x26   :  { %7322 = vmatmul.mubr.msk.f32.vlgmr.msra.gmra.mrb[10].mxu0 %vm97_vm4, %v9209_v60  ;;  %405 = vadd.xlane.f32.xlu1 %v404_v32 }
  0x27   :  { %7317 = vmatmul.mubr.msk.f32.gmra.mrb[12].mxu1 %vm97_vm4, %v8954_v30  ;;  %7324 = vmatprep.mubr.msk.f32.mxu0 %vm97_vm4, %v9214_v61 }
  0x28   :  { %7335 = vmatprep.mubr.msk.f32.mxu1 %vm97_vm4, %v9192_v59  ;;  %8087 = vmatpush3.bf16.msra.mxu0 %v9101_v50 }
  0x29   :  { %7351 = vmatprep.subr.msk.mxu0 %vm969_vm15, %v935_v62  ;;  %411 = vadd.xlane.f32.xlu0 %v410_v40  ;;  %v400_v40 = vmul.f32 %v9170_v57, %v9302_v15 }
  0x2a   :  { %7325 = vmatmul.mubr.msk.f32.gmra.mrb[12].mxu0 %vm97_vm4, %v9234_v63  ;;  %414 = vadd.xlane.f32.xlu1 %v413_v35 }
  0x2b   :  { %7336 = vmatmul.mubr.msk.f32.vlgmr.msra.gmra.mrb[14].mxu1 %vm97_vm4, %v9209_v60  ;;  %7327 = vmatprep.mubr.msk.f32.mxu0 %vm97_vm4, %v9240_v0 }
  0x2c   :  { %7338 = vmatprep.mubr.msk.f32.mxu1 %vm97_vm4, %v9214_v61  ;;  %8090 = vmatpush3.bf16.msra.mxu1 %v9101_v50  ;;  %v925_v50 = vmul.u32 4, %v8855_v8 }
  0x2d   :  { %7360 = vmatprep.subr.mxu1 %v10812_v28  ;;  %7352 = vmatpush3.msk.msra.mxu0 %vm969_vm15, %v935_v62 }
  0x2e   :  { %7328 = vmatmul.mubr.msk.f32.gmra.mrb[14].mxu0 %vm97_vm4, %v9254_v1  ;;  %7365 = vmatprep.subr.mxu0 %v10812_v28  ;;  %vm926_vm14 = vcmp.lt.s32.totalorder %v8848_v5, %v925_v50 }
  0x2f   :  { %7339 = vmatmul.mubr.msk.f32.gmra.mrb[16].mxu1 %vm97_vm4, %v9234_v63  ;;  %7330 = vmatprep.mubr.msk.f32.mxu0 %vm97_vm4, %v9260_v2 }
  0x30   :  { %7341 = vmatprep.mubr.msk.f32.mxu1 %vm97_vm4, %v9240_v0  ;;  %7361 = vmatpush3.msk.msra.mxu1 %vm969_vm15, %v935_v62  ;;  %v397_v62 = vmul.f32 %v9142_v54, %v9302_v15 }
  0x31   :  { %7370 = vmatprep.subr.mxu1 %v10812_v28  ;;  %417 = vadd.xlane.f32.xlu1 %v416_v53 }
  0x32   :  { %7331 = vmatmul.mubr.msk.f32.gmra.mrb[16].mxu0 %vm97_vm4, %v9272_v3 }
  0x33   :  { %7342 = vmatmul.mubr.msk.f32.gmra.mrb[18].mxu1 %vm97_vm4, %v9254_v1 }
  0x34   :  { %7344 = vmatprep.mubr.msk.f32.mxu1 %vm97_vm4, %v9260_v2 }
  0x37   :  { %7345 = vmatmul.mubr.msk.f32.gmra.mrb[20].mxu1 %vm97_vm4, %v9272_v3 }
  0x38   :  { %7362 = vmatprep.mubr.msk.f32.mxu1 %vm8818_vm7, %v10812_v28 }
  0x81   :  { %v940_v6 = vpop.permute.xlu0 %939  ;;  %v943_v7 = vpop.permute.xlu1 %942 }
  0x82   :  { %vm944_vm10 = vcmp.eq.s32.totalorder %v940_v6, %v8848_v5  ;;  %vm945_vm2 = vcmp.eq.s32.totalorder %v943_v7, %v8848_v5 }
  0x83   :  { %v6624_v10 = vsel %vm944_vm10, 1.0, %v10812_v28  ;;  %v6625_v11 = vsel %vm945_vm2, 1.0, %v10812_v28  ;;  %vm8821_vm10 = vmmov 1  }
  0x84   :  { %7353 = vmatprep.mubr.msk.f32.mxu0 %vm962_vm8, %v6624_v10  ;;  %vm9465_vm2 = vmpackc.low %vm1457_vm5, %vm8821_vm10 }
  0x85   :  { %v953_v13 = vpop.permute.xlu0 %952  ;;  %7354 = vmatmul.mubr.msk.f32.vlgmr.msra.gmra.mrb[18].mxu0 %vm962_vm8, %v6625_v11 }
  0x86   :  { %vm954_vm12 = vcmp.eq.s32.totalorder %v953_v13, %v8848_v5  ;;  %7367 = vmatprep.mubr.msk.f32.mxu0 %vm8818_vm7, %v10812_v28  ;;  %v419_v13 = vsel %vm97_vm4, %v397_v62, 0.0  ;;  %v428_v62 = vsel %vm97_vm4, %v400_v40, 0.0 }
  0x87   :  { %v6626_v14 = vsel %vm954_vm12, 1.0, %v10812_v28  ;;  %420 = vadd.xlane.f32.xlu1 %v419_v13 }
  0x88   :  { %7363 = vmatmul.mubr.msk.f32.vlgmr.msra.gmra.mrb[22].mxu1 %vm962_vm8, %v6626_v14  ;;  %v398_v14 = vmul.f32 %v9147_v55, %v9302_v15 }
  0x89   :  { %7372 = vmatprep.mubr.msk.f32.mxu1 %vm8818_vm7, %v10812_v28 }
  0x8a   :  { %v422_v22 = vsel %vm97_vm4, %v398_v14, 0.0 }
  0x8b   :  { %423 = vadd.xlane.f32.xlu1 %v422_v22 }
  0xe2   :  { %v7298_v16 = vpop.f32.mrb[0].mxu1 }
  0xe3   :  { %v250_v23 = vpop.f32.mrb[1].mxu1 }
  0xe4   :  { %v9312_v31 = vpack.c.bf16 %v7298_v16, %v250_v23  ;;  %v399_v23 = vmul.f32 %v9167_v56, %v9302_v15 }
  0xe5   :  { %v7283_v36 = vpop.f32.mrb[0].mxu0 }
  0xe6   :  { %v9316_v34 = vpop.f32.mrb[2].mxu1  ;;  %v200_v39 = vpop.f32.mrb[1].mxu0  ;;  %v425_v35 = vsel %vm97_vm4, %v399_v23, 0.0 }
  0xe7   :  { %10958 = vst [vmem:[#allocation21_spill] sm:$0xff] %v9316_v34  ;;  %v9322_v42 = vpop.f32.mrb[3].mxu1  ;;  %v9324_v43 = vpack.c.bf16 %v7283_v36, %v200_v39  ;;  %426 = vadd.xlane.f32.xlu1 %v425_v35 }
  0xe8   :  { %10959 = vst [vmem:[#allocation22_spill] sm:$0xff] %v9322_v42 }
  0xe9   :  { %v7286_v45 = vpop.f32.mrb[2].mxu0 }
  0xea   :  { %v9326_v46 = vpop.f32.mrb[4].mxu1  ;;  %v210_v52 = vpop.f32.mrb[3].mxu0 }
  0xeb   :  { %10960 = vst [vmem:[#allocation23_spill] sm:$0xff] %v9326_v46  ;;  %v9331_v6 = vpop.f32.mrb[5].mxu1  ;;  %v9333_v7 = vpack.c.bf16 %v7286_v45, %v210_v52  ;;  %429 = vadd.xlane.f32.xlu1 %v428_v62 }
  0xec   :  { %10961 = vst [vmem:[#allocation24_spill] sm:$0xff] %v9331_v6 }
  0xed   :  { %v7289_v47 = vpop.f32.mrb[4].mxu0 }
  0xee   :  { %v9335_v10 = vpop.f32.mrb[6].mxu1  ;;  %v220_v11 = vpop.f32.mrb[5].mxu0 }
  0xef   :  { %10962 = vst [vmem:[#allocation25_spill] sm:$0xff] %v9335_v10  ;;  %v9340_v16 = vpop.f32.mrb[7].mxu1  ;;  %v9342_v17 = vpack.c.bf16 %v7289_v47, %v220_v11 }
  0xf0   :  { %10963 = vst [vmem:[#allocation26_spill] sm:$0xff] %v9340_v16 }
  0xf1   :  { %v7292_v18 = vpop.f32.mrb[6].mxu0 }
  0xf2   :  { %v9344_v54 = vpop.f32.mrb[8].mxu1  ;;  %v230_v20 = vpop.f32.mrb[7].mxu0 }
  0xf3   :  { %10964 = vst [vmem:[#allocation27_spill] sm:$0xff] %v9344_v54  ;;  %v9349_v32 = vpop.f32.mrb[9].mxu1  ;;  %v9351_v33 = vpack.c.bf16 %v7292_v18, %v230_v20 }
  0xf4   :  { %10965 = vst [vmem:[#allocation28_spill] sm:$0xff] %v9349_v32 }
  0xf5   :  { %v7295_v36 = vpop.f32.mrb[8].mxu0 }
  0xf6   :  { %v9353_v55 = vpop.f32.mrb[10].mxu1  ;;  %v240_v39 = vpop.f32.mrb[9].mxu0 }
  0xf7   :  { %10966 = vst [vmem:[#allocation29_spill] sm:$0xff] %v9353_v55  ;;  %v9358_v38 = vpop.f32.mrb[11].mxu1  ;;  %v9360_v45 = vpack.c.bf16 %v7295_v36, %v240_v39 }
  0xf8   :  { %10967 = vst [vmem:[#allocation30_spill] sm:$0xff] %v9358_v38 }
  0xf9   :  { %v7323_v52 = vpop.f32.mrb[10].mxu0 }
  0xfa   :  { %v9362_v56 = vpop.f32.mrb[12].mxu1  ;;  %v664_v53 = vpop.f32.mrb[11].mxu0 }
  0xfb   :  { %10968 = vst [vmem:[#allocation31_spill] sm:$0xff] %v9362_v56  ;;  %v9365_v47 = vpop.f32.mrb[13].mxu1  ;;  %v9367_v11 = vpack.c.bf16 %v7323_v52, %v664_v53 }
  0xfc   :  { %10969 = vst [vmem:[#allocation32_spill] sm:$0xff] %v9365_v47 }
  0xfd   :  { %10970 = vst [vmem:[#allocation33_spill] sm:$0xff] %v9367_v11  ;;  %v7326_v13 = vpop.f32.mrb[12].mxu0  ;;  %v10833_v11 = vcvt.s32.f32 %v8914_v24 }
  0xfe   :  { %v9369_v14 = vpop.f32.mrb[14].mxu1  ;;  %v674_v57 = vpop.f32.mrb[13].mxu0 }
  0xff   :  { %10971 = vst [vmem:[#allocation34_spill] sm:$0xff] %v9369_v14  ;;  %v9371_v18 = vpop.f32.mrb[15].mxu1  ;;  %v9373_v20 = vpack.c.bf16 %v7326_v13, %v674_v57  ;;  %v923_v57 = vmul.u32 4, %v8846_v4  ;;  %v10838_v14 = vcvt.s32.f32 %v8933_v26 }
 0x100   :  { %10972 = vst [vmem:[#allocation35_spill] sm:$0xff] %v9371_v18 }
 0x101   :  { %10973 = vst [vmem:[#allocation36_spill] sm:$0xff] %v9373_v20  ;;  %v7329_v22 = vpop.f32.mrb[14].mxu0  ;;  %vm924_vm13 = vcmp.ge.s32.totalorder %v8848_v5, %v923_v57 }
 0x102   :  { %v9375_v23 = vpop.f32.mrb[16].mxu1  ;;  %v684_v36 = vpop.f32.mrb[15].mxu0  ;;  %vm927_vm15 = vmand %vm924_vm13, %vm926_vm14 }
 0x103   :  { %10974 = vst [vmem:[#allocation37_spill] sm:$0xff] %v9375_v23  ;;  %v9377_v39 = vpop.f32.mrb[17].mxu1  ;;  %v9379_v35 = vpack.c.bf16 %v7329_v22, %v684_v36  ;;  %v1321_v22 = vld [vmem:[%s10808_s1] sm:$0xff]  ;;  %v1322_v36 = vld [vmem:[%s10808_s1 + $0x8] sm:$0xff] }
 0x104   :  { %10975 = vst [vmem:[#allocation38_spill] sm:$0xff] %v9377_v39  ;;  %v8091_v8 = vpack.c.bf16 %v1322_v36, %v1321_v22  ;;  %v403_v22 = vmul.f32 %v8954_v30, %v9302_v15 }
 0x105   :  { %10976 = vst [vmem:[#allocation39_spill] sm:$0xff] %v9379_v35  ;;  %v7332_v40 = vpop.f32.mrb[16].mxu0 }
 0x106   :  { %v9381_v52 = vpop.f32.mrb[18].mxu1  ;;  %v694_v53 = vpop.f32.mrb[17].mxu0  ;;  %v437_v36 = vsel %vm97_vm4, %v403_v22, 0.0 }
 0x107   :  { %10977 = vst [vmem:[#allocation40_spill] sm:$0xff] %v9381_v52  ;;  %v9383_v62 = vpop.f32.mrb[19].mxu1  ;;  %v9385_v49 = vpack.c.bf16 %v7332_v40, %v694_v53  ;;  %v6627_v53 = vld [vmem:[%s10808_s1 + $0x18f] ss:$0 sm:$0xff] }
 0x108   :  { %10978 = vst [vmem:[#allocation41_spill] sm:$0xff] %v9383_v62 }
 0x109   :  { %10979 = vst [vmem:[#allocation42_spill] sm:$0xff] %v9385_v49 }
 0x10a   :  { %v9387_v28 = vpop.f32.mrb[20].mxu1 }
 0x10b   :  { %10980 = vst [vmem:[#allocation43_spill] sm:$0xff] %v9387_v28  ;;  %v9389_v13 = vpop.f32.mrb[21].mxu1  ;;  %v10982_v28 = vmov 0.0  }
 0x10c   :  { %10981 = vst [vmem:[#allocation44_spill] sm:$0xff] %v9389_v13  ;;  %v6622_v57 = vsel %vm927_vm15, 1.0, %v10982_v28 }
 0x158   :  { %v7355_v40 = vpop.f32.mrb[18].mxu0 }
 0x159   :  { %v1039_v51 = vpop.f32.mrb[19].mxu0  ;;  %v9413_v35 = vadd.f32 %v7355_v40, %v6627_v53  ;;  %v406_v40 = vpop.xlane.xlu1 %405 }
 0x15a   :  { %v9407_v5 = vadd.f32 %v6627_v53, %v1039_v51  ;;  %v10821_v53 = vcvt.s32.f32 %v8846_v4 }
 0x15b   :  { %v9405_v18 = vpop.f32.mrb[22].mxu1 }
 0x15c   :  { %10983 = vst [vmem:[#allocation45_spill] sm:$0xff] %v9405_v18  ;;  %v1194_v50 = vmul.f32 %v9405_v18, %v9405_v18  ;;  %v7364_v49 = vpop.f32.mrb[23].mxu1  ;;  %7366 = vmatpush3.msra.mxu0 %v9405_v18 }
 0x15d   :  { %7368 = vmatmul.mubr.msk.f32.vlgmr.msra.gmra.mrb[20].mxu0 %vm97_vm4, %v6622_v57  ;;  %8092 = vmatprep.subr.bf16.mxu0 %v8091_v8  ;;  %v401_v49 = vmul.f32 %v9189_v58, %v9302_v15  ;;  %v6635_v58 = vld [vmem:[%s10808_s1 + $0x20] ss:$0 sm:$0xff] }
 0x15e   :  { %7371 = vmatpush3.msra.mxu1 %v1194_v50  ;;  %8094 = vmatpush3.bf16.msra.mxu0 %v8091_v8  ;;  %v452_v8 = vmul.f32 12.0, %v406_v40  ;;  %v402_v40 = vmul.f32 %v8939_v29, %v9302_v15  ;;  %v409_v29 = vpop.xlane.xlu0 %408 }
 0x15f   :  { %7379 = vmatprep.mubr.msk.f32.mxu0 %vm1331_vm0, %v9407_v5  ;;  %7373 = vmatmul.mubr.msk.f32.vlgmr.msra.gmra.mrb[24].mxu1 %vm97_vm4, %v6622_v57  ;;  %v431_v51 = vsel %vm97_vm4, %v401_v49, 0.0 }
 0x160   :  { %432 = vadd.xlane.f32.xlu1 %v431_v51  ;;  %v464_v57 = vsub.f32 %v10821_v53, %v452_v8  ;;  %v434_v8 = vsel %vm97_vm4, %v402_v40, 0.0  ;;  %v10832_v40 = vcvt.s32.f32 %v8891_v19 }
 0x161   :  { %7380 = vmatmul.mubr.msk.f32.vlgmr.msra.gmra.mrb[22].mxu0 %vm1331_vm0, %v9413_v35 }
 0x162   :  { %vm476_vm1 = vcmp.eq.f32.partialorder %v464_v57, %v9302_v15  ;;  %v412_v53 = vpop.xlane.xlu0 %411 }
 0x163   :  { %v9436_v30 = vsel %vm476_vm1, 1.0, %v10982_v28  ;;  %v454_v13 = vmul.f32 12.0, %v412_v53 }
 0x164   :  { %438 = vadd.xlane.f32.xlu1 %v437_v36  ;;  %7386 = vmatprep.mubr.msk.f32.mxu1 %vm1420_vm3, %v9436_v30 }
 0x165   :  { %v466_v39 = vsub.f32 %v10833_v11, %v454_v13  ;;  %v10837_v13 = vcvt.s32.f32 %v8936_v27 }
 0x167   :  { %vm478_vm12 = vcmp.eq.f32.partialorder %v466_v39, %v9302_v15 }
 0x230   :  { %v9429_v50 = vpop.f32.mrb[20].mxu0 }
 0x231   :  { %10984 = vst [vmem:[#allocation46_spill] sm:$0xff] %v9429_v50  ;;  %v7369_v20 = vpop.f32.mrb[21].mxu0 }
 0x232   :  { %v9450_v57 = vpop.f32.mrb[24].mxu1 }
 0x233   :  { %10985 = vst [vmem:[#allocation47_spill] sm:$0xff] %v9450_v57 }
 0x234   :  { %v7381_v49 = vpop.f32.mrb[22].mxu0 }
 0x235   :  { %v9440_v51 = vadd.f32 %v7381_v49, %v6635_v58  ;;  %v1404_v22 = vpop.f32.mrb[23].mxu0  ;;  %v415_v49 = vpop.xlane.xlu1 %414 }
 0x236   :  { %v1405_v36 = vadd.f32 %v6635_v58, %v1404_v22  ;;  %v7374_v58 = vpop.f32.mrb[25].mxu1  ;;  %v455_v23 = vmul.f32 12.0, %v415_v49 }
 0x237   :  { %v10839_v58 = vcvt.s32.f32 %v8917_v25 }
 0x238   :  { %v8564_v20 = vpack.i.bf16 %v9440_v51, %v1405_v36  ;;  %7428 = vmatprep.mubr.msk.f32.mxu0 %vm1331_vm0, %v1405_v36 }
 0x239   :  { %v418_v22 = vpop.xlane.xlu1 %417  ;;  %v467_v49 = vsub.f32 %v10839_v58, %v455_v23 }
 0x23a   :  { %8565 = vrot.lane.b32.xlu0 %v8564_v20, %s8819_s28  ;;  %v456_v18 = vmul.f32 12.0, %v418_v22 }
 0x23b   :  { %vm479_vm13 = vcmp.eq.f32.partialorder %v467_v49, %v9302_v15 }
 0x23c   :  { %v468_v22 = vsub.f32 %v10838_v14, %v456_v18 }
 0x23d   :  { %v421_v36 = vpop.xlane.xlu1 %420 }
 0x23e   :  { %v457_v11 = vmul.f32 12.0, %v421_v36  ;;  %v9488_v36 = vsel %vm478_vm12, 1.0, %v10982_v28  ;;  %vm480_vm14 = vcmp.eq.f32.partialorder %v468_v22, %v9302_v15 }
 0x240   :  { %v469_v18 = vsub.f32 %v10837_v13, %v457_v11 }
 0x241   :  { %v424_v20 = vpop.xlane.xlu1 %423 }
 0x242   :  { %v458_v24 = vmul.f32 12.0, %v424_v20  ;;  %v448_v20 = vcvt.s32.f32 %v9066_v44  ;;  %vm481_vm15 = vcmp.eq.f32.partialorder %v469_v18, %v9302_v15  ;;  %v449_v44 = vcvt.s32.f32 %v9098_v48 }
 0x243   :  { %v9518_v22 = vsel %vm481_vm15, 1.0, %v10982_v28  ;;  %vm517_vm15 = vcmask 785408  }
 0x245   :  { %v427_v52 = vpop.xlane.xlu1 %426 }
 0x259   :  { %435 = vadd.xlane.f32.xlu0 %v434_v8  ;;  %v453_v8 = vmul.f32 12.0, %v409_v29 }
 0x25b   :  { %v465_v62 = vsub.f32 %v10832_v40, %v453_v8  ;;  %v430_v8 = vpop.xlane.xlu1 %429 }
 0x25d   :  { %vm477_vm6 = vcmp.eq.f32.partialorder %v465_v62, %v9302_v15  ;;  %v459_v62 = vmul.f32 12.0, %v427_v52  ;;  %v9503_v52 = vsel %vm479_vm13, 1.0, %v10982_v28 }
 0x25e   :  { %v9481_v23 = vsel %vm477_vm6, 1.0, %v10982_v28 }
 0x26f   :  { %1611 = vrot.lane.b32.xlu0 %v9316_v34, %s8820_s29 }
 0x273   :  { %1625 = vrot.lane.b32.xlu0 %v9358_v38, %s8820_s29 }
 0x277   :  { %1629 = vrot.lane.b32.xlu0 %v9365_v47, %s8820_s29 }
 0x2ac   :  { %v8566_v3 = vpop.permute.xlu0 %8565 }
 0x2ad   :  { %v8568_v29 = vunpack.i.h.bf16 %v8566_v3  ;;  %v8567_v2 = vunpack.i.l.bf16 %v8566_v3  ;;  %v10836_v3 = vcvt.s32.f32 %v9019_v37 }
 0x2af   :  { %v8095_v40 = vpack.c.bf16 %v8568_v29, %v8567_v2  ;;  %v10835_v2 = vcvt.s32.f32 %v9046_v41  ;;  %v470_v39 = vsub.f32 %v10836_v3, %v458_v24  ;;  %v433_v29 = vpop.xlane.xlu1 %432  ;;  %v9507_v24 = vsel %vm480_vm14, 1.0, %v10982_v28  ;;  %vm9577_vm14 = vmpackc.low %vm1331_vm0, %vm1331_vm0 }
 0x2b1   :  { %8097 = vmatprep.subr.msk.bf16.mxu1 %vm9465_vm2, %v8095_v40  ;;  %v471_v11 = vsub.f32 %v10835_v2, %v459_v62  ;;  %vm482_vm1 = vcmp.eq.f32.partialorder %v470_v39, %v9302_v15 }
 0x2b2   :  { %8100 = vmatpush3.bf16.msk.msra.mxu1 %vm9465_vm2, %v8095_v40  ;;  %v460_v40 = vmul.f32 12.0, %v430_v8  ;;  %v461_v8 = vmul.f32 12.0, %v433_v29  ;;  %v9522_v48 = vsel %vm482_vm1, 1.0, %v10982_v28  ;;  %v451_v29 = vcvt.s32.f32 %v8867_v12 }
 0x2b3   :  { %8138 = vmatprep.subr.bf16.mxu1 %v9324_v43  ;;  %vm483_vm5 = vcmp.eq.f32.partialorder %v471_v11, %v9302_v15  ;;  %vm893_vm1 = vcmp.ge.s32.totalorder %v8846_v4, 6 }
 0x2b4   :  { %v472_v49 = vsub.f32 %v448_v20, %v460_v40  ;;  %v473_v62 = vsub.f32 %v449_v44, %v461_v8  ;;  %v9532_v18 = vsel %vm483_vm5, 1.0, %v10982_v28  ;;  %v439_v40 = vpop.xlane.xlu1 %438  ;;  %v450_v8 = vcvt.s32.f32 %v8858_v9 }
 0x2b5   :  { %7387 = vmatmul.mubr.msk.f32.vlgmr.msra.gmra.mrb[26].mxu1 %vm1420_vm3, %v9481_v23  ;;  %v463_v11 = vmul.f32 12.0, %v439_v40 }
 0x2b6   :  { %8140 = vmatpush3.bf16.msra.mxu1 %v9324_v43  ;;  %7389 = vmatprep.mubr.msk.f32.mxu1 %vm1420_vm3, %v9488_v36  ;;  %vm484_vm6 = vcmp.eq.f32.partialorder %v472_v49, %v9302_v15  ;;  %vm485_vm10 = vcmp.eq.f32.partialorder %v473_v62, %v9302_v15 }
 0x2b7   :  { %8142 = vmatprep.subr.bf16.mxu1 %v9333_v7  ;;  %v9536_v39 = vsel %vm484_vm6, 1.0, %v10982_v28  ;;  %v9545_v20 = vsel %vm485_vm10, 1.0, %v10982_v28  ;;  %v475_v44 = vsub.f32 %v451_v29, %v463_v11  ;;  %vm1777_vm6 = vcmask 781312  }
 0x2b8   :  { %vm2094_vm10 = vcmask 125952  }
 0x2b9   :  { %7390 = vmatmul.mubr.msk.f32.gmra.mrb[28].mxu1 %vm1420_vm3, %v9503_v52  ;;  %vm487_vm12 = vcmp.eq.f32.partialorder %v475_v44, %v9302_v15 }
 0x2ba   :  { %8144 = vmatpush3.bf16.msra.mxu1 %v9333_v7  ;;  %7392 = vmatprep.mubr.msk.f32.mxu1 %vm1420_vm3, %v9507_v24  ;;  %v9558_v3 = vsel %vm487_vm12, 1.0, %v10982_v28  ;;  %vm1265_vm12 = vcmask 123904  }
 0x2bb   :  { %8146 = vmatprep.subr.bf16.mxu1 %v9342_v17 }
 0x2bd   :  { %7393 = vmatmul.mubr.msk.f32.gmra.mrb[30].mxu1 %vm1420_vm3, %v9518_v22 }
 0x2be   :  { %8148 = vmatpush3.bf16.msra.mxu1 %v9342_v17  ;;  %7395 = vmatprep.mubr.msk.f32.mxu1 %vm1420_vm3, %v9522_v48 }
 0x2bf   :  { %8150 = vmatprep.subr.bf16.mxu1 %v9351_v33 }
 0x2c1   :  { %7396 = vmatmul.mubr.msk.f32.gmra.mrb[32].mxu1 %vm1420_vm3, %v9532_v18 }
 0x2c2   :  { %8152 = vmatpush3.bf16.msra.mxu1 %v9351_v33  ;;  %7398 = vmatprep.mubr.msk.f32.mxu1 %vm1420_vm3, %v9536_v39 }
 0x2c3   :  { %8154 = vmatprep.subr.bf16.mxu1 %v9360_v45 }
 0x2c5   :  { %7399 = vmatmul.mubr.msk.f32.gmra.mrb[34].mxu1 %vm1420_vm3, %v9545_v20 }
 0x2c6   :  { %8156 = vmatpush3.bf16.msra.mxu1 %v9360_v45 }
 0x2c7   :  { %8158 = vmatprep.subr.bf16.mxu1 %v9312_v31 }
 0x2ca   :  { %8160 = vmatpush3.bf16.msra.mxu1 %v9312_v31 }
 0x2e6   :  { %v436_v49 = vpop.xlane.xlu0 %435 }
 0x2e7   :  { %v462_v62 = vmul.f32 12.0, %v436_v49 }
 0x2e9   :  { %v474_v2 = vsub.f32 %v450_v8, %v462_v62 }
 0x2eb   :  { %vm486_vm13 = vcmp.eq.f32.partialorder %v474_v2, %v9302_v15 }
 0x2ec   :  { %v9561_v13 = vsel %vm486_vm13, 1.0, %v10982_v28 }
 0x2ed   :  { %7401 = vmatprep.mubr.msk.f32.mxu1 %vm1420_vm3, %v9561_v13 }
 0x2ee   :  { %7402 = vmatmul.mubr.msk.f32.gmra.mrb[36].mxu1 %vm1420_vm3, %v9558_v3 }
 0x388   :  { %v9567_v9 = vpop.f32.mrb[26].mxu1 }
 0x389   :  { %v1586_v12 = vmul.f32 %v9567_v9, %v9316_v34  ;;  %v9571_v40 = vpop.f32.mrb[27].mxu1 }
 0x38a   :  { %v1585_v2 = vmul.f32 %v9571_v40, %v9322_v42 }
 0x38c   :  { %v8101_v11 = vpack.c.bf16 %v1586_v12, %v1585_v2  ;;  %v9581_v44 = vpop.f32.mrb[28].mxu1 }
 0x38d   :  { %v1588_v8 = vmul.f32 %v9581_v44, %v9326_v46  ;;  %v9585_v49 = vpop.f32.mrb[29].mxu1 }
 0x38e   :  { %v1587_v62 = vmul.f32 %v9585_v49, %v9331_v6  ;;  %8103 = vmatprep.subr.msk.bf16.mxu0 %vm9577_vm14, %v8101_v11 }
 0x38f   :  { %8106 = vmatpush3.bf16.xpose.msk.msra.mxu0 %vm9577_vm14, %v8101_v11 }
 0x390   :  { %v8107_v14 = vpack.c.bf16 %v1588_v8, %v1587_v62  ;;  %v9593_v58 = vpop.f32.mrb[30].mxu1 }
 0x391   :  { %v1590_v12 = vmul.f32 %v9593_v58, %v9335_v10  ;;  %v9597_v2 = vpop.f32.mrb[31].mxu1 }
 0x392   :  { %v1589_v41 = vmul.f32 %v9597_v2, %v9340_v16  ;;  %8109 = vmatprep.subr.msk.bf16.mxu0 %vm9577_vm14, %v8107_v14 }
 0x394   :  { %v8113_v37 = vpack.c.bf16 %v1590_v12, %v1589_v41  ;;  %v9603_v27 = vpop.f32.mrb[32].mxu1 }
 0x395   :  { %v1592_v11 = vmul.f32 %v9603_v27, %v9344_v54  ;;  %v9607_v8 = vpop.f32.mrb[33].mxu1 }
 0x396   :  { %v1591_v62 = vmul.f32 %v9607_v8, %v9349_v32 }
 0x397   :  { %8112 = vmatpush3.bf16.xpose.msk.msra.mxu0 %vm9577_vm14, %v8107_v14 }
 0x398   :  { %v8119_v26 = vpack.c.bf16 %v1592_v11, %v1591_v62  ;;  %v9613_v25 = vpop.f32.mrb[34].mxu1  ;;  %8115 = vmatprep.subr.msk.bf16.mxu0 %vm9577_vm14, %v8113_v37 }
 0x399   :  { %v1594_v41 = vmul.f32 %v9613_v25, %v9353_v55  ;;  %v9619_v12 = vpop.f32.mrb[35].mxu1 }
 0x39a   :  { %v1593_v19 = vmul.f32 %v9619_v12, %v9358_v38 }
 0x39c   :  { %v8125_v0 = vpack.c.bf16 %v1594_v41, %v1593_v19 }
 0x39f   :  { %8118 = vmatpush3.bf16.xpose.msk.msra.mxu0 %vm9577_vm14, %v8113_v37 }
 0x3a0   :  { %8121 = vmatprep.subr.msk.bf16.mxu0 %vm9577_vm14, %v8119_v26 }
 0x3a7   :  { %8124 = vmatpush3.bf16.xpose.msk.msra.mxu0 %vm9577_vm14, %v8119_v26  ;;  %v6583_v26 = vsel %vm8896_vm9, 1.0, %v10982_v28 }
 0x3a8   :  { %8127 = vmatprep.subr.msk.bf16.mxu0 %vm9577_vm14, %v8125_v0 }
 0x3af   :  { %8130 = vmatpush3.bf16.xpose.msk.msra.mxu0 %vm9577_vm14, %v8125_v0  ;;  %v518_v0 = vsel %vm517_vm15, %v6583_v26, 0.0 }
 0x3b0   :  { %v519_v41 = vrot.slane %v518_v0, 4 }
 0x3b2   :  { %v520_v1 = vadd.f32 %v519_v41, %v518_v0 }
 0x3b4   :  { %v521_v59 = vrot.slane %v520_v1, 2 }
 0x3c1   :  { %v9633_v14 = vpop.f32.mrb[36].mxu1 }
 0x3c2   :  { %v1596_v19 = vmul.f32 %v9633_v14, %v9362_v56  ;;  %v9637_v11 = vpop.f32.mrb[37].mxu1 }
 0x3c3   :  { %v1595_v37 = vmul.f32 %v9637_v11, %v9365_v47 }
 0x3c5   :  { %v8131_v62 = vpack.c.bf16 %v1596_v19, %v1595_v37  ;;  %v522_v19 = vadd.f32 %v521_v59, %v520_v1 }
 0x3c7   :  { %8133 = vmatprep.subr.msk.bf16.mxu0 %vm9577_vm14, %v8131_v62  ;;  %v523_v37 = vrot.slane %v522_v19, 1 }
 0x3c8   :  { %8136 = vmatpush3.bf16.xpose.msk.msra.mxu0 %vm9577_vm14, %v8131_v62  ;;  %v6620_v62 = vsel %vm893_vm1, 1.0, %v10982_v28 }
 0x3c9   :  { %v9652_v63 = vadd.f32 %v523_v37, %v522_v19  ;;  %v901_v61 = vsub.f32 1.0, %v6620_v62 }
 0x3cb   :  { %10990 = vst [vmem:[#allocation48_spill] sm:$0xff] %v9652_v63  ;;  %v899_v21 = vmul.f32 %v6620_v62, %v9652_v63 }
 0x3cf   :  { %7429 = vmatmul.mubr.msk.f32.vlgmr.msra.gmra.mrb[24].mxu0 %vm1331_vm0, %v9440_v51  ;;  %v9656_v51 = vsub.f32 1.0, %v9652_v63 }
 0x3d1   :  { %10991 = vst [vmem:[#allocation49_spill] sm:$0xff] %v9656_v51  ;;  %v904_v60 = vmul.f32 %v9656_v51, %v901_v61  ;;  %v905_v26 = vmul.f32 0.0, %v9656_v51 }
 0x3d3   :  { %v9661_v0 = vadd.f32 %v904_v60, %v899_v21  ;;  %v9664_v59 = vadd.f32 %v905_v26, %v9652_v63 }
 0x3d5   :  { %10992 = vst [vmem:[#allocation50_spill] sm:$0xff] %v9661_v0  ;;  %10993 = vst [vmem:[#allocation51_spill] sm:$0xff] %v9664_v59  ;;  %vm908_vm9 = vcmp.gt.f32.partialorder %v9661_v0, 0.5  ;;  %vm909_vm5 = vcmp.gt.f32.partialorder %v9664_v59, 0.5 }
 0x4a2   :  { %v7430_v1 = vpop.f32.mrb[24].mxu0 }
 0x4a3   :  { %v1763_v41 = vpop.f32.mrb[25].mxu0  ;;  %v1773_v61 = vsel %vm909_vm5, %v7430_v1, -1e+30 }
 0x4a4   :  { %v1772_v19 = vsel %vm908_vm9, %v1763_v41, -1e+30  ;;  %v1778_v60 = vsel %vm1777_vm6, %v1773_v61, -inf }
 0x4a5   :  { %v1774_v37 = vsel %vm517_vm15, %v1772_v19, -inf }
 0x4a6   :  { %1775 = vmax.xlane.f32.xlu1 %v1774_v37 }
 0x4aa   :  { %1779 = vmax.xlane.f32.xlu1 %v1778_v60  ;;  %v9692_v60 = vpop.permute.xlu0 %1611 }
 0x4ab   :  { %10994 = vst [vmem:[#allocation52_spill] sm:$0xff] %v9692_v60  ;;  %v1646_v63 = vmul.f32 %v9567_v9, %v9692_v60 }
 0x4bb   :  { %1609 = vrot.lane.b32.xlu1 %v9322_v42, %s8820_s29 }
 0x4bf   :  { %1613 = vrot.lane.b32.xlu1 %v9331_v6, %s8820_s29 }
 0x4c3   :  { %1615 = vrot.lane.b32.xlu1 %v9326_v46, %s8820_s29 }
 0x4c7   :  { %1617 = vrot.lane.b32.xlu1 %v9340_v16, %s8820_s29 }
 0x4cb   :  { %1619 = vrot.lane.b32.xlu1 %v9335_v10, %s8820_s29 }
 0x4cf   :  { %1621 = vrot.lane.b32.xlu1 %v9349_v32, %s8820_s29 }
 0x4d3   :  { %1623 = vrot.lane.b32.xlu1 %v9344_v54, %s8820_s29 }
 0x4d7   :  { %1627 = vrot.lane.b32.xlu1 %v9353_v55, %s8820_s29 }
 0x4db   :  { %1631 = vrot.lane.b32.xlu1 %v9362_v56, %s8820_s29 }
 0x533   :  { %v1776_v62 = vpop.xlane.xlu1 %1775 }
 0x534   :  { %v1781_v21 = vsub.f32 %v1763_v41, %v1776_v62 }
 0x536   :  { %v1783_v26 = vmul.f32 1.442695, %v1781_v21 }
 0x537   :  { %v1780_v19 = vpop.xlane.xlu1 %1779 }
 0x538   :  { %8745 = vpow2.f32 %v1783_v26  ;;  %v1782_v37 = vsub.f32 %v7430_v1, %v1780_v19 }
 0x53a   :  { %v1785_v61 = vmul.f32 1.442695, %v1782_v37 }
 0x53b   :  { %v9694_v51 = vpop.permute.xlu1 %1609 }
 0x53c   :  { %10995 = vst [vmem:[#allocation53_spill] sm:$0xff] %v9694_v51  ;;  %8747 = vpow2.f32 %v1785_v61  ;;  %v1645_v15 = vmul.f32 %v9694_v51, %v9571_v40 }
 0x53e   :  { %v8569_v28 = vpack.i.bf16 %v1646_v63, %v1645_v15 }
 0x53f   :  { %v9700_v4 = vpop.permute.xlu1 %1613 }
 0x540   :  { %10996 = vst [vmem:[#allocation54_spill] sm:$0xff] %v9700_v4  ;;  %8570 = vrot.lane.b32.xlu0 %v8569_v28, %s8819_s28  ;;  %v1647_v9 = vmul.f32 %v9700_v4, %v9585_v49 }
 0x542   :  { %v8746_v41 = vpop.eup %8745 }
 0x543   :  { %v9703_v62 = vpop.permute.xlu1 %1615  ;;  %v9707_v1 = vsel %vm908_vm9, %v8746_v41, 0.0 }
 0x544   :  { %10997 = vst [vmem:[#allocation55_spill] sm:$0xff] %v9703_v62  ;;  %7455 = vmatprep.mubr.msk.f32.mxu1 %vm517_vm15, %v9707_v1  ;;  %v1648_v63 = vmul.f32 %v9581_v44, %v9703_v62 }
 0x546   :  { %v8748_v15 = vpop.eup %8747  ;;  %v8574_v40 = vpack.i.bf16 %v1648_v63, %v1647_v9  ;;  %v9739_v63 = vpop.permute.xlu0 %1625 }
 0x547   :  { %v9715_v21 = vpop.permute.xlu1 %1617  ;;  %v9719_v28 = vsel %vm909_vm5, %v8748_v15, 0.0  ;;  %11002 = vst [vmem:[#allocation60_spill] sm:$0xff] %v9739_v63 }
 0x548   :  { %10998 = vst [vmem:[#allocation56_spill] sm:$0xff] %v9715_v21  ;;  %7456 = vmatmul.mubr.msk.f32.vlgmr.msra.gmra.mrb[38].mxu1 %vm517_vm15, %v9719_v28  ;;  %8575 = vrot.lane.b32.xlu1 %v8574_v40, %s8819_s28  ;;  %v1649_v49 = vmul.f32 %v9715_v21, %v9597_v2 }
 0x54b   :  { %v9724_v26 = vpop.permute.xlu1 %1619 }
 0x54c   :  { %10999 = vst [vmem:[#allocation57_spill] sm:$0xff] %v9724_v26  ;;  %v1650_v44 = vmul.f32 %v9593_v58, %v9724_v26  ;;  %v1653_v58 = vmul.f32 %v9739_v63, %v9619_v12  ;;  %v1324_v12 = vld [vmem:[%s10808_s1 + $0x18] sm:$0xff] }
 0x54e   :  { %v8579_v19 = vpack.i.bf16 %v1650_v44, %v1649_v49  ;;  %v9748_v44 = vpop.permute.xlu0 %1629 }
 0x54f   :  { %v9730_v37 = vpop.permute.xlu1 %1621  ;;  %11004 = vst [vmem:[#allocation62_spill] sm:$0xff] %v9748_v44 }
 0x550   :  { %11000 = vst [vmem:[#allocation58_spill] sm:$0xff] %v9730_v37  ;;  %8580 = vrot.lane.b32.xlu0 %v8579_v19, %s8819_s28  ;;  %v1651_v41 = vmul.f32 %v9730_v37, %v9607_v8 }
 0x553   :  { %v9733_v61 = vpop.permute.xlu1 %1623 }
 0x554   :  { %11001 = vst [vmem:[#allocation59_spill] sm:$0xff] %v9733_v61  ;;  %v1652_v9 = vmul.f32 %v9603_v27, %v9733_v61  ;;  %v1655_v27 = vmul.f32 %v9748_v44, %v9637_v11 }
 0x556   :  { %v8584_v15 = vpack.i.bf16 %v1652_v9, %v1651_v41 }
 0x557   :  { %v9741_v2 = vpop.permute.xlu1 %1627 }
 0x558   :  { %11003 = vst [vmem:[#allocation61_spill] sm:$0xff] %v9741_v2  ;;  %8585 = vrot.lane.b32.xlu1 %v8584_v15, %s8819_s28  ;;  %v1654_v40 = vmul.f32 %v9613_v25, %v9741_v2  ;;  %v1323_v25 = vld [vmem:[%s10808_s1 + $0x10] sm:$0xff] }
 0x559   :  { %v8185_v9 = vpack.c.bf16 %v1324_v12, %v1323_v25 }
 0x55a   :  { %v8589_v49 = vpack.i.bf16 %v1654_v40, %v1653_v58 }
 0x55b   :  { %v9750_v8 = vpop.permute.xlu1 %1631  ;;  %8186 = vmatprep.subr.bf16.mxu0 %v8185_v9 }
 0x55c   :  { %11005 = vst [vmem:[#allocation63_spill] sm:$0xff] %v9750_v8  ;;  %8590 = vrot.lane.b32.xlu0 %v8589_v49, %s8819_s28  ;;  %v1656_v19 = vmul.f32 %v9633_v14, %v9750_v8  ;;  %8188 = vmatpush3.bf16.msra.mxu0 %v8185_v9 }
 0x55e   :  { %v8594_v41 = vpack.i.bf16 %v1656_v19, %v1655_v27 }
 0x560   :  { %8595 = vrot.lane.b32.xlu1 %v8594_v41, %s8819_s28 }
 0x5b2   :  { %v8571_v11 = vpop.permute.xlu0 %8570 }
 0x5b3   :  { %v8573_v15 = vunpack.i.h.bf16 %v8571_v11  ;;  %v8572_v58 = vunpack.i.l.bf16 %v8571_v11 }
 0x5b5   :  { %v8161_v40 = vpack.c.bf16 %v8573_v15, %v8572_v58 }
 0x5b7   :  { %8162 = vmatprep.subr.bf16.mxu1 %v8161_v40 }
 0x5b8   :  { %8164 = vmatpush3.bf16.msra.mxu1 %v8161_v40 }
 0x5ba   :  { %v8576_v14 = vpop.permute.xlu1 %8575 }
 0x5bb   :  { %v8578_v49 = vunpack.i.h.bf16 %v8576_v14  ;;  %v8577_v27 = vunpack.i.l.bf16 %v8576_v14 }
 0x5bd   :  { %v8165_v19 = vpack.c.bf16 %v8578_v49, %v8577_v27 }
 0x5bf   :  { %8166 = vmatprep.subr.bf16.mxu1 %v8165_v19 }
 0x5c0   :  { %8168 = vmatpush3.bf16.msra.mxu1 %v8165_v19 }
 0x5c2   :  { %v8581_v41 = vpop.permute.xlu0 %8580 }
 0x5c3   :  { %v8583_v57 = vunpack.i.h.bf16 %v8581_v41  ;;  %v8582_v50 = vunpack.i.l.bf16 %v8581_v41 }
 0x5c5   :  { %v8169_v0 = vpack.c.bf16 %v8583_v57, %v8582_v50 }
 0x5c7   :  { %8170 = vmatprep.subr.bf16.mxu1 %v8169_v0 }
 0x5c8   :  { %8172 = vmatpush3.bf16.msra.mxu1 %v8169_v0 }
 0x5ca   :  { %v8586_v25 = vpop.permute.xlu1 %8585 }
 0x5cb   :  { %v8588_v12 = vunpack.i.h.bf16 %v8586_v25  ;;  %v8587_v9 = vunpack.i.l.bf16 %v8586_v25 }
 0x5cd   :  { %v8173_v59 = vpack.c.bf16 %v8588_v12, %v8587_v9 }
 0x5ce   :  { %v8591_v11 = vpop.permute.xlu0 %8590 }
 0x5cf   :  { %v8593_v15 = vunpack.i.h.bf16 %v8591_v11  ;;  %v8592_v58 = vunpack.i.l.bf16 %v8591_v11  ;;  %8174 = vmatprep.subr.bf16.mxu1 %v8173_v59  ;;  %v6669_v11 = vld [vmem:[%s10808_s1 + $0x21] ss:$0 sm:$0xff] }
 0x5d0   :  { %8176 = vmatpush3.bf16.msra.mxu1 %v8173_v59 }
 0x5d1   :  { %v8177_v40 = vpack.c.bf16 %v8593_v15, %v8592_v58 }
 0x5d2   :  { %v8596_v14 = vpop.permute.xlu1 %8595 }
 0x5d3   :  { %v8598_v49 = vunpack.i.h.bf16 %v8596_v14  ;;  %v8597_v27 = vunpack.i.l.bf16 %v8596_v14  ;;  %8178 = vmatprep.subr.bf16.mxu1 %v8177_v40 }
 0x5d4   :  { %8180 = vmatpush3.bf16.msra.mxu1 %v8177_v40 }
 0x5d5   :  { %v8181_v19 = vpack.c.bf16 %v8598_v49, %v8597_v27 }
 0x5d7   :  { %8182 = vmatprep.subr.bf16.mxu1 %v8181_v19 }
 0x5d8   :  { %8184 = vmatpush3.bf16.msra.mxu1 %v8181_v19 }
 0x61b   :  { %v7457_v50 = vpop.f32.mrb[38].mxu1 }
 0x61c   :  { %8749 = vrcp.f32 %v7457_v50  ;;  %v1861_v57 = vpop.f32.mrb[39].mxu1 }
 0x61d   :  { %8751 = vrcp.f32 %v1861_v57 }
 0x626   :  { %v8750_v0 = vpop.eup %8749 }
 0x627   :  { %v8752_v41 = vpop.eup %8751  ;;  %v1873_v12 = vmul.f32 %v8750_v0, %v9719_v28 }
 0x628   :  { %v1872_v25 = vmul.f32 %v8752_v41, %v9707_v1 }
 0x62a   :  { %7482 = vmatprep.mubr.msk.f32.mxu1 %vm517_vm15, %v1872_v25 }
 0x62b   :  { %7483 = vmatmul.mubr.msk.f32.vlgmr.msra.gmra.mrb[40].mxu1 %vm517_vm15, %v1873_v12 }
 0x6fe   :  { %v7484_v59 = vpop.f32.mrb[40].mxu1 }
 0x6ff   :  { %v1994_v9 = vpop.f32.mrb[41].mxu1 }
 0x700   :  { %7489 = vmatprep.mubr.msk.f32.mxu0 %vm1331_vm0, %v1994_v9 }
 0x701   :  { %7490 = vmatmul.mubr.msk.f32.vlgmr.msra.gmra.mrb[26].mxu0 %vm1331_vm0, %v7484_v59 }
 0x7d4   :  { %v7491_v15 = vpop.f32.mrb[26].mxu0 }
 0x7d5   :  { %v2085_v58 = vadd.f32 %v7491_v15, %v6669_v11  ;;  %v2079_v40 = vpop.f32.mrb[27].mxu0  ;;  %v2132_v15 = vld [vmem:[%s10808_s1 + $0xf8] sm:$0xff] }
 0x7d6   :  { %v2080_v1 = vadd.f32 %v6669_v11, %v2079_v40  ;;  %v2131_v11 = vld [vmem:[%s10808_s1 + $0xf0] sm:$0xff] }
 0x7d7   :  { %v2089_v28 = vadd.f32 %v2085_v58, %v9413_v35  ;;  %v8189_v58 = vpack.c.bf16 %v2132_v15, %v2131_v11  ;;  %v2133_v15 = vld [vmem:[%s10808_s1 + $0x100] sm:$0xff] }
 0x7d8   :  { %v2088_v14 = vadd.f32 %v2080_v1, %v9407_v5  ;;  %v6672_v5 = vld [vmem:[%s10808_s1 + $0x169] ss:$0 sm:$0xff]  ;;  %7499 = vmatprep.subr.mxu0 %v2133_v15 }
 0x7d9   :  { %v2095_v49 = vsel %vm2094_vm10, %v2089_v28, 0.0  ;;  %8190 = vmatprep.subr.bf16.mxu1 %v8189_v58  ;;  %7500 = vmatpush3.msra.mxu0 %v2133_v15 }
 0x7da   :  { %2096 = vadd.xlane.f32.xlu1 %v2095_v49  ;;  %v2091_v27 = vsel %vm1331_vm0, %v2088_v14, 0.0  ;;  %8192 = vmatpush3.bf16.msra.mxu1 %v8189_v58 }
 0x7db   :  { %2092 = vadd.xlane.f32.xlu0 %v2091_v27 }
 0x867   :  { %v2097_v19 = vpop.xlane.xlu1 %2096 }
 0x868   :  { %v2100_v50 = vmul.f32 0.0625, %v2097_v19  ;;  %v2093_v57 = vpop.xlane.xlu0 %2092 }
 0x869   :  { %v2099_v0 = vmul.f32 0.0625, %v2093_v57 }
 0x86a   :  { %v2102_v41 = vsub.f32 %v2089_v28, %v2100_v50 }
 0x86b   :  { %v2101_v25 = vsub.f32 %v2088_v14, %v2099_v0 }
 0x86c   :  { %v2104_v9 = vmul.f32 %v2102_v41, %v2102_v41 }
 0x86d   :  { %v2103_v12 = vmul.f32 %v2101_v25, %v2101_v25 }
 0x86e   :  { %v2108_v35 = vsel %vm2094_vm10, %v2104_v9, 0.0 }
 0x86f   :  { %v2105_v59 = vsel %vm1331_vm0, %v2103_v12, 0.0 }
 0x870   :  { %2106 = vadd.xlane.f32.xlu0 %v2105_v59 }
 0x874   :  { %2109 = vadd.xlane.f32.xlu0 %v2108_v35 }
 0x88a   :  { %2126 = vrot.lane.b32.xlu0 %v6672_v5, %s8819_s28 }
 0x8fd   :  { %v2107_v40 = vpop.xlane.xlu0 %2106 }
 0x8fe   :  { %v2111_v1 = vmul.f32 0.0625, %v2107_v40 }
 0x900   :  { %v2113_v28 = vadd.f32 1e-05, %v2111_v1 }
 0x901   :  { %v2110_v14 = vpop.xlane.xlu0 %2109 }
 0x902   :  { %8753 = vrsqrt.f32 %v2113_v28  ;;  %v2112_v49 = vmul.f32 0.0625, %v2110_v14 }
 0x904   :  { %v2114_v27 = vadd.f32 1e-05, %v2112_v49 }
 0x905   :  { %v2127_v57 = vpop.permute.xlu0 %2126 }
 0x906   :  { %8755 = vrsqrt.f32 %v2114_v27 }
 0x90c   :  { %v8754_v19 = vpop.eup %8753 }
 0x90d   :  { %v2117_v50 = vmul.f32 %v8754_v19, %v2101_v25  ;;  %v6673_v25 = vld [vmem:[%s10808_s1 + $0x108] ss:$0 sm:$0xff] }
 0x90e   :  { %2223 = vrot.lane.b32.xlu1 %v6673_v25, %s8822_s17 }
 0x90f   :  { %v2123_v0 = vmul.f32 %v6672_v5, %v2117_v50 }
 0x910   :  { %v8756_v12 = vpop.eup %8755 }
 0x911   :  { %v2118_v59 = vmul.f32 %v8756_v12, %v2102_v41  ;;  %v2129_v9 = vadd.f32 %v2127_v57, %v2123_v0 }
 0x913   :  { %v2124_v35 = vmul.f32 %v6672_v5, %v2118_v59  ;;  %7496 = vmatprep.mubr.msk.f32.mxu1 %vm1331_vm0, %v2129_v9 }
 0x915   :  { %v2130_v11 = vadd.f32 %v2127_v57, %v2124_v35 }
 0x917   :  { %7497 = vmatmul.mubr.msk.f32.vlgmr.msra.gmra.mrb[42].mxu1 %vm1331_vm0, %v2130_v11 }
 0x980   :  { %v2224_v14 = vpop.permute.xlu1 %2223 }
 0x9ea   :  { %v7498_v41 = vpop.f32.mrb[42].mxu1 }
 0x9eb   :  { %v2217_v5 = vadd.f32 %v7498_v41, %v6673_v25  ;;  %v2211_v58 = vpop.f32.mrb[43].mxu1 }
 0x9ec   :  { %v2212_v40 = vadd.f32 %v6673_v25, %v2211_v58 }
 0x9ed   :  { %v2221_v28 = vmax.f32 %v2217_v5, 0.0 }
 0x9ee   :  { %v2220_v1 = vmax.f32 %v2212_v40, 0.0 }
 0x9f0   :  { %7501 = vmatprep.mubr.msk.f32.mxu0 %vm97_vm4, %v2220_v1 }
 0x9f1   :  { %7502 = vmatmul.mubr.msk.f32.vlgmr.msra.gmra.mrb[28].mxu0 %vm97_vm4, %v2221_v28 }
 0x9f2   :  { %7515 = vmatprep.mubr.msk.f32.mxu0 %vm1420_vm3, %v9436_v30 }
 0xac4   :  { %v7503_v49 = vpop.f32.mrb[28].mxu0 }
 0xac5   :  { %v2304_v27 = vadd.f32 %v7503_v49, %v2224_v14  ;;  %v2298_v19 = vpop.f32.mrb[29].mxu0  ;;  %v2349_v49 = vld [vmem:[%s10808_s1 + $0x30] sm:$0xff] }
 0xac6   :  { %v2299_v50 = vadd.f32 %v2298_v19, %v2224_v14  ;;  %v2348_v14 = vld [vmem:[%s10808_s1 + $0x28] sm:$0xff] }
 0xac7   :  { %v2308_v57 = vadd.f32 %v2304_v27, %v2130_v11  ;;  %v8193_v27 = vpack.c.bf16 %v2349_v49, %v2348_v14  ;;  %v6679_v49 = vld [vmem:[%s10808_s1 + $0x48] ss:$0 sm:$0xff] }
 0xac8   :  { %v2307_v0 = vadd.f32 %v2299_v50, %v2129_v9  ;;  %v6678_v9 = vld [vmem:[%s10808_s1 + $0x16a] ss:$0 sm:$0xff] }
 0xac9   :  { %v2313_v12 = vsel %vm2094_vm10, %v2308_v57, 0.0  ;;  %8194 = vmatprep.subr.bf16.mxu1 %v8193_v27 }
 0xaca   :  { %2314 = vadd.xlane.f32.xlu0 %v2313_v12  ;;  %v2310_v59 = vsel %vm1331_vm0, %v2307_v0, 0.0  ;;  %8196 = vmatpush3.bf16.msra.mxu1 %v8193_v27 }
 0xacb   :  { %2311 = vadd.xlane.f32.xlu1 %v2310_v59 }
 0xb57   :  { %v2315_v35 = vpop.xlane.xlu0 %2314 }
 0xb58   :  { %v2317_v15 = vmul.f32 0.0625, %v2315_v35  ;;  %v2312_v25 = vpop.xlane.xlu1 %2311 }
 0xb59   :  { %v2316_v41 = vmul.f32 0.0625, %v2312_v25 }
 0xb5a   :  { %v2319_v5 = vsub.f32 %v2308_v57, %v2317_v15 }
 0xb5b   :  { %v2318_v58 = vsub.f32 %v2307_v0, %v2316_v41 }
 0xb5c   :  { %v2321_v40 = vmul.f32 %v2319_v5, %v2319_v5 }
 0xb5d   :  { %v2320_v1 = vmul.f32 %v2318_v58, %v2318_v58 }
 0xb5e   :  { %v2325_v28 = vsel %vm2094_vm10, %v2321_v40, 0.0 }
 0xb5f   :  { %2326 = vadd.xlane.f32.xlu1 %v2325_v28  ;;  %v2322_v11 = vsel %vm1331_vm0, %v2320_v1, 0.0 }
 0xb60   :  { %2323 = vadd.xlane.f32.xlu0 %v2322_v11 }
 0xb76   :  { %2343 = vrot.lane.b32.xlu0 %v6678_v9, %s8819_s28 }
 0xbec   :  { %v2327_v19 = vpop.xlane.xlu1 %2326 }
 0xbed   :  { %v2329_v50 = vmul.f32 0.0625, %v2327_v19  ;;  %v2324_v57 = vpop.xlane.xlu0 %2323 }
 0xbee   :  { %v2328_v0 = vmul.f32 0.0625, %v2324_v57 }
 0xbef   :  { %v2331_v12 = vadd.f32 1e-05, %v2329_v50 }
 0xbf0   :  { %v2330_v59 = vadd.f32 1e-05, %v2328_v0 }
 0xbf1   :  { %8757 = vrsqrt.f32 %v2331_v12  ;;  %v2344_v40 = vpop.permute.xlu0 %2343 }
 0xbf2   :  { %8759 = vrsqrt.f32 %v2330_v59 }
 0xbfb   :  { %v8758_v35 = vpop.eup %8757 }
 0xbfc   :  { %v8760_v15 = vpop.eup %8759  ;;  %v2335_v25 = vmul.f32 %v8758_v35, %v2319_v5 }
 0xbfd   :  { %v2334_v41 = vmul.f32 %v8760_v15, %v2318_v58 }
 0xbfe   :  { %v2341_v1 = vmul.f32 %v6678_v9, %v2335_v25 }
 0xbff   :  { %v2340_v28 = vmul.f32 %v6678_v9, %v2334_v41 }
 0xc00   :  { %v9818_v14 = vadd.f32 %v2344_v40, %v2341_v1 }
 0xc01   :  { %v9816_v11 = vadd.f32 %v2344_v40, %v2340_v28 }
 0xc03   :  { %7508 = vmatprep.mubr.msk.f32.mxu1 %vm1331_vm0, %v9816_v11 }
 0xc04   :  { %7509 = vmatmul.mubr.msk.f32.vlgmr.msra.gmra.mrb[44].mxu1 %vm1331_vm0, %v9818_v14 }
 0xcd7   :  { %v7510_v27 = vpop.f32.mrb[44].mxu1 }
 0xcd8   :  { %v9827_v5 = vadd.f32 %v7510_v27, %v6679_v49  ;;  %v2430_v58 = vpop.f32.mrb[45].mxu1 }
 0xcd9   :  { %v2431_v19 = vadd.f32 %v6679_v49, %v2430_v58 }
 0xcdb   :  { %v8599_v9 = vpack.i.bf16 %v9827_v5, %v2431_v19  ;;  %7557 = vmatprep.mubr.msk.f32.mxu1 %vm1331_vm0, %v2431_v19 }
 0xcdd   :  { %8600 = vrot.lane.b32.xlu1 %v8599_v9, %s8819_s28 }
 0xd4f   :  { %v8601_v50 = vpop.permute.xlu1 %8600 }
 0xd50   :  { %v8603_v57 = vunpack.i.h.bf16 %v8601_v50  ;;  %v8602_v0 = vunpack.i.l.bf16 %v8601_v50 }
 0xd52   :  { %v8197_v12 = vpack.c.bf16 %v8603_v57, %v8602_v0 }
 0xd54   :  { %8199 = vmatprep.subr.msk.bf16.mxu0 %vm9465_vm2, %v8197_v12 }
 0xd55   :  { %8202 = vmatpush3.bf16.msk.msra.mxu0 %vm9465_vm2, %v8197_v12 }
 0xd56   :  { %8240 = vmatprep.subr.bf16.mxu0 %v9324_v43 }
 0xd58   :  { %7516 = vmatmul.mubr.msk.f32.vlgmr.msra.gmra.mrb[30].mxu0 %vm1420_vm3, %v9481_v23 }
 0xd59   :  { %7518 = vmatprep.mubr.msk.f32.mxu0 %vm1420_vm3, %v9488_v36  ;;  %8242 = vmatpush3.bf16.msra.mxu0 %v9324_v43 }
 0xd5a   :  { %8244 = vmatprep.subr.bf16.mxu0 %v9333_v7 }
 0xd5c   :  { %7519 = vmatmul.mubr.msk.f32.gmra.mrb[32].mxu0 %vm1420_vm3, %v9503_v52 }
 0xd5d   :  { %7521 = vmatprep.mubr.msk.f32.mxu0 %vm1420_vm3, %v9507_v24  ;;  %8246 = vmatpush3.bf16.msra.mxu0 %v9333_v7 }
 0xd5e   :  { %8248 = vmatprep.subr.bf16.mxu0 %v9342_v17 }
 0xd60   :  { %7522 = vmatmul.mubr.msk.f32.gmra.mrb[34].mxu0 %vm1420_vm3, %v9518_v22 }
 0xd61   :  { %7524 = vmatprep.mubr.msk.f32.mxu0 %vm1420_vm3, %v9522_v48  ;;  %8250 = vmatpush3.bf16.msra.mxu0 %v9342_v17 }
 0xd62   :  { %8252 = vmatprep.subr.bf16.mxu0 %v9351_v33 }
 0xd64   :  { %7525 = vmatmul.mubr.msk.f32.gmra.mrb[36].mxu0 %vm1420_vm3, %v9532_v18 }
 0xd65   :  { %7527 = vmatprep.mubr.msk.f32.mxu0 %vm1420_vm3, %v9536_v39  ;;  %8254 = vmatpush3.bf16.msra.mxu0 %v9351_v33 }
 0xd66   :  { %8256 = vmatprep.subr.bf16.mxu0 %v9360_v45 }
 0xd68   :  { %7528 = vmatmul.mubr.msk.f32.gmra.mrb[38].mxu0 %vm1420_vm3, %v9545_v20 }
 0xd69   :  { %7530 = vmatprep.mubr.msk.f32.mxu0 %vm1420_vm3, %v9561_v13  ;;  %8258 = vmatpush3.bf16.msra.mxu0 %v9360_v45 }
 0xd6a   :  { %8260 = vmatprep.subr.bf16.mxu0 %v9312_v31 }
 0xd6c   :  { %7531 = vmatmul.mubr.msk.f32.gmra.mrb[40].mxu0 %vm1420_vm3, %v9558_v3 }
 0xd6d   :  { %8262 = vmatpush3.bf16.msra.mxu0 %v9312_v31 }
 0xe2b   :  { %v7517_v59 = vpop.f32.mrb[30].mxu0 }
 0xe2c   :  { %v2574_v35 = vmul.f32 %v7517_v59, %v9316_v34  ;;  %v9872_v15 = vmul.f32 %v7517_v59, %v9692_v60  ;;  %v2514_v25 = vpop.f32.mrb[31].mxu0 }
 0xe2d   :  { %v9875_v41 = vmul.f32 %v2514_v25, %v9694_v51  ;;  %v2573_v40 = vmul.f32 %v2514_v25, %v9322_v42 }
 0xe2f   :  { %v8203_v28 = vpack.c.bf16 %v2574_v35, %v2573_v40  ;;  %v7520_v49 = vpop.f32.mrb[32].mxu0 }
 0xe30   :  { %v2576_v27 = vmul.f32 %v7520_v49, %v9326_v46  ;;  %v2588_v58 = vmul.f32 %v7520_v49, %v9703_v62  ;;  %v2524_v19 = vpop.f32.mrb[33].mxu0 }
 0xe31   :  { %v2587_v9 = vmul.f32 %v2524_v19, %v9700_v4  ;;  %v2575_v50 = vmul.f32 %v2524_v19, %v9331_v6  ;;  %8205 = vmatprep.subr.msk.bf16.mxu1 %vm9577_vm14, %v8203_v28 }
 0xe32   :  { %8208 = vmatpush3.bf16.xpose.msk.msra.mxu1 %vm9577_vm14, %v8203_v28 }
 0xe33   :  { %v8609_v57 = vpack.i.bf16 %v2588_v58, %v2587_v9  ;;  %v8209_v0 = vpack.c.bf16 %v2576_v27, %v2575_v50  ;;  %v7523_v12 = vpop.f32.mrb[34].mxu0 }
 0xe34   :  { %v2578_v59 = vmul.f32 %v7523_v12, %v9335_v10  ;;  %v2590_v35 = vmul.f32 %v7523_v12, %v9724_v26  ;;  %v2534_v25 = vpop.f32.mrb[35].mxu0 }
 0xe35   :  { %v2589_v40 = vmul.f32 %v2534_v25, %v9715_v21  ;;  %v2577_v49 = vmul.f32 %v2534_v25, %v9340_v16  ;;  %8211 = vmatprep.subr.msk.bf16.mxu1 %vm9577_vm14, %v8209_v0 }
 0xe37   :  { %v8614_v19 = vpack.i.bf16 %v2590_v35, %v2589_v40  ;;  %v8215_v1 = vpack.c.bf16 %v2578_v59, %v2577_v49  ;;  %v7526_v6 = vpop.f32.mrb[36].mxu0 }
 0xe38   :  { %v2580_v28 = vmul.f32 %v7526_v6, %v9344_v54  ;;  %v2592_v27 = vmul.f32 %v7526_v6, %v9733_v61  ;;  %v2544_v58 = vpop.f32.mrb[37].mxu0 }
 0xe39   :  { %v2591_v9 = vmul.f32 %v2544_v58, %v9730_v37  ;;  %v2579_v50 = vmul.f32 %v2544_v58, %v9349_v32 }
 0xe3a   :  { %8214 = vmatpush3.bf16.xpose.msk.msra.mxu1 %vm9577_vm14, %v8209_v0 }
 0xe3b   :  { %v8619_v12 = vpack.i.bf16 %v2592_v27, %v2591_v9  ;;  %v8221_v25 = vpack.c.bf16 %v2580_v28, %v2579_v50  ;;  %v7529_v16 = vpop.f32.mrb[38].mxu0  ;;  %8217 = vmatprep.subr.msk.bf16.mxu1 %vm9577_vm14, %v8215_v1 }
 0xe3c   :  { %v2582_v59 = vmul.f32 %v7529_v16, %v9353_v55  ;;  %v2594_v35 = vmul.f32 %v7529_v16, %v9741_v2  ;;  %v2554_v40 = vpop.f32.mrb[39].mxu0  ;;  %v11036_v55 = vld [vmem:[#allocation5_spill] sm:$0xff] }
 0xe3d   :  { %v2593_v6 = vmul.f32 %v2554_v40, %v9739_v63  ;;  %v2581_v49 = vmul.f32 %v2554_v40, %v9358_v38  ;;  %v11037_v61 = vcvt.s32.f32 %v11036_v55 }
 0xe3f   :  { %v8624_v37 = vpack.i.bf16 %v2594_v35, %v2593_v6  ;;  %v8227_v58 = vpack.c.bf16 %v2582_v59, %v2581_v49  ;;  %v7532_v32 = vpop.f32.mrb[40].mxu0 }
 0xe40   :  { %v2584_v0 = vmul.f32 %v7532_v32, %v9362_v56  ;;  %v2596_v28 = vmul.f32 %v7532_v32, %v9750_v8  ;;  %v2564_v27 = vpop.f32.mrb[41].mxu0  ;;  %v11034_v8 = vld [vmem:[#allocation4_spill] sm:$0xff] }
 0xe41   :  { %v2595_v9 = vmul.f32 %v2564_v27, %v9748_v44  ;;  %v2583_v50 = vmul.f32 %v2564_v27, %v9365_v47  ;;  %v11035_v56 = vcvt.s32.f32 %v11034_v8  ;;  %v11041_v8 = vld [vmem:[#allocation7_spill] sm:$0xff] }
 0xe42   :  { %8220 = vmatpush3.bf16.xpose.msk.msra.mxu1 %vm9577_vm14, %v8215_v1 }
 0xe43   :  { %v8629_v16 = vpack.i.bf16 %v2596_v28, %v2595_v9  ;;  %v8233_v2 = vpack.c.bf16 %v2584_v0, %v2583_v50  ;;  %8223 = vmatprep.subr.msk.bf16.mxu1 %vm9577_vm14, %v8221_v25  ;;  %v11010_v0 = vld [vmem:[#allocation47_spill] sm:$0xff] }
 0xe44   :  { %v1270_v28 = vsel %vm1265_vm12, %v11010_v0, 0.0 }
 0xe4a   :  { %8226 = vmatpush3.bf16.xpose.msk.msra.mxu1 %vm9577_vm14, %v8221_v25 }
 0xe4b   :  { %8229 = vmatprep.subr.msk.bf16.mxu1 %vm9577_vm14, %v8227_v58 }
 0xe52   :  { %8232 = vmatpush3.bf16.xpose.msk.msra.mxu1 %vm9577_vm14, %v8227_v58 }
 0xe53   :  { %8235 = vmatprep.subr.msk.bf16.mxu1 %vm9577_vm14, %v8233_v2 }
 0xe5a   :  { %8238 = vmatpush3.bf16.xpose.msk.msra.mxu1 %vm9577_vm14, %v8233_v2  ;;  %v11008_v2 = vpack.i.bf16 %v9872_v15, %v9875_v41 }
 0xe61   :  { %7558 = vmatmul.mubr.msk.f32.vlgmr.msra.gmra.mrb[46].mxu1 %vm1331_vm0, %v9827_v5  ;;  %v11009_v5 = vld [vmem:[#allocation46_spill] sm:$0xff] }
 0xe62   :  { %v1266_v58 = vsel %vm1265_vm12, %v11009_v5, 0.0 }
 0xf34   :  { %v7559_v32 = vpop.f32.mrb[46].mxu1 }
 0xf35   :  { %v2703_v1 = vpop.f32.mrb[47].mxu1  ;;  %v2713_v25 = vsel %vm909_vm5, %v7559_v32, -1e+30 }
 0xf36   :  { %v2717_v35 = vsel %vm1777_vm6, %v2713_v25, -inf  ;;  %v2712_v6 = vsel %vm908_vm9, %v2703_v1, -1e+30 }
 0xf37   :  { %2718 = vmax.xlane.f32.xlu0 %v2717_v35  ;;  %v2714_v49 = vsel %vm517_vm15, %v2712_v6, -inf }
 0xf38   :  { %2715 = vmax.xlane.f32.xlu1 %v2714_v49 }
 0xf49   :  { %8610 = vrot.lane.b32.xlu1 %v8609_v57, %s8819_s28 }
 0xf4d   :  { %8605 = vrot.lane.b32.xlu0 %v11008_v2, %s8819_s28  ;;  %8615 = vrot.lane.b32.xlu1 %v8614_v19, %s8819_s28 }
 0xf51   :  { %8625 = vrot.lane.b32.xlu0 %v8624_v37, %s8819_s28  ;;  %8620 = vrot.lane.b32.xlu1 %v8619_v12, %s8819_s28 }
 0xf55   :  { %8630 = vrot.lane.b32.xlu1 %v8629_v16, %s8819_s28 }
 0xf70   :  { %1267 = vadd.xlane.f32.xlu0 %v1266_v58 }
 0xf79   :  { %1271 = vadd.xlane.f32.xlu1 %v1270_v28 }
 0xfc4   :  { %v2719_v57 = vpop.xlane.xlu0 %2718 }
 0xfc5   :  { %v2721_v27 = vsub.f32 %v7559_v32, %v2719_v57  ;;  %v2716_v9 = vpop.xlane.xlu1 %2715 }
 0xfc6   :  { %v2720_v15 = vsub.f32 %v2703_v1, %v2716_v9 }
 0xfc7   :  { %v2724_v41 = vmul.f32 1.442695, %v2721_v27 }
 0xfc8   :  { %v2722_v50 = vmul.f32 1.442695, %v2720_v15  ;;  %v8606_v19 = vpop.permute.xlu0 %8605 }
 0xfc9   :  { %8761 = vpow2.f32 %v2724_v41  ;;  %v8608_v37 = vunpack.i.h.bf16 %v8606_v19  ;;  %v8607_v25 = vunpack.i.l.bf16 %v8606_v19  ;;  %v8611_v16 = vpop.permute.xlu1 %8610 }
 0xfca   :  { %8763 = vpow2.f32 %v2722_v50  ;;  %v8613_v49 = vunpack.i.h.bf16 %v8611_v16  ;;  %v8612_v2 = vunpack.i.l.bf16 %v8611_v16 }
 0xfcb   :  { %v8263_v12 = vpack.c.bf16 %v8608_v37, %v8607_v25 }
 0xfcc   :  { %v8267_v28 = vpack.c.bf16 %v8613_v49, %v8612_v2  ;;  %v8626_v15 = vpop.permute.xlu0 %8625 }
 0xfcd   :  { %8264 = vmatprep.subr.bf16.mxu0 %v8263_v12  ;;  %v8616_v35 = vpop.permute.xlu1 %8615  ;;  %v8628_v41 = vunpack.i.h.bf16 %v8626_v15  ;;  %v8627_v50 = vunpack.i.l.bf16 %v8626_v15 }
 0xfce   :  { %v8618_v58 = vunpack.i.h.bf16 %v8616_v35  ;;  %v8617_v0 = vunpack.i.l.bf16 %v8616_v35 }
 0xfcf   :  { %v8279_v37 = vpack.c.bf16 %v8628_v41, %v8627_v50 }
 0xfd0   :  { %v8271_v9 = vpack.c.bf16 %v8618_v58, %v8617_v0 }
 0xfd1   :  { %v8621_v57 = vpop.permute.xlu1 %8620 }
 0xfd2   :  { %v8623_v27 = vunpack.i.h.bf16 %v8621_v57  ;;  %v8622_v40 = vunpack.i.l.bf16 %v8621_v57  ;;  %v11012_v57 = vmov 0.0  }
 0xfd3   :  { %v8762_v6 = vpop.eup %8761 }
 0xfd4   :  { %v8764_v5 = vpop.eup %8763  ;;  %v9951_v1 = vsel %vm909_vm5, %v8762_v6, 0.0  ;;  %v8275_v59 = vpack.c.bf16 %v8623_v27, %v8622_v40  ;;  %v1276_v40 = vld [vmem:[%s10808_s1 + $0x198] sm:$0x3] }
 0xfd5   :  { %v9945_v32 = vsel %vm908_vm9, %v8764_v5, 0.0  ;;  %v8631_v19 = vpop.permute.xlu1 %8630 }
 0xfd6   :  { %7584 = vmatprep.mubr.msk.f32.mxu0 %vm517_vm15, %v9945_v32  ;;  %v8633_v25 = vunpack.i.h.bf16 %v8631_v19  ;;  %v8632_v16 = vunpack.i.l.bf16 %v8631_v19 }
 0xfd7   :  { %7585 = vmatmul.mubr.msk.f32.vlgmr.msra.gmra.mrb[42].mxu0 %vm517_vm15, %v9951_v1 }
 0xfd8   :  { %8266 = vmatpush3.bf16.msra.mxu0 %v8263_v12  ;;  %v8283_v35 = vpack.c.bf16 %v8633_v25, %v8632_v16 }
 0xfd9   :  { %8268 = vmatprep.subr.bf16.mxu0 %v8267_v28 }
 0xfdc   :  { %8270 = vmatpush3.bf16.msra.mxu0 %v8267_v28  ;;  %v11011_v28 = vld [vmem:[#allocation2_spill] sm:$0xff] }
 0xfdd   :  { %8272 = vmatprep.subr.bf16.mxu0 %v8271_v9  ;;  %vm930_vm13 = vcmp.lt.s32.totalorder %v11011_v28, 4  ;;  %v1294_v15 = vsub.s32 1, %v11011_v28 }
 0xfde   :  { %v9957_v27 = vsel %vm930_vm13, 1.0, %v11012_v57 }
 0xfe0   :  { %8274 = vmatpush3.bf16.msra.mxu0 %v8271_v9  ;;  %v1288_v9 = vsub.s32 0, %v11011_v28 }
 0xfe1   :  { %8276 = vmatprep.subr.bf16.mxu0 %v8275_v59 }
 0xfe4   :  { %8278 = vmatpush3.bf16.msra.mxu0 %v8275_v59  ;;  %v1291_v59 = vsub.f32 1.0, %v9957_v27 }
 0xfe5   :  { %8280 = vmatprep.subr.bf16.mxu0 %v8279_v37 }
 0xfe8   :  { %8282 = vmatpush3.bf16.msra.mxu0 %v8279_v37 }
 0xfe9   :  { %8284 = vmatprep.subr.bf16.mxu0 %v8283_v35 }
 0xfec   :  { %8286 = vmatpush3.bf16.msra.mxu0 %v8283_v35 }
 0xffd   :  { %v1268_v12 = vpop.xlane.xlu0 %1267 }
 0xffe   :  { %v1269_v6 = vmul.f32 0.015625, %v1268_v12 }
0x1000   :  { %v1274_v2 = vmul.f32 %v1269_v6, %v1269_v6 }
0x1006   :  { %v1272_v49 = vpop.xlane.xlu1 %1271 }
0x1007   :  { %v1273_v5 = vmul.f32 0.015625, %v1272_v49  ;;  %v2350_v49 = vld [vmem:[%s10808_s1 + $0x38] sm:$0xff] }
0x1009   :  { %v1275_v58 = vsub.f32 %v1273_v5, %v1274_v2  ;;  %v2351_v2 = vld [vmem:[%s10808_s1 + $0x40] sm:$0xff] }
0x100a   :  { %v8287_v5 = vpack.c.bf16 %v2351_v2, %v2350_v49 }
0x100b   :  { %v1277_v0 = vadd.f32 1e-05, %v1275_v58 }
0x100c   :  { %8288 = vmatprep.subr.bf16.mxu1 %v8287_v5 }
0x100d   :  { %8765 = vrsqrt.f32 %v1277_v0  ;;  %8290 = vmatpush3.bf16.msra.mxu1 %v8287_v5 }
0x1017   :  { %v8766_v41 = vpop.eup %8765 }
0x1018   :  { %v1279_v50 = vmul.f32 %v8766_v41, %v1276_v40 }
0x101a   :  { %v1289_v19 = vrot.slane %v1279_v50, %v1288_v9  ;;  %v1295_v37 = vrot.slane %v1279_v50, %v1294_v15  ;;  %v1280_v25 = vmul.f32 %v1279_v50, %v1269_v6 }
0x101c   :  { %v1290_v16 = vmul.f32 %v9957_v27, %v1289_v19  ;;  %v1296_v35 = vmul.f32 %v1295_v37, %v1291_v59 }
0x101e   :  { %v1297_v12 = vadd.f32 %v1296_v35, %v1290_v16  ;;  %v6713_v35 = vld [vmem:[%s10808_s1 + $0x49] ss:$0 sm:$0xff] }
0x1020   :  { %1311 = vperm.xlu1 %8563, %v1297_v12  }
0x10aa   :  { %v7586_v58 = vpop.f32.mrb[42].mxu0 }
0x10ab   :  { %8767 = vrcp.f32 %v7586_v58  ;;  %v2800_v0 = vpop.f32.mrb[43].mxu0 }
0x10ac   :  { %8769 = vrcp.f32 %v2800_v0 }
0x10b5   :  { %v8768_v6 = vpop.eup %8767 }
0x10b6   :  { %v8770_v41 = vpop.eup %8769  ;;  %v2812_v19 = vmul.f32 %v8768_v6, %v9951_v1  ;;  %v8824_v6 = vmov 1  }
0x10b7   :  { %v2811_v50 = vmul.f32 %v8770_v41, %v9945_v32  ;;  %8634 = vset.pattern.permute.xlu0 %v8824_v6 }
0x10b9   :  { %7611 = vmatprep.mubr.msk.f32.mxu0 %vm517_vm15, %v2811_v50 }
0x10ba   :  { %7612 = vmatmul.mubr.msk.f32.vlgmr.msra.gmra.mrb[44].mxu0 %vm517_vm15, %v2812_v19 }
0x118d   :  { %v7613_v37 = vpop.f32.mrb[44].mxu0 }
0x118e   :  { %v2933_v16 = vpop.f32.mrb[45].mxu0 }
0x118f   :  { %7618 = vmatprep.mubr.msk.f32.mxu1 %vm1331_vm0, %v2933_v16 }
0x1190   :  { %7619 = vmatmul.mubr.msk.f32.vlgmr.msra.gmra.mrb[48].mxu1 %vm1331_vm0, %v7613_v37 }
0x1263   :  { %v7620_v12 = vpop.f32.mrb[48].mxu1 }
0x1264   :  { %v3018_v49 = vpop.f32.mrb[49].mxu1  ;;  %v3024_v2 = vadd.f32 %v7620_v12, %v6713_v35 }
0x1265   :  { %v3019_v32 = vadd.f32 %v6713_v35, %v3018_v49 }
0x1266   :  { %v3028_v58 = vadd.f32 %v3024_v2, %v9818_v14 }
0x1267   :  { %v3027_v1 = vadd.f32 %v3019_v32, %v9816_v11 }
0x1268   :  { %v3033_v0 = vsel %vm2094_vm10, %v3028_v58, 0.0 }
0x1269   :  { %v3030_v5 = vsel %vm1331_vm0, %v3027_v1, 0.0 }
0x126a   :  { %3031 = vadd.xlane.f32.xlu0 %v3030_v5 }
0x126e   :  { %3034 = vadd.xlane.f32.xlu0 %v3033_v0 }
0x1284   :  { %1282 = vrot.lane.b32.xlu0 %v1280_v25, %s8823_s8 }
0x12f7   :  { %v3032_v41 = vpop.xlane.xlu0 %3031 }
0x12f8   :  { %v3036_v50 = vmul.f32 0.0625, %v3032_v41  ;;  %v11016_v41 = vld [vmem:[#allocation14_spill] sm:$0xff] }
0x12fa   :  { %v3038_v16 = vsub.f32 %v3027_v1, %v3036_v50  ;;  %v6716_v1 = vld [vmem:[%s10808_s1 + $0x16b] ss:$0 sm:$0xff] }
0x12fb   :  { %v3035_v19 = vpop.xlane.xlu0 %3034 }
0x12fc   :  { %v3037_v37 = vmul.f32 0.0625, %v3035_v19  ;;  %v3040_v2 = vmul.f32 %v3038_v16, %v3038_v16 }
0x12fe   :  { %v3039_v35 = vsub.f32 %v3028_v58, %v3037_v37  ;;  %v3042_v0 = vsel %vm1331_vm0, %v3040_v2, 0.0  ;;  %v11019_v2 = vld [vmem:[#allocation17_spill] sm:$0xff] }
0x12ff   :  { %v1283_v12 = vpop.permute.xlu0 %1282 }
0x1300   :  { %v1285_v11 = vsub.f32 %v1276_v40, %v1283_v12  ;;  %v3041_v49 = vmul.f32 %v3039_v35, %v3039_v35  ;;  %v3068_v40 = vld [vmem:[%s10808_s1 + $0x110] sm:$0xff]  ;;  %v11017_v12 = vld [vmem:[#allocation15_spill] sm:$0xff] }
0x1302   :  { %v1301_v32 = vrot.slane %v1285_v11, %v1288_v9  ;;  %v1306_v47 = vrot.slane %v1285_v11, %v1294_v15  ;;  %v3045_v14 = vsel %vm2094_vm10, %v3041_v49, 0.0  ;;  %v11013_v9 = vmov 0.0|0.0   ;;  %v11014_v15 = vld [vmem:[#allocation20_spill] sm:$0xff] }
0x1303   :  { %3046 = vadd.xlane.f32.xlu1 %v3045_v14  ;;  %v810_v50 = vmul.f32 %v11016_v41, %v11014_v15  ;;  %v811_v11 = vmul.f32 %v11017_v12, %v11014_v15  ;;  %v11018_v49 = vld [vmem:[#allocation12_spill] sm:$0xff]  ;;  %v11022_v41 = vld [vmem:[#allocation19_spill] sm:$0xff] }
0x1304   :  { %v1302_v5 = vmul.f32 %v9957_v27, %v1301_v32  ;;  %v1307_v25 = vmul.f32 %v1306_v47, %v1291_v59  ;;  %v3069_v27 = vld [vmem:[%s10808_s1 + $0x118] sm:$0xff]  ;;  %v808_v32 = vmul.f32 %v11018_v49, %v11014_v15 }
0x1305   :  { %v8291_v47 = vpack.c.bf16 %v3069_v27, %v3068_v40  ;;  %v11015_v59 = vld [vmem:[#allocation13_spill] sm:$0xff]  ;;  %v822_v37 = vsel %vm97_vm4, %v810_v50, 0.0  ;;  %v825_v14 = vsel %vm97_vm4, %v811_v11, 0.0  ;;  %v11021_v27 = vld [vmem:[#allocation18_spill] sm:$0xff]  ;;  %v815_v50 = vmul.f32 %v11022_v41, %v11014_v15 }
0x1306   :  { %v1308_v6 = vadd.f32 %v1307_v25, %v1302_v5  ;;  %v809_v58 = vmul.f32 %v11015_v59, %v11014_v15  ;;  %v813_v5 = vmul.f32 %v11019_v2, %v11014_v15  ;;  %v816_v25 = vsel %vm97_vm4, %v808_v32, 0.0 }
0x1307   :  { %3043 = vadd.xlane.f32.xlu1 %v3042_v0  ;;  %8292 = vmatprep.subr.bf16.mxu0 %v8291_v47  ;;  %v11020_v0 = vld [vmem:[#allocation16_spill] sm:$0xff] }
0x1308   :  { %1317 = vperm.xlu0 %8634, %v1308_v6   ;;  %8294 = vmatpush3.bf16.msra.mxu0 %v8291_v47  ;;  %v819_v19 = vsel %vm97_vm4, %v809_v58, 0.0  ;;  %v812_v6 = vmul.f32 %v11020_v0, %v11014_v15  ;;  %v831_v40 = vsel %vm97_vm4, %v813_v5, 0.0  ;;  %v814_v47 = vmul.f32 %v11021_v27, %v11014_v15  ;;  %v3324_v27 = vld [vmem:[%s10808_s1 + $0x50] sm:$0xff] }
0x1309   :  { %8295 = vmatprep.subr.bf16.mxu0 %v11013_v9 }
0x130a   :  { %v828_v59 = vsel %vm97_vm4, %v812_v6, 0.0  ;;  %v834_v58 = vsel %vm97_vm4, %v814_v47, 0.0  ;;  %v3325_v47 = vld [vmem:[%s10808_s1 + $0x58] sm:$0xff] }
0x1318   :  { %3063 = vrot.lane.b32.xlu1 %v6716_v1, %s8819_s28 }
0x1327   :  { %820 = vadd.xlane.f32.xlu0 %v819_v19  ;;  %v837_v19 = vsel %vm97_vm4, %v815_v50, 0.0  ;;  %v8296_v50 = vpack.c.bf16 %v3325_v47, %v3324_v27 }
0x132b   :  { %823 = vadd.xlane.f32.xlu0 %v822_v37  ;;  %v1312_v37 = vpop.permute.xlu1 %1311 }
0x132f   :  { %826 = vadd.xlane.f32.xlu0 %v825_v14 }
0x1333   :  { %832 = vadd.xlane.f32.xlu0 %v831_v40 }
0x1337   :  { %835 = vadd.xlane.f32.xlu0 %v834_v58 }
0x133b   :  { %838 = vadd.xlane.f32.xlu0 %v837_v19 }
0x133c   :  { %817 = vadd.xlane.f32.xlu1 %v816_v25 }
0x1340   :  { %829 = vadd.xlane.f32.xlu1 %v828_v59 }
0x1390   :  { %v3047_v12 = vpop.xlane.xlu1 %3046 }
0x1391   :  { %v3049_v11 = vmul.f32 0.0625, %v3047_v12  ;;  %v1318_v12 = vpop.permute.xlu0 %1317 }
0x1393   :  { %v3051_v49 = vadd.f32 1e-05, %v3049_v11 }
0x1394   :  { %v3044_v32 = vpop.xlane.xlu1 %3043 }
0x1395   :  { %8771 = vrsqrt.f32 %v3051_v49  ;;  %v3048_v14 = vmul.f32 0.0625, %v3044_v32  ;;  %v10053_v32 = vld [vmem:[%s10808_s1 + $0x128] ss:$0 sm:$0xff] }
0x1397   :  { %v3050_v2 = vadd.f32 1e-05, %v3048_v14  ;;  %v11024_v14 = vcvt.s32.f32 %v11011_v28 }
0x1398   :  { %v3064_v58 = vpop.permute.xlu1 %3063 }
0x1399   :  { %8773 = vrsqrt.f32 %v3050_v2 }
0x139f   :  { %v8772_v5 = vpop.eup %8771 }
0x13a0   :  { %v3055_v25 = vmul.f32 %v8772_v5, %v3039_v35 }
0x13a2   :  { %v3061_v40 = vmul.f32 %v6716_v1, %v3055_v25 }
0x13a3   :  { %v8774_v0 = vpop.eup %8773 }
0x13a4   :  { %v3054_v6 = vmul.f32 %v8774_v0, %v3038_v16  ;;  %v10031_v19 = vadd.f32 %v3064_v58, %v3061_v40  ;;  %v11023_v16 = vld [vmem:[#allocation45_spill] sm:$0xff]  ;;  %v6724_v40 = vld [vmem:[%s10808_s1 + $0x70] ss:$0 sm:$0xff] }
0x13a5   :  { %v1314_v35 = vmul.f32 %v1312_v37, %v11023_v16  ;;  %v3070_v37 = vld [vmem:[%s10808_s1 + $0x120] sm:$0xff] }
0x13a6   :  { %v3060_v59 = vmul.f32 %v6716_v1, %v3054_v6  ;;  %7628 = vmatprep.subr.mxu1 %v3070_v37  ;;  %v11026_v16 = vld [vmem:[#allocation34_spill] sm:$0xff] }
0x13a7   :  { %v10040_v1 = vadd.f32 %v1318_v12, %v1314_v35  ;;  %7629 = vmatpush3.msra.mxu1 %v3070_v37  ;;  %v11027_v35 = vld [vmem:[#allocation38_spill] sm:$0xff]  ;;  %v11028_v37 = vld [vmem:[#allocation37_spill] sm:$0xff] }
0x13a8   :  { %v10029_v41 = vadd.f32 %v3064_v58, %v3060_v59 }
0x13aa   :  { %7625 = vmatprep.mubr.msk.f32.mxu0 %vm1331_vm0, %v10029_v41 }
0x13ab   :  { %7626 = vmatmul.mubr.msk.f32.vlgmr.msra.gmra.mrb[46].mxu0 %vm1331_vm0, %v10031_v19 }
0x13ac   :  { %8297 = vmatpush3.bf16.msra.mxu0 %v8296_v50  ;;  %7637 = vmatprep.mubr.msk.f32.mxu0 %vm8818_vm7, %v11012_v57 }
0x13ad   :  { %8298 = vmatprep.subr.bf16.mxu0 %v11013_v9 }
0x13af   :  { %7638 = vmatmul.mubr.msk.f32.vlgmr.msra.gmra.mrb[48].mxu0 %vm1331_vm0, %v10040_v1 }
0x13b0   :  { %7670 = vmatprep.mubr.msk.f32.mxu0 %vm8818_vm7, %v11012_v57 }
0x13c9   :  { %v818_v11 = vpop.xlane.xlu1 %817 }
0x13ca   :  { %v840_v49 = vmul.f32 8.0, %v818_v11  ;;  %v11029_v11 = vld [vmem:[#allocation41_spill] sm:$0xff] }
0x13cc   :  { %v848_v2 = vsub.f32 %v11024_v14, %v840_v49  ;;  %v11030_v49 = vld [vmem:[#allocation40_spill] sm:$0xff] }
0x13cd   :  { %v11031_v14 = vld [vmem:[#allocation44_spill] sm:$0xff] }
0x13ce   :  { %vm856_vm1 = vcmp.eq.f32.partialorder %v848_v2, %v11014_v15  ;;  %v821_v2 = vpop.xlane.xlu0 %820 }
0x13cf   :  { %v10066_v12 = vsel %vm856_vm1, 1.0, %v11012_v57 }
0x13d0   :  { %11025 = vst [vmem:[#allocation51_spill] sm:$0xff] %v10066_v12 }
0x147e   :  { %v7627_v5 = vpop.f32.mrb[46].mxu0 }
0x147f   :  { %v3154_v25 = vadd.f32 %v7627_v5, %v10053_v32  ;;  %v3148_v0 = vpop.f32.mrb[47].mxu0  ;;  %v824_v5 = vpop.xlane.xlu0 %823 }
0x1480   :  { %v3149_v6 = vadd.f32 %v10053_v32, %v3148_v0 }
0x1481   :  { %v3158_v59 = vmax.f32 %v3154_v25, 0.0 }
0x1482   :  { %v3157_v27 = vmax.f32 %v3149_v6, 0.0  ;;  %v3403_v47 = vpop.f32.mrb[48].mxu0  ;;  %v841_v6 = vmul.f32 8.0, %v821_v2 }
0x1483   :  { %v10063_v58 = vadd.f32 %v6724_v40, %v3403_v47  ;;  %v7639_v50 = vpop.f32.mrb[49].mxu0  ;;  %v827_v25 = vpop.xlane.xlu0 %826  ;;  %v842_v40 = vmul.f32 8.0, %v824_v5  ;;  %v11032_v47 = vld [vmem:[#allocation3_spill] sm:$0xff] }
0x1484   :  { %7630 = vmatprep.mubr.msk.f32.mxu1 %vm97_vm4, %v3157_v27  ;;  %v843_v44 = vmul.f32 8.0, %v827_v25 }
0x1485   :  { %7631 = vmatmul.mubr.msk.f32.vlgmr.msra.gmra.mrb[50].mxu1 %vm97_vm4, %v3158_v59  ;;  %3408 = vrot.lane.b32.xlu1 %v10063_v58, %s8819_s28  ;;  %v11033_v59 = vcvt.s32.f32 %v11032_v47  ;;  %v850_v38 = vsub.f32 %v11035_v56, %v842_v40  ;;  %v11042_v56 = vcvt.s32.f32 %v11041_v8 }
0x1486   :  { %7642 = vmatprep.mubr.msk.f32.mxu1 %vm97_vm4, %v10066_v12  ;;  %v830_v12 = vpop.xlane.xlu1 %829  ;;  %v851_v54 = vsub.f32 %v11037_v61, %v843_v44 }
0x1487   :  { %v833_v0 = vpop.xlane.xlu0 %832  ;;  %v849_v50 = vsub.f32 %v11033_v59, %v841_v6  ;;  %v844_v63 = vmul.f32 8.0, %v830_v12  ;;  %vm858_vm5 = vcmp.eq.f32.partialorder %v850_v38, %v11014_v15  ;;  %v11039_v6 = vld [vmem:[#allocation6_spill] sm:$0xff]  ;;  %v11044_v38 = vld [vmem:[#allocation8_spill] sm:$0xff] }
0x1488   :  { %v845_v21 = vmul.f32 8.0, %v833_v0  ;;  %v11040_v47 = vcvt.s32.f32 %v11039_v6  ;;  %v10102_v40 = vsel %vm858_vm5, 1.0, %v11012_v57  ;;  %vm859_vm6 = vcmp.eq.f32.partialorder %v851_v54, %v11014_v15  ;;  %v11048_v54 = vld [vmem:[#allocation9_spill] sm:$0xff] }
0x1489   :  { %3558 = vrot.lane.b32.xlu1 %v11026_v16, %s8820_s29  ;;  %vm857_vm9 = vcmp.eq.f32.partialorder %v849_v50, %v11014_v15  ;;  %11043 = vst [vmem:[#allocation46_spill] sm:$0xff] %v10102_v40  ;;  %v11045_v61 = vcvt.s32.f32 %v11044_v38  ;;  %v11049_v0 = vcvt.s32.f32 %v11048_v54  ;;  %v11051_v50 = vld [vmem:[#allocation36_spill] sm:$0xff]  ;;  %vm885_vm5 = vcmask 523264  }
0x148a   :  { %v10095_v5 = vsel %vm857_vm9, 1.0, %v11012_v57  ;;  %v852_v25 = vsub.f32 %v11040_v47, %v844_v63  ;;  %v853_v12 = vsub.f32 %v11042_v56, %v845_v21  ;;  %v11046_v63 = vld [vmem:[#allocation33_spill] sm:$0xff]  ;;  %v10114_v21 = vsel %vm859_vm6, 1.0, %v11012_v57  ;;  %v11054_v47 = vld [vmem:[#allocation39_spill] sm:$0xff] }
0x148b   :  { %v836_v27 = vpop.xlane.xlu0 %835  ;;  %11038 = vst [vmem:[#allocation50_spill] sm:$0xff] %v10095_v5  ;;  %11047 = vst [vmem:[#allocation47_spill] sm:$0xff] %v10114_v21  ;;  %vm910_vm6 = vcmp.ge.s32.totalorder %v11011_v28, 4 }
0x148c   :  { %v846_v26 = vmul.f32 8.0, %v836_v27  ;;  %vm860_vm12 = vcmp.eq.f32.partialorder %v852_v25, %v11014_v15  ;;  %vm861_vm13 = vcmp.eq.f32.partialorder %v853_v12, %v11014_v15 }
0x148d   :  { %3560 = vrot.lane.b32.xlu1 %v11027_v35, %s8820_s29  ;;  %v10125_v27 = vsel %vm860_vm12, 1.0, %v11012_v57 }
0x148e   :  { %v854_v44 = vsub.f32 %v11045_v61, %v846_v26  ;;  %11050 = vst [vmem:[#allocation2_spill] sm:$0xff] %v10125_v27 }
0x148f   :  { %v839_v2 = vpop.xlane.xlu0 %838 }
0x1490   :  { %v847_v55 = vmul.f32 8.0, %v839_v2  ;;  %vm862_vm1 = vcmp.eq.f32.partialorder %v854_v44, %v11014_v15  ;;  %v10131_v2 = vsel %vm861_vm13, 1.0, %v11012_v57 }
0x1491   :  { %3562 = vrot.lane.b32.xlu1 %v11028_v37, %s8820_s29  ;;  %11052 = vst [vmem:[#allocation20_spill] sm:$0xff] %v10131_v2  ;;  %v10135_v6 = vsel %vm862_vm1, 1.0, %v11012_v57 }
0x1492   :  { %v855_v26 = vsub.f32 %v11049_v0, %v847_v55  ;;  %11053 = vst [vmem:[#allocation13_spill] sm:$0xff] %v10135_v6  ;;  %v11059_v0 = vld [vmem:[#allocation35_spill] sm:$0xff] }
0x1494   :  { %vm863_vm9 = vcmp.eq.f32.partialorder %v855_v26, %v11014_v15 }
0x1495   :  { %3564 = vrot.lane.b32.xlu1 %v11029_v11, %s8820_s29  ;;  %v10144_v25 = vsel %vm863_vm9, 1.0, %v11012_v57 }
0x1496   :  { %11055 = vst [vmem:[#allocation14_spill] sm:$0xff] %v10144_v25 }
0x1499   :  { %3566 = vrot.lane.b32.xlu1 %v11030_v49, %s8820_s29 }
0x149d   :  { %3568 = vrot.lane.b32.xlu1 %v11031_v14, %s8820_s29 }
0x14f7   :  { %v3409_v59 = vpop.permute.xlu1 %3408 }
0x14f8   :  { %7640 = vmatprep.subr.mxu1 %v3409_v59 }
0x14f9   :  { %7641 = vmatpush3.msra.mxu1 %v3409_v59  ;;  %v11056_v59 = vld [vmem:[#allocation42_spill] sm:$0xff] }
0x14fa   :  { %7643 = vmatmul.mubr.msk.f32.vlgmr.msra.gmra.mrb[52].mxu1 %vm97_vm4, %v10095_v5  ;;  %8314 = vmatprep.subr.bf16.mxu1 %v11013_v9 }
0x14fb   :  { %8316 = vmatpush3.bf16.msra.mxu1 %v11046_v63  ;;  %7645 = vmatprep.mubr.msk.f32.mxu1 %vm97_vm4, %v10102_v40  ;;  %v10157_v56 = vpop.permute.xlu1 %3558 }
0x14fc   :  { %8317 = vmatprep.subr.bf16.mxu1 %v11013_v9 }
0x14fe   :  { %7646 = vmatmul.mubr.msk.f32.gmra.mrb[54].mxu1 %vm97_vm4, %v10114_v21 }
0x14ff   :  { %7648 = vmatprep.mubr.msk.f32.mxu1 %vm97_vm4, %v10125_v27  ;;  %8319 = vmatpush3.bf16.msra.mxu1 %v11051_v50  ;;  %v10159_v12 = vpop.permute.xlu1 %3560 }
0x1500   :  { %8320 = vmatprep.subr.bf16.mxu1 %v11013_v9  ;;  %11057 = vst [vmem:[#allocation15_spill] sm:$0xff] %v10159_v12 }
0x1502   :  { %7649 = vmatmul.mubr.msk.f32.gmra.mrb[56].mxu1 %vm97_vm4, %v10131_v2 }
0x1503   :  { %8322 = vmatpush3.bf16.msra.mxu1 %v11054_v47  ;;  %7651 = vmatprep.mubr.msk.f32.mxu1 %vm97_vm4, %v10135_v6  ;;  %v10161_v55 = vpop.permute.xlu1 %3562 }
0x1504   :  { %8323 = vmatprep.subr.bf16.mxu1 %v11013_v9  ;;  %11058 = vst [vmem:[#allocation12_spill] sm:$0xff] %v10161_v55 }
0x1506   :  { %7652 = vmatmul.mubr.msk.f32.gmra.mrb[58].mxu1 %vm97_vm4, %v10144_v25 }
0x1507   :  { %8325 = vmatpush3.bf16.msra.mxu1 %v11056_v59  ;;  %7689 = vmatprep.mubr.msk.f32.mxu1 %vm8818_vm7, %v11012_v57  ;;  %v10169_v54 = vpop.permute.xlu1 %3564 }
0x1508   :  { %8326 = vmatprep.subr.bf16.mxu1 %v11013_v9 }
0x1558   :  { %v10153_v15 = vpop.f32.mrb[50].mxu1 }
0x1559   :  { %v10155_v8 = vpop.f32.mrb[51].mxu1 }
0x15cd   :  { %v10163_v38 = vpop.f32.mrb[52].mxu1 }
0x15ce   :  { %v3541_v61 = vmul.f32 %v10163_v38, %v11026_v16  ;;  %v10167_v44 = vpop.f32.mrb[53].mxu1  ;;  %v10180_v16 = vpop.permute.xlu1 %3566 }
0x15cf   :  { %v3540_v26 = vmul.f32 %v10167_v44, %v11059_v0 }
0x15d1   :  { %v8299_v59 = vpack.c.bf16 %v3541_v61, %v3540_v26  ;;  %v7647_v25 = vpop.f32.mrb[54].mxu1 }
0x15d2   :  { %v3543_v47 = vmul.f32 %v7647_v25, %v11028_v37  ;;  %v3583_v6 = vmul.f32 %v7647_v25, %v10161_v55  ;;  %v3511_v2 = vpop.f32.mrb[55].mxu1 }
0x15d3   :  { %v3582_v50 = vmul.f32 %v10159_v12, %v3511_v2  ;;  %v3542_v27 = vmul.f32 %v3511_v2, %v11027_v35  ;;  %8301 = vmatpush3.bf16.xpose.msk.msra.mxu0 %vm9577_vm14, %v8299_v59  ;;  %v11060_v59 = vld [vmem:[#allocation43_spill] sm:$0xff] }
0x15d4   :  { %8302 = vmatprep.subr.bf16.mxu0 %v11013_v9 }
0x15d5   :  { %v8640_v21 = vpack.i.bf16 %v3583_v6, %v3582_v50  ;;  %v8303_v63 = vpack.c.bf16 %v3543_v47, %v3542_v27  ;;  %v7650_v61 = vpop.f32.mrb[56].mxu1 }
0x15d6   :  { %v3545_v26 = vmul.f32 %v7650_v61, %v11030_v49  ;;  %v3585_v37 = vmul.f32 %v7650_v61, %v10180_v16  ;;  %v3521_v25 = vpop.f32.mrb[57].mxu1 }
0x15d7   :  { %v3584_v55 = vmul.f32 %v10169_v54, %v3521_v25  ;;  %v3544_v12 = vmul.f32 %v3521_v25, %v11029_v11 }
0x15d9   :  { %v8645_v2 = vpack.i.bf16 %v3585_v37, %v3584_v55  ;;  %v8307_v35 = vpack.c.bf16 %v3545_v26, %v3544_v12  ;;  %v7653_v40 = vpop.f32.mrb[58].mxu1 }
0x15da   :  { %v3547_v5 = vmul.f32 %v7653_v40, %v11060_v59  ;;  %v3531_v10 = vpop.f32.mrb[59].mxu1 }
0x15db   :  { %v3546_v4 = vmul.f32 %v3531_v10, %v11031_v14  ;;  %8305 = vmatpush3.bf16.xpose.msk.msra.mxu0 %vm9577_vm14, %v8303_v63 }
0x15dc   :  { %8306 = vmatprep.subr.bf16.mxu0 %v11013_v9 }
0x15dd   :  { %v8311_v27 = vpack.c.bf16 %v3547_v5, %v3546_v4  ;;  %v6619_v4 = vsel %vm9110_vm11, 1.0, %v11012_v57 }
0x15e3   :  { %8309 = vmatpush3.bf16.xpose.msk.msra.mxu0 %vm9577_vm14, %v8307_v35  ;;  %v886_v35 = vsel %vm885_vm5, %v6619_v4, 0.0 }
0x15e4   :  { %8310 = vmatprep.subr.bf16.mxu0 %v11013_v9  ;;  %v887_v5 = vrot.slane %v886_v35, 4 }
0x15e6   :  { %v888_v63 = vadd.f32 %v887_v5, %v886_v35 }
0x15e8   :  { %v889_v50 = vrot.slane %v888_v63, 2 }
0x15ea   :  { %v890_v6 = vadd.f32 %v889_v50, %v888_v63 }
0x15eb   :  { %8313 = vmatpush3.bf16.xpose.msk.msra.mxu0 %vm9577_vm14, %v8311_v27 }
0x15ec   :  { %8338 = vmatprep.subr.bf16.mxu0 %v11013_v9  ;;  %v891_v47 = vrot.slane %v890_v6, 1 }
0x15ee   :  { %v892_v12 = vadd.f32 %v891_v47, %v890_v6  ;;  %v3581_v47 = vmul.f32 %v10163_v38, %v10157_v56 }
0x15f0   :  { %v915_v61 = vsub.f32 1.0, %v892_v12 }
0x15f2   :  { %7671 = vmatmul.mubr.msk.f32.vlgmr.msra.gmra.mrb[50].mxu0 %vm1331_vm0, %v10063_v58  ;;  %v10207_v58 = vsel %vm910_vm6, 1.0, %v11012_v57 }
0x15f3   :  { %7715 = vmatprep.mubr.msk.f32.mxu0 %vm8818_vm7, %v11012_v57  ;;  %v10912_v55 = vsub.f32 1.0, %v10207_v58  ;;  %v913_v26 = vmul.f32 %v10207_v58, %v892_v12 }
0x15f5   :  { %v916_v25 = vmul.f32 %v915_v61, %v10912_v55 }
0x15f7   :  { %v10213_v27 = vadd.f32 %v916_v25, %v913_v26  ;;  %v10230_v26 = vpop.permute.xlu1 %3568 }
0x15f9   :  { %vm918_vm11 = vcmp.gt.f32.partialorder %v10213_v27, 0.5 }
0x16c5   :  { %v3680_v37 = vpop.f32.mrb[50].mxu0 }
0x16c6   :  { %v7672_v4 = vpop.f32.mrb[51].mxu0  ;;  %v3684_v28 = vsel %vm918_vm11, %v3680_v37, -1e+30 }
0x16c7   :  { %v3685_v35 = vsel %vm885_vm5, %v3684_v28, -inf  ;;  %v3586_v4 = vmul.f32 %v10230_v26, %v3531_v10 }
0x16c8   :  { %3686 = vmax.xlane.f32.xlu0 %v3685_v35 }
0x16de   :  { %3556 = vrot.lane.b32.xlu0 %v11059_v0, %s8820_s29 }
0x16e2   :  { %3570 = vrot.lane.b32.xlu0 %v11060_v59, %s8820_s29 }
0x16e6   :  { %8641 = vrot.lane.b32.xlu0 %v8640_v21, %s8819_s28 }
0x1755   :  { %v3687_v5 = vpop.xlane.xlu0 %3686 }
0x1756   :  { %v3688_v63 = vsub.f32 %v3680_v37, %v3687_v5 }
0x1758   :  { %v3689_v50 = vmul.f32 1.442695, %v3688_v63 }
0x1759   :  { %v10224_v6 = vpop.permute.xlu0 %3556 }
0x175a   :  { %8775 = vpow2.f32 %v3689_v50  ;;  %v3580_v12 = vmul.f32 %v10224_v6, %v10167_v44 }
0x175c   :  { %v8635_v61 = vpack.i.bf16 %v3581_v47, %v3580_v12 }
0x175d   :  { %v10232_v25 = vpop.permute.xlu0 %3570 }
0x175e   :  { %v3587_v21 = vmul.f32 %v7653_v40, %v10232_v25  ;;  %8636 = vrot.lane.b32.xlu1 %v8635_v61, %s8819_s28 }
0x1760   :  { %v8650_v37 = vpack.i.bf16 %v3587_v21, %v3586_v4 }
0x1761   :  { %v8642_v10 = vpop.permute.xlu0 %8641 }
0x1762   :  { %8646 = vrot.lane.b32.xlu1 %v8645_v2, %s8819_s28  ;;  %8651 = vrot.lane.b32.xlu0 %v8650_v37, %s8819_s28  ;;  %v8644_v5 = vunpack.i.h.bf16 %v8642_v10  ;;  %v8643_v2 = vunpack.i.l.bf16 %v8642_v10 }
0x1764   :  { %v8776_v38 = vpop.eup %8775  ;;  %v8330_v47 = vpack.c.bf16 %v8644_v5, %v8643_v2 }
0x1765   :  { %v3691_v44 = vsel %vm918_vm11, %v8776_v38, 0.0 }
0x1766   :  { %7690 = vmatmul.mubr.msk.f32.vlgmr.msra.gmra.mrb[60].mxu1 %vm885_vm5, %v3691_v44  ;;  %3160 = vrot.lane.b32.xlu1 %v10053_v32, %s8822_s17 }
0x1767   :  { %7708 = vmatprep.mubr.msk.f32.mxu1 %vm8818_vm7, %v11012_v57 }
0x17d0   :  { %v8637_v40 = vpop.permute.xlu1 %8636 }
0x17d1   :  { %v8639_v28 = vunpack.i.h.bf16 %v8637_v40  ;;  %v8638_v35 = vunpack.i.l.bf16 %v8637_v40 }
0x17d3   :  { %v8327_v63 = vpack.c.bf16 %v8639_v28, %v8638_v35 }
0x17d4   :  { %v8647_v50 = vpop.permute.xlu1 %8646  ;;  %v8652_v4 = vpop.permute.xlu0 %8651 }
0x17d5   :  { %8328 = vmatpush3.bf16.msra.mxu1 %v8327_v63  ;;  %v8649_v12 = vunpack.i.h.bf16 %v8647_v50  ;;  %v8648_v61 = vunpack.i.l.bf16 %v8647_v50  ;;  %v8654_v38 = vunpack.i.h.bf16 %v8652_v4  ;;  %v8653_v10 = vunpack.i.l.bf16 %v8652_v4 }
0x17d6   :  { %8329 = vmatprep.subr.bf16.mxu1 %v11013_v9 }
0x17d7   :  { %v8333_v40 = vpack.c.bf16 %v8649_v12, %v8648_v61 }
0x17d8   :  { %v3161_v21 = vpop.permute.xlu1 %3160 }
0x17d9   :  { %v3236_v32 = vadd.f32 %v10155_v8, %v3161_v21  ;;  %v3241_v37 = vadd.f32 %v10153_v15, %v3161_v21  ;;  %8331 = vmatpush3.bf16.msra.mxu1 %v8330_v47  ;;  %v8336_v8 = vpack.c.bf16 %v8654_v38, %v8653_v10  ;;  %v3326_v10 = vld [vmem:[%s10808_s1 + $0x60] sm:$0xff] }
0x17da   :  { %8332 = vmatprep.subr.bf16.mxu1 %v11013_v9 }
0x17db   :  { %v3245_v28 = vadd.f32 %v3241_v37, %v10031_v19  ;;  %v3244_v35 = vadd.f32 %v3236_v32, %v10029_v41 }
0x17dd   :  { %8334 = vmatpush3.bf16.msra.mxu1 %v8333_v40  ;;  %v3250_v5 = vsel %vm2094_vm10, %v3245_v28, 0.0  ;;  %v3247_v2 = vsel %vm1331_vm0, %v3244_v35, 0.0 }
0x17de   :  { %3251 = vadd.xlane.f32.xlu1 %v3250_v5  ;;  %3248 = vadd.xlane.f32.xlu0 %v3247_v2 }
0x17df   :  { %8335 = vmatprep.subr.bf16.mxu1 %v11013_v9 }
0x17e1   :  { %8337 = vmatpush3.bf16.msra.mxu1 %v8336_v8 }
0x17e2   :  { %8341 = vmatprep.subr.bf16.mxu1 %v11013_v9 }
0x1839   :  { %v3761_v15 = vpop.f32.mrb[60].mxu1 }
0x183a   :  { %8777 = vrcp.f32 %v3761_v15  ;;  %v7691_v63 = vpop.f32.mrb[61].mxu1 }
0x1844   :  { %v8778_v50 = vpop.eup %8777 }
0x1845   :  { %v3766_v19 = vmul.f32 %v8778_v50, %v3691_v44  ;;  %v6722_v44 = vld [vmem:[%s10808_s1 + $0x16c] ss:$0 sm:$0xff] }
0x1847   :  { %7709 = vmatmul.mubr.msk.f32.vlgmr.msra.gmra.mrb[62].mxu1 %vm885_vm5, %v3766_v19 }
0x1848   :  { %7722 = vmatprep.mubr.msk.f32.mxu1 %vm8818_vm7, %v11012_v57 }
0x186b   :  { %v3252_v41 = vpop.xlane.xlu1 %3251  ;;  %v3249_v47 = vpop.xlane.xlu0 %3248 }
0x186c   :  { %v3254_v12 = vmul.f32 0.0625, %v3252_v41  ;;  %v3253_v61 = vmul.f32 0.0625, %v3249_v47 }
0x186e   :  { %v3256_v4 = vsub.f32 %v3245_v28, %v3254_v12  ;;  %v3255_v21 = vsub.f32 %v3244_v35, %v3253_v61  ;;  %v3327_v28 = vld [vmem:[%s10808_s1 + $0x68] sm:$0xff] }
0x186f   :  { %v8339_v35 = vpack.c.bf16 %v3327_v28, %v3326_v10 }
0x1870   :  { %v3257_v32 = vmul.f32 %v3255_v21, %v3255_v21  ;;  %v3258_v38 = vmul.f32 %v3256_v4, %v3256_v4 }
0x1871   :  { %8340 = vmatpush3.bf16.msra.mxu0 %v8339_v35 }
0x1872   :  { %v3259_v37 = vsel %vm1331_vm0, %v3257_v32, 0.0  ;;  %v3262_v40 = vsel %vm2094_vm10, %v3258_v38, 0.0 }
0x1873   :  { %3260 = vadd.xlane.f32.xlu0 %v3259_v37 }
0x1877   :  { %3263 = vadd.xlane.f32.xlu0 %v3262_v40 }
0x188d   :  { %3280 = vrot.lane.b32.xlu0 %v6722_v44, %s8819_s28 }
0x1900   :  { %v3261_v5 = vpop.xlane.xlu0 %3260 }
0x1901   :  { %v3265_v2 = vmul.f32 0.0625, %v3261_v5 }
0x1903   :  { %v3267_v8 = vadd.f32 1e-05, %v3265_v2 }
0x1904   :  { %v3264_v15 = vpop.xlane.xlu0 %3263 }
0x1905   :  { %8779 = vrsqrt.f32 %v3267_v8  ;;  %v3266_v63 = vmul.f32 0.0625, %v3264_v15 }
0x1907   :  { %v3268_v50 = vadd.f32 1e-05, %v3266_v63 }
0x1908   :  { %v3281_v47 = vpop.permute.xlu0 %3280 }
0x1909   :  { %8781 = vrsqrt.f32 %v3268_v50 }
0x190f   :  { %v8780_v19 = vpop.eup %8779 }
0x1910   :  { %v3271_v41 = vmul.f32 %v8780_v19, %v3255_v21  ;;  %v6723_v21 = vld [vmem:[%s10808_s1 + $0x16d] ss:$0 sm:$0xff] }
0x1911   :  { %3319 = vrot.lane.b32.xlu0 %v6723_v21, %s8819_s28 }
0x1912   :  { %v3277_v12 = vmul.f32 %v6722_v44, %v3271_v41 }
0x1913   :  { %v8782_v61 = vpop.eup %8781 }
0x1914   :  { %v3272_v32 = vmul.f32 %v8782_v61, %v3256_v4  ;;  %v3283_v37 = vadd.f32 %v3281_v47, %v3277_v12  ;;  %v3974_v12 = vld [vmem:[%s10808_s1 + $0x78] sm:$0xff]  ;;  %v3975_v61 = vld [vmem:[%s10808_s1 + $0x80] sm:$0xff] }
0x1916   :  { %v3278_v38 = vmul.f32 %v6722_v44, %v3272_v32  ;;  %v3286_v40 = vsel %vm1331_vm0, %v3283_v37, 0.0  ;;  %v8655_v32 = vpack.i.bf16 %v3975_v61, %v3974_v12 }
0x1917   :  { %3287 = vadd.xlane.f32.xlu1 %v3286_v40 }
0x1918   :  { %v3284_v10 = vadd.f32 %v3281_v47, %v3278_v38 }
0x191a   :  { %v3868_v28 = vpop.f32.mrb[62].mxu1  ;;  %v3289_v35 = vsel %vm2094_vm10, %v3284_v10, 0.0 }
0x191b   :  { %3290 = vadd.xlane.f32.xlu1 %v3289_v35  ;;  %v7710_v5 = vpop.f32.mrb[63].mxu1  ;;  %7716 = vmatmul.mubr.msk.f32.vlgmr.msra.gmra.mrb[52].mxu0 %vm1331_vm0, %v3868_v28 }
0x191c   :  { %v10295_v5 = vld [vmem:[%s10808_s1 + $0x98] ss:$0 sm:$0xff] }
0x19a4   :  { %v3288_v4 = vpop.xlane.xlu1 %3287 }
0x19a5   :  { %v3292_v2 = vmul.f32 0.0625, %v3288_v4 }
0x19a7   :  { %v3294_v15 = vsub.f32 %v3283_v37, %v3292_v2  ;;  %v6745_v37 = vld [vmem:[%s10808_s1 + $0x71] ss:$0 sm:$0xff] }
0x19a8   :  { %v3291_v44 = vpop.xlane.xlu1 %3290 }
0x19a9   :  { %v3293_v8 = vmul.f32 0.0625, %v3291_v44  ;;  %v3296_v41 = vmul.f32 %v3294_v15, %v3294_v15 }
0x19ab   :  { %v3295_v63 = vsub.f32 %v3284_v10, %v3293_v8  ;;  %v3298_v47 = vsel %vm1331_vm0, %v3296_v41, 0.0 }
0x19ad   :  { %v3297_v50 = vmul.f32 %v3295_v63, %v3295_v63 }
0x19af   :  { %v3301_v19 = vsel %vm2094_vm10, %v3297_v50, 0.0 }
0x19b0   :  { %3302 = vadd.xlane.f32.xlu1 %v3301_v19 }
0x19b4   :  { %3299 = vadd.xlane.f32.xlu1 %v3298_v47 }
0x19c5   :  { %8656 = vrot.lane.b32.xlu1 %v8655_v32, %s8819_s28 }
0x19ee   :  { %v3945_v38 = vpop.f32.mrb[52].mxu0 }
0x19ef   :  { %v3946_v40 = vadd.f32 %v6745_v37, %v3945_v38  ;;  %v7717_v10 = vpop.f32.mrb[53].mxu0 }
0x19f1   :  { %v3949_v28 = vadd.f32 %v3946_v40, %v10040_v1 }
0x19f3   :  { %v3951_v35 = vsel %vm1331_vm0, %v3949_v28, 0.0 }
0x19f4   :  { %3952 = vadd.xlane.f32.xlu0 %v3951_v35 }
0x1a0a   :  { %4066 = vrot.lane.b32.xlu0 %v10295_v5, %s8819_s28 }
0x1a3d   :  { %v3303_v4 = vpop.xlane.xlu1 %3302 }
0x1a3e   :  { %v3305_v2 = vmul.f32 0.0625, %v3303_v4 }
0x1a40   :  { %v3307_v44 = vadd.f32 1e-05, %v3305_v2  ;;  %v3320_v2 = vpop.permute.xlu0 %3319 }
0x1a41   :  { %v3300_v8 = vpop.xlane.xlu1 %3299 }
0x1a42   :  { %8783 = vrsqrt.f32 %v3307_v44  ;;  %v3304_v50 = vmul.f32 0.0625, %v3300_v8 }
0x1a44   :  { %v3306_v19 = vadd.f32 1e-05, %v3304_v50 }
0x1a45   :  { %v8657_v41 = vpop.permute.xlu1 %8656 }
0x1a46   :  { %8785 = vrsqrt.f32 %v3306_v19  ;;  %v8659_v1 = vunpack.i.h.bf16 %v8657_v41  ;;  %v8658_v47 = vunpack.i.l.bf16 %v8657_v41  ;;  %v6747_v19 = vld [vmem:[%s10808_s1 + $0x16e] ss:$0 sm:$0xff]  ;;  %v8342_v41 = vpack.c.bf16 %v3975_v61, %v3974_v12 }
0x1a48   :  { %v8344_v32 = vpack.c.bf16 %v8659_v1, %v8658_v47  ;;  %8343 = vmatpush3.bf16.msra.mxu1 %v8342_v41 }
0x1a4a   :  { %8345 = vmatprep.subr.bf16.mxu0 %v8344_v32 }
0x1a4b   :  { %8347 = vmatpush3.bf16.msra.mxu0 %v8344_v32 }
0x1a4c   :  { %v8784_v37 = vpop.eup %8783  ;;  %8354 = vmatprep.subr.bf16.mxu0 %v11013_v9 }
0x1a4d   :  { %v3311_v38 = vmul.f32 %v8784_v37, %v3295_v63 }
0x1a4f   :  { %v3317_v35 = vmul.f32 %v6723_v21, %v3311_v38 }
0x1a50   :  { %v8786_v40 = vpop.eup %8785 }
0x1a51   :  { %v3310_v10 = vmul.f32 %v8786_v40, %v3294_v15  ;;  %v10302_v44 = vadd.f32 %v3320_v2, %v3317_v35 }
0x1a53   :  { %v3316_v4 = vmul.f32 %v6723_v21, %v3310_v10 }
0x1a55   :  { %v10300_v55 = vadd.f32 %v3320_v2, %v3316_v4 }
0x1a57   :  { %7729 = vmatprep.mubr.msk.f32.mxu0 %vm1331_vm0, %v10300_v55 }
0x1a58   :  { %7730 = vmatmul.mubr.msk.f32.vlgmr.msra.gmra.mrb[54].mxu0 %vm1331_vm0, %v10302_v44 }
0x1a59   :  { %7778 = vmatprep.mubr.msk.f32.mxu0 %vm8818_vm7, %v11012_v57 }
0x1a81   :  { %v3953_v8 = vpop.xlane.xlu0 %3952 }
0x1a82   :  { %v3954_v63 = vmul.f32 0.0625, %v3953_v8 }
0x1a84   :  { %v3955_v50 = vsub.f32 %v3949_v28, %v3954_v63 }
0x1a85   :  { %v4067_v10 = vpop.permute.xlu0 %4066 }
0x1a86   :  { %v3956_v15 = vmul.f32 %v3955_v50, %v3955_v50 }
0x1a88   :  { %v3957_v21 = vsel %vm1331_vm0, %v3956_v15, 0.0 }
0x1a89   :  { %3958 = vadd.xlane.f32.xlu1 %v3957_v21 }
0x1a9a   :  { %3970 = vrot.lane.b32.xlu1 %v6747_v19, %s8819_s28 }
0x1b16   :  { %v3959_v1 = vpop.xlane.xlu1 %3958 }
0x1b17   :  { %v3960_v47 = vmul.f32 0.0625, %v3959_v1 }
0x1b19   :  { %v3961_v32 = vadd.f32 1e-05, %v3960_v47 }
0x1b1a   :  { %v3971_v40 = vpop.permute.xlu1 %3970 }
0x1b1b   :  { %8787 = vrsqrt.f32 %v3961_v32 }
0x1b25   :  { %v8788_v37 = vpop.eup %8787 }
0x1b26   :  { %v3963_v38 = vmul.f32 %v8788_v37, %v3955_v50 }
0x1b28   :  { %v3968_v28 = vmul.f32 %v6747_v19, %v3963_v38 }
0x1b2a   :  { %v10315_v35 = vadd.f32 %v3971_v40, %v3968_v28 }
0x1b2b   :  { %v7731_v4 = vpop.f32.mrb[54].mxu0 }
0x1b2c   :  { %v4147_v2 = vadd.f32 %v7731_v4, %v4067_v10  ;;  %7723 = vmatmul.mubr.msk.f32.vlgmr.msra.gmra.mrb[64].mxu1 %vm1331_vm0, %v10315_v35  ;;  %v4141_v8 = vpop.f32.mrb[55].mxu0  ;;  %v11062_v4 = vld [vmem:[#allocation54_spill] sm:$0xff] }
0x1b2d   :  { %v4142_v63 = vadd.f32 %v4141_v8, %v4067_v10  ;;  %7736 = vmatprep.mubr.msk.f32.mxu1 %vm1420_vm3, %v9436_v30  ;;  %v11063_v8 = vld [vmem:[#allocation24_spill] sm:$0xff] }
0x1b2f   :  { %v8348_v12 = vpack.c.bf16 %v4147_v2, %v4142_v63 }
0x1b31   :  { %8350 = vmatprep.subr.msk.bf16.mxu1 %vm9465_vm2, %v8348_v12 }
0x1b32   :  { %8353 = vmatpush3.bf16.msk.msra.mxu1 %vm9465_vm2, %v8348_v12 }
0x1b33   :  { %8378 = vmatprep.subr.bf16.mxu1 %v11013_v9 }
0x1b35   :  { %7737 = vmatmul.mubr.msk.f32.vlgmr.msra.gmra.mrb[66].mxu1 %vm1420_vm3, %v9481_v23 }
0x1b36   :  { %7739 = vmatprep.mubr.msk.f32.mxu1 %vm1420_vm3, %v9488_v36  ;;  %8380 = vmatpush3.bf16.msra.mxu1 %v9324_v43 }
0x1b37   :  { %8381 = vmatprep.subr.bf16.mxu1 %v11013_v9 }
0x1b39   :  { %7740 = vmatmul.mubr.msk.f32.gmra.mrb[68].mxu1 %vm1420_vm3, %v9503_v52 }
0x1b3a   :  { %7742 = vmatprep.mubr.msk.f32.mxu1 %vm1420_vm3, %v9507_v24  ;;  %8383 = vmatpush3.bf16.msra.mxu1 %v9333_v7 }
0x1b3b   :  { %8384 = vmatprep.subr.bf16.mxu1 %v11013_v9 }
0x1b3d   :  { %7743 = vmatmul.mubr.msk.f32.gmra.mrb[70].mxu1 %vm1420_vm3, %v9518_v22 }
0x1b3e   :  { %7745 = vmatprep.mubr.msk.f32.mxu1 %vm1420_vm3, %v9522_v48  ;;  %8386 = vmatpush3.bf16.msra.mxu1 %v9342_v17 }
0x1b3f   :  { %8387 = vmatprep.subr.bf16.mxu1 %v11013_v9 }
0x1b41   :  { %7746 = vmatmul.mubr.msk.f32.gmra.mrb[72].mxu1 %vm1420_vm3, %v9532_v18 }
0x1b42   :  { %7748 = vmatprep.mubr.msk.f32.mxu1 %vm1420_vm3, %v9536_v39  ;;  %8389 = vmatpush3.bf16.msra.mxu1 %v9351_v33 }
0x1b43   :  { %8390 = vmatprep.subr.bf16.mxu1 %v11013_v9 }
0x1b45   :  { %7749 = vmatmul.mubr.msk.f32.gmra.mrb[74].mxu1 %vm1420_vm3, %v9545_v20 }
0x1b46   :  { %7751 = vmatprep.mubr.msk.f32.mxu1 %vm1420_vm3, %v9561_v13  ;;  %8392 = vmatpush3.bf16.msra.mxu1 %v9360_v45 }
0x1b47   :  { %8393 = vmatprep.subr.bf16.mxu1 %v11013_v9 }
0x1b49   :  { %7752 = vmatmul.mubr.msk.f32.gmra.mrb[76].mxu1 %vm1420_vm3, %v9558_v3 }
0x1b4a   :  { %8395 = vmatpush3.bf16.msra.mxu1 %v9312_v31  ;;  %7805 = vmatprep.mubr.msk.f32.mxu1 %vm8818_vm7, %v11012_v57 }
0x1b4b   :  { %8396 = vmatprep.subr.bf16.mxu1 %v11013_v9 }
0x1bff   :  { %v10362_v61 = vpop.f32.mrb[64].mxu1 }
0x1c00   :  { %v7724_v50 = vpop.f32.mrb[65].mxu1 }
0x1c08   :  { %v7738_v15 = vpop.f32.mrb[66].mxu1 }
0x1c09   :  { %v4279_v21 = vmul.f32 %v7738_v15, %v9316_v34  ;;  %v4291_v19 = vmul.f32 %v7738_v15, %v9692_v60  ;;  %v4219_v41 = vpop.f32.mrb[67].mxu1 }
0x1c0a   :  { %v4290_v1 = vmul.f32 %v4219_v41, %v9694_v51  ;;  %v4278_v47 = vmul.f32 %v4219_v41, %v9322_v42  ;;  %v11065_v41 = vld [vmem:[#allocation57_spill] sm:$0xff]  ;;  %v11069_v51 = vld [vmem:[#allocation59_spill] sm:$0xff] }
0x1c0c   :  { %v8660_v32 = vpack.i.bf16 %v4291_v19, %v4290_v1  ;;  %v8355_v37 = vpack.c.bf16 %v4279_v21, %v4278_v47  ;;  %v7741_v38 = vpop.f32.mrb[68].mxu1  ;;  %v11064_v21 = vld [vmem:[#allocation25_spill] sm:$0xff] }
0x1c0d   :  { %v4281_v40 = vmul.f32 %v7741_v38, %v9326_v46  ;;  %v4293_v28 = vmul.f32 %v7741_v38, %v9703_v62  ;;  %v4229_v10 = vpop.f32.mrb[69].mxu1  ;;  %v11066_v38 = vld [vmem:[#allocation56_spill] sm:$0xff] }
0x1c0e   :  { %v4292_v2 = vmul.f32 %v4229_v10, %v11062_v4  ;;  %v4280_v63 = vmul.f32 %v4229_v10, %v11063_v8  ;;  %8661 = vrot.lane.b32.xlu1 %v8660_v32, %s8819_s28  ;;  %8357 = vmatpush3.bf16.xpose.msk.msra.mxu0 %vm9577_vm14, %v8355_v37  ;;  %v11067_v4 = vld [vmem:[#allocation26_spill] sm:$0xff]  ;;  %v11068_v37 = vld [vmem:[#allocation27_spill] sm:$0xff] }
0x1c0f   :  { %8358 = vmatprep.subr.bf16.mxu0 %v11013_v9 }
0x1c10   :  { %v8665_v12 = vpack.i.bf16 %v4293_v28, %v4292_v2  ;;  %v8359_v50 = vpack.c.bf16 %v4281_v40, %v4280_v63  ;;  %v7744_v15 = vpop.f32.mrb[70].mxu1  ;;  %v11070_v2 = vld [vmem:[#allocation58_spill] sm:$0xff] }
0x1c11   :  { %v4283_v19 = vmul.f32 %v7744_v15, %v11064_v21  ;;  %v4295_v1 = vmul.f32 %v7744_v15, %v11065_v41  ;;  %v4239_v47 = vpop.f32.mrb[71].mxu1  ;;  %v11071_v21 = vld [vmem:[#allocation28_spill] sm:$0xff]  ;;  %v11072_v15 = vld [vmem:[#allocation29_spill] sm:$0xff]  ;;  %v11077_v41 = vld [vmem:[#allocation63_spill] sm:$0xff] }
0x1c12   :  { %v4294_v62 = vmul.f32 %v4239_v47, %v11066_v38  ;;  %v4282_v46 = vmul.f32 %v4239_v47, %v11067_v4  ;;  %8666 = vrot.lane.b32.xlu1 %v8665_v12, %s8819_s28 }
0x1c14   :  { %v8670_v32 = vpack.i.bf16 %v4295_v1, %v4294_v62  ;;  %v8363_v10 = vpack.c.bf16 %v4283_v19, %v4282_v46  ;;  %v7747_v8 = vpop.f32.mrb[72].mxu1  ;;  %v11073_v1 = vld [vmem:[#allocation61_spill] sm:$0xff] }
0x1c15   :  { %v4285_v42 = vmul.f32 %v7747_v8, %v11068_v37  ;;  %v4297_v28 = vmul.f32 %v7747_v8, %v11069_v51  ;;  %v4249_v40 = vpop.f32.mrb[73].mxu1  ;;  %v11074_v51 = vld [vmem:[#allocation60_spill] sm:$0xff] }
0x1c16   :  { %v4296_v63 = vmul.f32 %v4249_v40, %v11070_v2  ;;  %v4284_v60 = vmul.f32 %v4249_v40, %v11071_v21  ;;  %8361 = vmatpush3.bf16.xpose.msk.msra.mxu0 %vm9577_vm14, %v8359_v50  ;;  %8671 = vrot.lane.b32.xlu1 %v8670_v32, %s8819_s28  ;;  %v11075_v2 = vld [vmem:[#allocation30_spill] sm:$0xff]  ;;  %v11076_v32 = vld [vmem:[#allocation31_spill] sm:$0xff] }
0x1c17   :  { %8362 = vmatprep.subr.bf16.mxu0 %v11013_v9 }
0x1c18   :  { %v8675_v12 = vpack.i.bf16 %v4297_v28, %v4296_v63  ;;  %v8367_v62 = vpack.c.bf16 %v4285_v42, %v4284_v60  ;;  %v7750_v46 = vpop.f32.mrb[74].mxu1  ;;  %v11078_v60 = vld [vmem:[#allocation62_spill] sm:$0xff] }
0x1c19   :  { %v4287_v19 = vmul.f32 %v7750_v46, %v11072_v15  ;;  %v4299_v47 = vmul.f32 %v7750_v46, %v11073_v1  ;;  %v4259_v8 = vpop.f32.mrb[75].mxu1  ;;  %v11079_v15 = vld [vmem:[#allocation32_spill] sm:$0xff] }
0x1c1a   :  { %v4298_v37 = vmul.f32 %v4259_v8, %v11074_v51  ;;  %v4286_v4 = vmul.f32 %v4259_v8, %v11075_v2  ;;  %8676 = vrot.lane.b32.xlu1 %v8675_v12, %s8819_s28 }
0x1c1c   :  { %v8680_v40 = vpack.i.bf16 %v4299_v47, %v4298_v37  ;;  %v8371_v50 = vpack.c.bf16 %v4287_v19, %v4286_v4  ;;  %v7753_v21 = vpop.f32.mrb[76].mxu1  ;;  %v11080_v4 = vld [vmem:[#allocation48_spill] sm:$0xff] }
0x1c1d   :  { %v4289_v38 = vmul.f32 %v7753_v21, %v11076_v32  ;;  %v4301_v28 = vmul.f32 %v7753_v21, %v11077_v41  ;;  %v4269_v42 = vpop.f32.mrb[77].mxu1  ;;  %v919_v21 = vmul.f32 %v10207_v58, %v11080_v4 }
0x1c1e   :  { %v4300_v63 = vmul.f32 %v4269_v42, %v11078_v60  ;;  %v4288_v34 = vmul.f32 %v4269_v42, %v11079_v15  ;;  %8365 = vmatpush3.bf16.xpose.msk.msra.mxu0 %vm9577_vm14, %v8363_v10  ;;  %8681 = vrot.lane.b32.xlu1 %v8680_v40, %s8819_s28  ;;  %v11082_v10 = vsub.f32 1.0, %v10207_v58 }
0x1c1f   :  { %8366 = vmatprep.subr.bf16.mxu0 %v11013_v9 }
0x1c20   :  { %v8685_v12 = vpack.i.bf16 %v4301_v28, %v4300_v63  ;;  %v8375_v37 = vpack.c.bf16 %v4289_v38, %v4288_v34  ;;  %v4054_v34 = vadd.f32 %v10295_v5, %v10362_v61  ;;  %v11081_v38 = vld [vmem:[#allocation49_spill] sm:$0xff] }
0x1c22   :  { %8686 = vrot.lane.b32.xlu1 %v8685_v12, %s8819_s28 }
0x1c26   :  { %8369 = vmatpush3.bf16.xpose.msk.msra.mxu0 %vm9577_vm14, %v8367_v62  ;;  %v920_v62 = vmul.f32 %v11082_v10, %v11081_v38 }
0x1c27   :  { %8370 = vmatprep.subr.bf16.mxu0 %v11013_v9 }
0x1c28   :  { %v10422_v46 = vadd.f32 %v920_v62, %v919_v21 }
0x1c2a   :  { %11083 = vst [vmem:[#allocation17_spill] sm:$0xff] %v10422_v46  ;;  %vm922_vm10 = vcmp.gt.f32.partialorder %v10422_v46, 0.5 }
0x1c2e   :  { %8373 = vmatpush3.bf16.xpose.msk.msra.mxu0 %vm9577_vm14, %v8371_v50 }
0x1c2f   :  { %8374 = vmatprep.subr.bf16.mxu0 %v11013_v9 }
0x1c36   :  { %8377 = vmatpush3.bf16.xpose.msk.msra.mxu0 %vm9577_vm14, %v8375_v37 }
0x1c37   :  { %8414 = vmatprep.subr.bf16.mxu0 %v11013_v9 }
0x1c3d   :  { %7779 = vmatmul.mubr.msk.f32.vlgmr.msra.gmra.mrb[56].mxu0 %vm1331_vm0, %v4054_v34 }
0x1c3e   :  { %7839 = vmatprep.mubr.msk.f32.mxu0 %vm8818_vm7, %v11012_v57 }
0x1c80   :  { %v8662_v8 = vpop.permute.xlu1 %8661 }
0x1c81   :  { %v8664_v63 = vunpack.i.h.bf16 %v8662_v8  ;;  %v8663_v12 = vunpack.i.l.bf16 %v8662_v8 }
0x1c83   :  { %v8397_v34 = vpack.c.bf16 %v8664_v63, %v8663_v12 }
0x1c84   :  { %v8667_v42 = vpop.permute.xlu1 %8666 }
0x1c85   :  { %v8669_v4 = vunpack.i.h.bf16 %v8667_v42  ;;  %v8668_v21 = vunpack.i.l.bf16 %v8667_v42 }
0x1c87   :  { %v8400_v62 = vpack.c.bf16 %v8669_v4, %v8668_v21  ;;  %v3976_v4 = vld [vmem:[%s10808_s1 + $0x88] sm:$0xff]  ;;  %v3977_v21 = vld [vmem:[%s10808_s1 + $0x90] sm:$0xff] }
0x1c88   :  { %v8672_v58 = vpop.permute.xlu1 %8671 }
0x1c8c   :  { %v8677_v10 = vpop.permute.xlu1 %8676 }
0x1c8d   :  { %v8679_v8 = vunpack.i.h.bf16 %v8677_v10 }
0x1d10   :  { %v4407_v19 = vpop.f32.mrb[56].mxu0 }
0x1d11   :  { %v7780_v47 = vpop.f32.mrb[57].mxu0  ;;  %v4411_v5 = vsel %vm922_vm10, %v4407_v19, -1e+30 }
0x1d12   :  { %v4412_v61 = vsel %vm517_vm15, %v4411_v5, -inf  ;;  %v8673_v47 = vunpack.i.l.bf16 %v8672_v58  ;;  %v8682_v5 = vpop.permute.xlu1 %8681 }
0x1d13   :  { %4413 = vmax.xlane.f32.xlu0 %v4412_v61  ;;  %v8683_v42 = vunpack.i.l.bf16 %v8682_v5 }
0x1d16   :  { %v8687_v63 = vpop.permute.xlu1 %8686 }
0x1da0   :  { %v4414_v40 = vpop.xlane.xlu0 %4413 }
0x1da1   :  { %v4415_v50 = vsub.f32 %v4407_v19, %v4414_v40  ;;  %v8674_v19 = vunpack.i.h.bf16 %v8672_v58  ;;  %v8678_v40 = vunpack.i.l.bf16 %v8677_v10  ;;  %v8688_v58 = vunpack.i.l.bf16 %v8687_v63 }
0x1da2   :  { %v8415_v10 = vpack.c.bf16 %v3977_v21, %v3976_v4 }
0x1da3   :  { %v4416_v28 = vmul.f32 1.442695, %v4415_v50  ;;  %v8403_v61 = vpack.c.bf16 %v8674_v19, %v8673_v47  ;;  %v8406_v50 = vpack.c.bf16 %v8679_v8, %v8678_v40  ;;  %v6780_v40 = vld [vmem:[%s10808_s1 + $0x99] ss:$0 sm:$0xff] }
0x1da4   :  { %8416 = vmatpush3.bf16.msra.mxu0 %v8415_v10  ;;  %v4718_v10 = vld [vmem:[%s10808_s1 + $0x138] sm:$0xff] }
0x1da5   :  { %8789 = vpow2.f32 %v4416_v28  ;;  %v8684_v28 = vunpack.i.h.bf16 %v8682_v5  ;;  %7849 = vmatprep.subr.mxu0 %v11012_v57 }
0x1da7   :  { %v8409_v12 = vpack.c.bf16 %v8684_v28, %v8683_v42 }
0x1daf   :  { %v8790_v37 = vpop.eup %8789 }
0x1db0   :  { %v4418_v38 = vsel %vm922_vm10, %v8790_v37, 0.0  ;;  %v8689_v37 = vunpack.i.h.bf16 %v8687_v63 }
0x1db1   :  { %7806 = vmatmul.mubr.msk.f32.vlgmr.msra.gmra.mrb[78].mxu1 %vm517_vm15, %v4418_v38 }
0x1db2   :  { %8398 = vmatpush3.bf16.msra.mxu1 %v8397_v34  ;;  %7832 = vmatprep.mubr.msk.f32.mxu1 %vm8818_vm7, %v11012_v57  ;;  %v8412_v34 = vpack.c.bf16 %v8689_v37, %v8688_v58 }
0x1db3   :  { %8399 = vmatprep.subr.bf16.mxu1 %v11013_v9 }
0x1db6   :  { %8401 = vmatpush3.bf16.msra.mxu1 %v8400_v62 }
0x1db7   :  { %8402 = vmatprep.subr.bf16.mxu1 %v11013_v9 }
0x1dba   :  { %8404 = vmatpush3.bf16.msra.mxu1 %v8403_v61 }
0x1dbb   :  { %8405 = vmatprep.subr.bf16.mxu1 %v11013_v9 }
0x1dbe   :  { %8407 = vmatpush3.bf16.msra.mxu1 %v8406_v50 }
0x1dbf   :  { %8408 = vmatprep.subr.bf16.mxu1 %v11013_v9 }
0x1dc2   :  { %8410 = vmatpush3.bf16.msra.mxu1 %v8409_v12  ;;  %v6782_v12 = vld [vmem:[%s10808_s1 + $0x16f] ss:$0 sm:$0xff] }
0x1dc3   :  { %8411 = vmatprep.subr.bf16.mxu1 %v11013_v9 }
0x1dc6   :  { %8413 = vmatpush3.bf16.msra.mxu1 %v8412_v34 }
0x1dc7   :  { %8417 = vmatprep.subr.bf16.mxu1 %v11013_v9 }
0x1e84   :  { %v4488_v62 = vpop.f32.mrb[78].mxu1 }
0x1e85   :  { %8791 = vrcp.f32 %v4488_v62  ;;  %v7807_v19 = vpop.f32.mrb[79].mxu1 }
0x1e86   :  { %v6783_v19 = vld [vmem:[%s10808_s1 + $0x148] ss:$0 sm:$0xff] }
0x1e8f   :  { %v8792_v47 = vpop.eup %8791 }
0x1e90   :  { %v4493_v5 = vmul.f32 %v8792_v47, %v4418_v38 }
0x1e92   :  { %7833 = vmatmul.mubr.msk.f32.vlgmr.msra.gmra.mrb[80].mxu1 %vm517_vm15, %v4493_v5 }
0x1e93   :  { %7846 = vmatprep.mubr.msk.f32.mxu1 %vm8818_vm7, %v11012_v57 }
0x1f65   :  { %v4611_v61 = vpop.f32.mrb[80].mxu1 }
0x1f66   :  { %v7834_v8 = vpop.f32.mrb[81].mxu1  ;;  %7840 = vmatmul.mubr.msk.f32.vlgmr.msra.gmra.mrb[58].mxu0 %vm1331_vm0, %v4611_v61 }
0x1f67   :  { %7851 = vmatprep.mubr.msk.f32.mxu0 %vm8818_vm7, %v11012_v57 }
0x2039   :  { %v4688_v50 = vpop.f32.mrb[58].mxu0 }
0x203a   :  { %v4689_v28 = vadd.f32 %v6780_v40, %v4688_v50  ;;  %v7841_v42 = vpop.f32.mrb[59].mxu0 }
0x203c   :  { %v4692_v38 = vadd.f32 %v4689_v28, %v10315_v35  ;;  %v4717_v35 = vld [vmem:[%s10808_s1 + $0x130] sm:$0xff] }
0x203d   :  { %v8418_v62 = vpack.c.bf16 %v4718_v10, %v4717_v35 }
0x203e   :  { %v4694_v63 = vsel %vm1331_vm0, %v4692_v38, 0.0 }
0x203f   :  { %4695 = vadd.xlane.f32.xlu0 %v4694_v63  ;;  %8419 = vmatpush3.bf16.msra.mxu1 %v8418_v62 }
0x2040   :  { %8420 = vmatprep.subr.bf16.mxu1 %v11013_v9 }
0x2055   :  { %4713 = vrot.lane.b32.xlu0 %v6782_v12, %s8819_s28 }
0x2059   :  { %4800 = vrot.lane.b32.xlu0 %v6783_v19, %s8822_s17 }
0x20cc   :  { %v4696_v37 = vpop.xlane.xlu0 %4695 }
0x20cd   :  { %v4697_v58 = vmul.f32 0.0625, %v4696_v37 }
0x20cf   :  { %v4698_v34 = vsub.f32 %v4692_v38, %v4697_v58  ;;  %v4719_v38 = vld [vmem:[%s10808_s1 + $0x140] sm:$0xff] }
0x20d0   :  { %v4714_v50 = vpop.permute.xlu0 %4713  ;;  %7850 = vmatpush3.msra.mxu0 %v4719_v38 }
0x20d1   :  { %v4699_v4 = vmul.f32 %v4698_v34, %v4698_v34 }
0x20d3   :  { %v4700_v21 = vsel %vm1331_vm0, %v4699_v4, 0.0 }
0x20d4   :  { %4701 = vadd.xlane.f32.xlu1 %v4700_v21 }
0x2161   :  { %v4702_v47 = vpop.xlane.xlu1 %4701 }
0x2162   :  { %v4703_v5 = vmul.f32 0.0625, %v4702_v47 }
0x2164   :  { %v4704_v61 = vadd.f32 1e-05, %v4703_v5 }
0x2166   :  { %8793 = vrsqrt.f32 %v4704_v61 }
0x2170   :  { %v8794_v8 = vpop.eup %8793 }
0x2171   :  { %v4706_v40 = vmul.f32 %v8794_v8, %v4698_v34  ;;  %v11084_v34 = vld [vmem:[#allocation51_spill] sm:$0xff] }
0x2173   :  { %v4711_v28 = vmul.f32 %v6782_v12, %v4706_v40  ;;  %v4801_v12 = vpop.permute.xlu0 %4800 }
0x2175   :  { %v4716_v42 = vadd.f32 %v4714_v50, %v4711_v28  ;;  %v6786_v50 = vld [vmem:[%s10808_s1 + $0x170] ss:$0 sm:$0xff]  ;;  %v4901_v28 = vld [vmem:[%s10808_s1 + $0xa0] sm:$0xff] }
0x2177   :  { %7847 = vmatmul.mubr.msk.f32.vlgmr.msra.gmra.mrb[82].mxu1 %vm1331_vm0, %v4716_v42 }
0x2178   :  { %7858 = vmatprep.mubr.msk.f32.mxu1 %vm8818_vm7, %v11012_v57 }
0x224a   :  { %v4794_v63 = vpop.f32.mrb[82].mxu1 }
0x224b   :  { %v4795_v37 = vadd.f32 %v6783_v19, %v4794_v63  ;;  %v7848_v58 = vpop.f32.mrb[83].mxu1 }
0x224d   :  { %v4798_v4 = vmax.f32 %v4795_v37, 0.0 }
0x224f   :  { %7852 = vmatmul.mubr.msk.f32.vlgmr.msra.gmra.mrb[60].mxu0 %vm97_vm4, %v4798_v4 }
0x2250   :  { %7863 = vmatprep.mubr.msk.f32.mxu0 %vm97_vm4, %v11084_v34 }
0x2322   :  { %v4872_v21 = vpop.f32.mrb[60].mxu0 }
0x2323   :  { %v4873_v35 = vadd.f32 %v4872_v21, %v4801_v12  ;;  %v7853_v10 = vpop.f32.mrb[61].mxu0 }
0x2324   :  { %v6787_v10 = vld [vmem:[%s10808_s1 + $0xc0] ss:$0 sm:$0xff] }
0x2325   :  { %v4876_v62 = vadd.f32 %v4873_v35, %v4716_v42  ;;  %v4902_v42 = vld [vmem:[%s10808_s1 + $0xa8] sm:$0xff] }
0x2326   :  { %v8421_v38 = vpack.c.bf16 %v4902_v42, %v4901_v28  ;;  %v11089_v28 = vld [vmem:[#allocation2_spill] sm:$0xff]  ;;  %v11090_v42 = vld [vmem:[#allocation36_spill] sm:$0xff] }
0x2327   :  { %v4878_v47 = vsel %vm1331_vm0, %v4876_v62, 0.0 }
0x2328   :  { %4879 = vadd.xlane.f32.xlu0 %v4878_v47  ;;  %8422 = vmatpush3.bf16.msra.mxu1 %v8421_v38  ;;  %v11091_v38 = vld [vmem:[#allocation20_spill] sm:$0xff] }
0x2329   :  { %8423 = vmatprep.subr.bf16.mxu1 %v11013_v9 }
0x23b5   :  { %v4880_v5 = vpop.xlane.xlu0 %4879 }
0x23b6   :  { %v4881_v61 = vmul.f32 0.0625, %v4880_v5 }
0x23b8   :  { %v4882_v8 = vsub.f32 %v4876_v62, %v4881_v61 }
0x23ba   :  { %v4883_v40 = vmul.f32 %v4882_v8, %v4882_v8 }
0x23bc   :  { %v4884_v19 = vsel %vm1331_vm0, %v4883_v40, 0.0  ;;  %v11086_v40 = vld [vmem:[#allocation46_spill] sm:$0xff] }
0x23bd   :  { %4885 = vadd.xlane.f32.xlu1 %v4884_v19  ;;  %v11087_v19 = vld [vmem:[#allocation33_spill] sm:$0xff] }
0x23ce   :  { %4897 = vrot.lane.b32.xlu1 %v6786_v50, %s8819_s28 }
0x244a   :  { %v4886_v63 = vpop.xlane.xlu1 %4885 }
0x244b   :  { %v4887_v37 = vmul.f32 0.0625, %v4886_v63  ;;  %v11092_v63 = vld [vmem:[#allocation13_spill] sm:$0xff] }
0x244d   :  { %v4888_v58 = vadd.f32 1e-05, %v4887_v37  ;;  %v11093_v37 = vld [vmem:[#allocation39_spill] sm:$0xff] }
0x244e   :  { %v4898_v12 = vpop.permute.xlu1 %4897 }
0x244f   :  { %8795 = vrsqrt.f32 %v4888_v58  ;;  %v11094_v58 = vld [vmem:[#allocation14_spill] sm:$0xff] }
0x2459   :  { %v8796_v4 = vpop.eup %8795 }
0x245a   :  { %v4890_v34 = vmul.f32 %v8796_v4, %v4882_v8  ;;  %v11085_v8 = vld [vmem:[#allocation50_spill] sm:$0xff] }
0x245b   :  { %v11095_v4 = vld [vmem:[#allocation42_spill] sm:$0xff] }
0x245c   :  { %v4895_v21 = vmul.f32 %v6786_v50, %v4890_v34  ;;  %v11088_v50 = vld [vmem:[#allocation47_spill] sm:$0xff] }
0x245e   :  { %v10495_v35 = vadd.f32 %v4898_v12, %v4895_v21  ;;  %v11096_v12 = vld [vmem:[#allocation34_spill] sm:$0xff] }
0x2460   :  { %7859 = vmatmul.mubr.msk.f32.vlgmr.msra.gmra.mrb[84].mxu1 %vm1331_vm0, %v10495_v35 }
0x2461   :  { %7891 = vmatprep.mubr.msk.f32.mxu1 %vm8818_vm7, %v11012_v57 }
0x2533   :  { %v4980_v62 = vpop.f32.mrb[84].mxu1 }
0x2534   :  { %v10504_v47 = vadd.f32 %v6787_v10, %v4980_v62  ;;  %v7860_v5 = vpop.f32.mrb[85].mxu1 }
0x2536   :  { %4985 = vrot.lane.b32.xlu1 %v10504_v47, %s8819_s28 }
0x25a8   :  { %v4986_v61 = vpop.permute.xlu1 %4985 }
0x25a9   :  { %7861 = vmatprep.subr.mxu0 %v4986_v61 }
0x25aa   :  { %7862 = vmatpush3.msra.mxu0 %v4986_v61 }
0x25ab   :  { %7864 = vmatmul.mubr.msk.f32.vlgmr.msra.gmra.mrb[62].mxu0 %vm97_vm4, %v11085_v8  ;;  %8439 = vmatprep.subr.bf16.mxu0 %v11013_v9 }
0x25ac   :  { %7866 = vmatprep.mubr.msk.f32.mxu0 %vm97_vm4, %v11086_v40  ;;  %8441 = vmatpush3.bf16.msra.mxu0 %v11087_v19 }
0x25ad   :  { %8442 = vmatprep.subr.bf16.mxu0 %v11013_v9 }
0x25af   :  { %7867 = vmatmul.mubr.msk.f32.gmra.mrb[64].mxu0 %vm97_vm4, %v11088_v50  ;;  %v11097_v50 = vld [vmem:[#allocation37_spill] sm:$0xff] }
0x25b0   :  { %7869 = vmatprep.mubr.msk.f32.mxu0 %vm97_vm4, %v11089_v28  ;;  %8444 = vmatpush3.bf16.msra.mxu0 %v11090_v42  ;;  %v11098_v42 = vld [vmem:[#allocation12_spill] sm:$0xff] }
0x25b1   :  { %8445 = vmatprep.subr.bf16.mxu0 %v11013_v9 }
0x25b3   :  { %7870 = vmatmul.mubr.msk.f32.gmra.mrb[66].mxu0 %vm97_vm4, %v11091_v38 }
0x25b4   :  { %7872 = vmatprep.mubr.msk.f32.mxu0 %vm97_vm4, %v11092_v63  ;;  %8447 = vmatpush3.bf16.msra.mxu0 %v11093_v37  ;;  %v11099_v37 = vld [vmem:[#allocation15_spill] sm:$0xff] }
0x25b5   :  { %8448 = vmatprep.subr.bf16.mxu0 %v11013_v9 }
0x25b7   :  { %7873 = vmatmul.mubr.msk.f32.gmra.mrb[68].mxu0 %vm97_vm4, %v11094_v58 }
0x25b8   :  { %8450 = vmatpush3.bf16.msra.mxu0 %v11095_v4  ;;  %7910 = vmatprep.mubr.msk.f32.mxu0 %vm8818_vm7, %v11012_v57  ;;  %v11100_v4 = vld [vmem:[#allocation38_spill] sm:$0xff] }
0x25b9   :  { %8451 = vmatprep.subr.bf16.mxu0 %v11013_v9 }
0x267e   :  { %v7865_v34 = vpop.f32.mrb[62].mxu0 }
0x267f   :  { %v5094_v21 = vmul.f32 %v7865_v34, %v11096_v12  ;;  %v5102_v10 = vmul.f32 %v7865_v34, %v10157_v56  ;;  %v5054_v62 = vpop.f32.mrb[63].mxu0 }
0x2680   :  { %v5101_v5 = vmul.f32 %v5054_v62, %v10224_v6  ;;  %v5093_v61 = vmul.f32 %v5054_v62, %v11059_v0 }
0x2682   :  { %v8690_v8 = vpack.i.bf16 %v5102_v10, %v5101_v5  ;;  %v8424_v40 = vpack.c.bf16 %v5094_v21, %v5093_v61  ;;  %v7868_v19 = vpop.f32.mrb[64].mxu0 }
0x2683   :  { %v5096_v28 = vmul.f32 %v7868_v19, %v11097_v50  ;;  %v5104_v38 = vmul.f32 %v7868_v19, %v11098_v42  ;;  %v5064_v63 = vpop.f32.mrb[65].mxu0 }
0x2684   :  { %v5103_v58 = vmul.f32 %v5064_v63, %v11099_v37  ;;  %v5095_v46 = vmul.f32 %v5064_v63, %v11100_v4  ;;  %8691 = vrot.lane.b32.xlu1 %v8690_v8, %s8819_s28  ;;  %8426 = vmatpush3.bf16.xpose.msk.msra.mxu1 %vm9577_vm14, %v8424_v40 }
0x2685   :  { %8427 = vmatprep.subr.bf16.mxu1 %v11013_v9 }
0x2686   :  { %v8695_v56 = vpack.i.bf16 %v5104_v38, %v5103_v58  ;;  %v8428_v0 = vpack.c.bf16 %v5096_v28, %v5095_v46  ;;  %v7871_v6 = vpop.f32.mrb[66].mxu0 }
0x2687   :  { %v5098_v34 = vmul.f32 %v7871_v6, %v11030_v49  ;;  %v5106_v12 = vmul.f32 %v7871_v6, %v10180_v16  ;;  %v5074_v21 = vpop.f32.mrb[67].mxu0 }
0x2688   :  { %v5105_v10 = vmul.f32 %v5074_v21, %v10169_v54  ;;  %v5097_v62 = vmul.f32 %v5074_v21, %v11029_v11 }
0x268a   :  { %v8700_v5 = vpack.i.bf16 %v5106_v12, %v5105_v10  ;;  %v8432_v61 = vpack.c.bf16 %v5098_v34, %v5097_v62  ;;  %v7874_v8 = vpop.f32.mrb[68].mxu0 }
0x268b   :  { %v5100_v19 = vmul.f32 %v7874_v8, %v11060_v59  ;;  %v5108_v40 = vmul.f32 %v7874_v8, %v10232_v25  ;;  %v5084_v50 = vpop.f32.mrb[69].mxu0 }
0x268c   :  { %v5107_v46 = vmul.f32 %v5084_v50, %v10230_v26  ;;  %v5099_v28 = vmul.f32 %v5084_v50, %v11031_v14  ;;  %8430 = vmatpush3.bf16.xpose.msk.msra.mxu1 %vm9577_vm14, %v8428_v0  ;;  %8701 = vrot.lane.b32.xlu1 %v8700_v5, %s8819_s28  ;;  %v4903_v50 = vld [vmem:[%s10808_s1 + $0xb0] sm:$0xff] }
0x268d   :  { %8431 = vmatprep.subr.bf16.mxu1 %v11013_v9 }
0x268e   :  { %v8705_v16 = vpack.i.bf16 %v5108_v40, %v5107_v46  ;;  %v8436_v11 = vpack.c.bf16 %v5100_v19, %v5099_v28  ;;  %v5495_v19 = vld [vmem:[%s10808_s1 + $0xc8] sm:$0xff]  ;;  %v5496_v40 = vld [vmem:[%s10808_s1 + $0xd0] sm:$0xff]  ;;  %v4904_v28 = vld [vmem:[%s10808_s1 + $0xb8] sm:$0xff] }
0x268f   :  { %v8710_v46 = vpack.i.bf16 %v5496_v40, %v5495_v19 }
0x2690   :  { %8706 = vrot.lane.b32.xlu1 %v8705_v16, %s8819_s28  ;;  %v8464_v16 = vpack.c.bf16 %v4904_v28, %v4903_v50  ;;  %v6810_v50 = vld [vmem:[%s10808_s1 + $0x171] ss:$0 sm:$0xff] }
0x2694   :  { %8434 = vmatpush3.bf16.xpose.msk.msra.mxu1 %vm9577_vm14, %v8432_v61  ;;  %8711 = vrot.lane.b32.xlu1 %v8710_v46, %s8819_s28 }
0x2695   :  { %8435 = vmatprep.subr.bf16.mxu1 %v11013_v9 }
0x269c   :  { %8438 = vmatpush3.bf16.xpose.msk.msra.mxu1 %vm9577_vm14, %v8436_v11 }
0x269d   :  { %8463 = vmatprep.subr.bf16.mxu1 %v11013_v9 }
0x26a3   :  { %7892 = vmatmul.mubr.msk.f32.vlgmr.msra.gmra.mrb[86].mxu1 %vm1331_vm0, %v10504_v47 }
0x26a4   :  { %7936 = vmatprep.mubr.msk.f32.mxu1 %vm8818_vm7, %v11012_v57  ;;  %8465 = vmatpush3.bf16.msra.mxu1 %v8464_v16 }
0x26f6   :  { %v8692_v38 = vpop.permute.xlu1 %8691 }
0x26f7   :  { %v8694_v63 = vunpack.i.h.bf16 %v8692_v38  ;;  %v8693_v47 = vunpack.i.l.bf16 %v8692_v38 }
0x26f9   :  { %v8452_v0 = vpack.c.bf16 %v8694_v63, %v8693_v47  ;;  %v6808_v47 = vld [vmem:[%s10808_s1 + $0xc1] ss:$0 sm:$0xff] }
0x26fe   :  { %v8702_v4 = vpop.permute.xlu1 %8701 }
0x26ff   :  { %v8703_v21 = vunpack.i.l.bf16 %v8702_v4 }
0x2702   :  { %v8707_v62 = vpop.permute.xlu1 %8706 }
0x2703   :  { %v8709_v61 = vunpack.i.h.bf16 %v8707_v62  ;;  %v8708_v8 = vunpack.i.l.bf16 %v8707_v62 }
0x2705   :  { %v8461_v27 = vpack.c.bf16 %v8709_v61, %v8708_v8 }
0x2776   :  { %v5201_v49 = vpop.f32.mrb[86].mxu1 }
0x2777   :  { %v5205_v14 = vsel %vm918_vm11, %v5201_v49, -1e+30  ;;  %v7893_v54 = vpop.f32.mrb[87].mxu1 }
0x2778   :  { %v5206_v59 = vsel %vm885_vm5, %v5205_v14, -inf  ;;  %v8712_v14 = vpop.permute.xlu1 %8711 }
0x2779   :  { %5207 = vmax.xlane.f32.xlu0 %v5206_v59  ;;  %v8714_v54 = vunpack.i.h.bf16 %v8712_v14  ;;  %v8713_v59 = vunpack.i.l.bf16 %v8712_v14 }
0x278f   :  { %8696 = vrot.lane.b32.xlu0 %v8695_v56, %s8819_s28  ;;  %v8704_v56 = vunpack.i.h.bf16 %v8702_v4 }
0x2791   :  { %v8458_v5 = vpack.c.bf16 %v8704_v56, %v8703_v21 }
0x2806   :  { %v5208_v26 = vpop.xlane.xlu0 %5207 }
0x2807   :  { %v5209_v25 = vsub.f32 %v5201_v49, %v5208_v26  ;;  %v8469_v26 = vpack.c.bf16 %v8714_v54, %v8713_v59  ;;  %v11107_v59 = vld [vmem:[#allocation54_spill] sm:$0xff] }
0x2809   :  { %v5210_v42 = vmul.f32 1.442695, %v5209_v25  ;;  %8470 = vmatprep.subr.bf16.mxu1 %v8469_v26 }
0x280a   :  { %v8697_v37 = vpop.permute.xlu0 %8696 }
0x280b   :  { %8797 = vpow2.f32 %v5210_v42  ;;  %v8699_v6 = vunpack.i.h.bf16 %v8697_v37  ;;  %v8698_v34 = vunpack.i.l.bf16 %v8697_v37 }
0x280d   :  { %v8455_v10 = vpack.c.bf16 %v8699_v6, %v8698_v34 }
0x2815   :  { %v8798_v58 = vpop.eup %8797 }
0x2816   :  { %v5212_v12 = vsel %vm918_vm11, %v8798_v58, 0.0 }
0x2817   :  { %7911 = vmatmul.mubr.msk.f32.vlgmr.msra.gmra.mrb[70].mxu0 %vm885_vm5, %v5212_v12 }
0x2818   :  { %8453 = vmatpush3.bf16.msra.mxu0 %v8452_v0  ;;  %7929 = vmatprep.mubr.msk.f32.mxu0 %vm8818_vm7, %v11012_v57 }
0x2819   :  { %8454 = vmatprep.subr.bf16.mxu0 %v11013_v9 }
0x281c   :  { %8456 = vmatpush3.bf16.msra.mxu0 %v8455_v10 }
0x281d   :  { %8457 = vmatprep.subr.bf16.mxu0 %v11013_v9 }
0x2820   :  { %8459 = vmatpush3.bf16.msra.mxu0 %v8458_v5 }
0x2821   :  { %8460 = vmatprep.subr.bf16.mxu0 %v11013_v9 }
0x2824   :  { %8462 = vmatpush3.bf16.msra.mxu0 %v8461_v27 }
0x2825   :  { %8466 = vmatprep.subr.bf16.mxu0 %v11013_v9 }
0x28ea   :  { %v5282_v11 = vpop.f32.mrb[70].mxu0 }
0x28eb   :  { %8799 = vrcp.f32 %v5282_v11  ;;  %v7912_v49 = vpop.f32.mrb[71].mxu0 }
0x28f5   :  { %v8800_v25 = vpop.eup %8799 }
0x28f6   :  { %v5287_v42 = vmul.f32 %v8800_v25, %v5212_v12  ;;  %v8467_v12 = vpack.c.bf16 %v5496_v40, %v5495_v19  ;;  %v11108_v25 = vld [vmem:[#allocation24_spill] sm:$0xff] }
0x28f8   :  { %7930 = vmatmul.mubr.msk.f32.vlgmr.msra.gmra.mrb[72].mxu0 %vm885_vm5, %v5287_v42 }
0x28f9   :  { %7943 = vmatprep.mubr.msk.f32.mxu0 %vm8818_vm7, %v11012_v57  ;;  %8468 = vmatpush3.bf16.msra.mxu0 %v8467_v12  ;;  %v11112_v12 = vld [vmem:[#allocation26_spill] sm:$0xff] }
0x29cb   :  { %v5389_v38 = vpop.f32.mrb[72].mxu0 }
0x29cc   :  { %v7931_v63 = vpop.f32.mrb[73].mxu0  ;;  %7937 = vmatmul.mubr.msk.f32.vlgmr.msra.gmra.mrb[88].mxu1 %vm1331_vm0, %v5389_v38 }
0x29cd   :  { %8472 = vmatpush3.bf16.msra.mxu1 %v8469_v26  ;;  %7950 = vmatprep.mubr.msk.f32.mxu1 %vm1331_vm0, %v10300_v55 }
0x29ce   :  { %8479 = vmatprep.subr.bf16.mxu1 %v11013_v9 }
0x29d0   :  { %7951 = vmatmul.mubr.msk.f32.vlgmr.msra.gmra.mrb[90].mxu1 %vm1331_vm0, %v10302_v44  ;;  %v10613_v44 = vld [vmem:[%s10808_s1 + $0xe8] ss:$0 sm:$0xff] }
0x29d1   :  { %7999 = vmatprep.mubr.msk.f32.mxu1 %vm8818_vm7, %v11012_v57 }
0x2a9f   :  { %v5466_v37 = vpop.f32.mrb[88].mxu1 }
0x2aa0   :  { %v5467_v58 = vadd.f32 %v6808_v47, %v5466_v37  ;;  %v7938_v4 = vpop.f32.mrb[89].mxu1  ;;  %v11109_v37 = vld [vmem:[#allocation25_spill] sm:$0xff] }
0x2aa1   :  { %v11110_v4 = vld [vmem:[#allocation57_spill] sm:$0xff] }
0x2aa2   :  { %v5470_v0 = vadd.f32 %v5467_v58, %v10495_v35 }
0x2aa3   :  { %v7952_v6 = vpop.f32.mrb[90].mxu1 }
0x2aa4   :  { %v5656_v34 = vpop.f32.mrb[91].mxu1  ;;  %v5472_v55 = vsel %vm1331_vm0, %v5470_v0, 0.0 }
0x2aa5   :  { %5473 = vadd.xlane.f32.xlu1 %v5472_v55 }
0x2ab6   :  { %5587 = vrot.lane.b32.xlu1 %v10613_v44, %s8819_s28 }
0x2b32   :  { %v5474_v56 = vpop.xlane.xlu1 %5473 }
0x2b33   :  { %v5475_v21 = vmul.f32 0.0625, %v5474_v56 }
0x2b35   :  { %v5476_v10 = vsub.f32 %v5470_v0, %v5475_v21 }
0x2b36   :  { %v5588_v62 = vpop.permute.xlu1 %5587 }
0x2b37   :  { %v5657_v35 = vadd.f32 %v5656_v34, %v5588_v62  ;;  %v5662_v5 = vadd.f32 %v7952_v6, %v5588_v62  ;;  %v5477_v61 = vmul.f32 %v5476_v10, %v5476_v10  ;;  %v11111_v34 = vld [vmem:[#allocation56_spill] sm:$0xff] }
0x2b39   :  { %v8473_v8 = vpack.c.bf16 %v5662_v5, %v5657_v35  ;;  %v5478_v27 = vsel %vm1331_vm0, %v5477_v61, 0.0  ;;  %v11113_v35 = vld [vmem:[#allocation27_spill] sm:$0xff] }
0x2b3a   :  { %5479 = vadd.xlane.f32.xlu0 %v5478_v27  ;;  %v11114_v61 = vld [vmem:[#allocation59_spill] sm:$0xff] }
0x2b3b   :  { %8475 = vmatprep.subr.msk.bf16.mxu0 %vm9465_vm2, %v8473_v8 }
0x2b50   :  { %5491 = vrot.lane.b32.xlu0 %v6810_v50, %s8819_s28 }
0x2bc7   :  { %v5480_v19 = vpop.xlane.xlu0 %5479 }
0x2bc8   :  { %v5481_v40 = vmul.f32 0.0625, %v5480_v19 }
0x2bca   :  { %v5482_v46 = vadd.f32 1e-05, %v5481_v40  ;;  %v11116_v40 = vld [vmem:[#allocation28_spill] sm:$0xff] }
0x2bcb   :  { %v5492_v11 = vpop.permute.xlu0 %5491 }
0x2bcc   :  { %8801 = vrsqrt.f32 %v5482_v46 }
0x2bd6   :  { %v8802_v28 = vpop.eup %8801 }
0x2bd7   :  { %v5484_v16 = vmul.f32 %v8802_v28, %v5476_v10 }
0x2bd9   :  { %v5489_v49 = vmul.f32 %v6810_v50, %v5484_v16  ;;  %v11115_v50 = vld [vmem:[#allocation58_spill] sm:$0xff] }
0x2bdb   :  { %v10624_v14 = vadd.f32 %v5492_v11, %v5489_v49  ;;  %v11117_v49 = vld [vmem:[#allocation29_spill] sm:$0xff] }
0x2bdd   :  { %7944 = vmatmul.mubr.msk.f32.vlgmr.msra.gmra.mrb[74].mxu0 %vm1331_vm0, %v10624_v14 }
0x2bde   :  { %8478 = vmatpush3.bf16.msk.msra.mxu0 %vm9465_vm2, %v8473_v8  ;;  %7957 = vmatprep.mubr.msk.f32.mxu0 %vm1420_vm3, %v9436_v30  ;;  %v11102_v30 = vld [vmem:[#allocation52_spill] sm:$0xff] }
0x2bdf   :  { %8503 = vmatprep.subr.bf16.mxu0 %v11013_v9 }
0x2be1   :  { %7958 = vmatmul.mubr.msk.f32.vlgmr.msra.gmra.mrb[76].mxu0 %vm1420_vm3, %v9481_v23  ;;  %v11103_v23 = vld [vmem:[#allocation53_spill] sm:$0xff] }
0x2be2   :  { %8505 = vmatpush3.bf16.msra.mxu0 %v9324_v43  ;;  %7960 = vmatprep.mubr.msk.f32.mxu0 %vm1420_vm3, %v9488_v36 }
0x2be3   :  { %8506 = vmatprep.subr.bf16.mxu0 %v11013_v9 }
0x2be5   :  { %7961 = vmatmul.mubr.msk.f32.gmra.mrb[78].mxu0 %vm1420_vm3, %v9503_v52  ;;  %v11104_v52 = vld [vmem:[#allocation22_spill] sm:$0xff] }
0x2be6   :  { %8508 = vmatpush3.bf16.msra.mxu0 %v9333_v7  ;;  %7963 = vmatprep.mubr.msk.f32.mxu0 %vm1420_vm3, %v9507_v24 }
0x2be7   :  { %8509 = vmatprep.subr.bf16.mxu0 %v11013_v9 }
0x2be9   :  { %7964 = vmatmul.mubr.msk.f32.gmra.mrb[80].mxu0 %vm1420_vm3, %v9518_v22 }
0x2bea   :  { %8511 = vmatpush3.bf16.msra.mxu0 %v9342_v17  ;;  %7966 = vmatprep.mubr.msk.f32.mxu0 %vm1420_vm3, %v9522_v48  ;;  %v11105_v48 = vld [vmem:[#allocation23_spill] sm:$0xff] }
0x2beb   :  { %8512 = vmatprep.subr.bf16.mxu0 %v11013_v9 }
0x2bed   :  { %7967 = vmatmul.mubr.msk.f32.gmra.mrb[82].mxu0 %vm1420_vm3, %v9532_v18 }
0x2bee   :  { %8514 = vmatpush3.bf16.msra.mxu0 %v9351_v33  ;;  %7969 = vmatprep.mubr.msk.f32.mxu0 %vm1420_vm3, %v9536_v39  ;;  %v11101_v33 = vld [vmem:[#allocation21_spill] sm:$0xff]  ;;  %v11106_v39 = vld [vmem:[#allocation55_spill] sm:$0xff] }
0x2bef   :  { %8515 = vmatprep.subr.bf16.mxu0 %v11013_v9 }
0x2bf1   :  { %7970 = vmatmul.mubr.msk.f32.gmra.mrb[84].mxu0 %vm1420_vm3, %v9545_v20 }
0x2bf2   :  { %8517 = vmatpush3.bf16.msra.mxu0 %v9360_v45  ;;  %7972 = vmatprep.mubr.msk.f32.mxu0 %vm1420_vm3, %v9561_v13 }
0x2bf3   :  { %8518 = vmatprep.subr.bf16.mxu0 %v11013_v9 }
0x2bf5   :  { %7973 = vmatmul.mubr.msk.f32.gmra.mrb[86].mxu0 %vm1420_vm3, %v9558_v3 }
0x2bf6   :  { %8520 = vmatpush3.bf16.msra.mxu0 %v9312_v31  ;;  %8026 = vmatprep.mubr.msk.f32.mxu0 %vm8818_vm7, %v11012_v57 }
0x2bf7   :  { %8521 = vmatprep.subr.bf16.mxu0 %v11013_v9 }
0x2cb0   :  { %v10669_v43 = vpop.f32.mrb[74].mxu0 }
0x2cb1   :  { %v7945_v7 = vpop.f32.mrb[75].mxu0 }
0x2cb4   :  { %v7959_v17 = vpop.f32.mrb[76].mxu0 }
0x2cb5   :  { %v5794_v45 = vmul.f32 %v7959_v17, %v11101_v33  ;;  %v5806_v53 = vmul.f32 %v7959_v17, %v11102_v30  ;;  %v5734_v13 = vpop.f32.mrb[77].mxu0 }
0x2cb6   :  { %v5805_v36 = vmul.f32 %v5734_v13, %v11103_v23  ;;  %v5793_v3 = vmul.f32 %v5734_v13, %v11104_v52 }
0x2cb8   :  { %v8715_v24 = vpack.i.bf16 %v5806_v53, %v5805_v36  ;;  %v8480_v31 = vpack.c.bf16 %v5794_v45, %v5793_v3  ;;  %v7962_v22 = vpop.f32.mrb[78].mxu0 }
0x2cb9   :  { %v5796_v18 = vmul.f32 %v7962_v22, %v11105_v48  ;;  %v5808_v20 = vmul.f32 %v7962_v22, %v11106_v39  ;;  %v5744_v54 = vpop.f32.mrb[79].mxu0 }
0x2cba   :  { %v5807_v26 = vmul.f32 %v5744_v54, %v11107_v59  ;;  %v5795_v42 = vmul.f32 %v5744_v54, %v11108_v25  ;;  %8716 = vrot.lane.b32.xlu0 %v8715_v24, %s8819_s28  ;;  %8482 = vmatpush3.bf16.xpose.msk.msra.mxu1 %vm9577_vm14, %v8480_v31 }
0x2cbb   :  { %8483 = vmatprep.subr.bf16.mxu1 %v11013_v9 }
0x2cbc   :  { %v8720_v38 = vpack.i.bf16 %v5808_v20, %v5807_v26  ;;  %v8484_v63 = vpack.c.bf16 %v5796_v18, %v5795_v42  ;;  %v7965_v47 = vpop.f32.mrb[80].mxu0 }
0x2cbd   :  { %v5798_v58 = vmul.f32 %v7965_v47, %v11109_v37  ;;  %v5810_v0 = vmul.f32 %v7965_v47, %v11110_v4  ;;  %v5754_v6 = vpop.f32.mrb[81].mxu0 }
0x2cbe   :  { %v5809_v55 = vmul.f32 %v5754_v6, %v11111_v34  ;;  %v5797_v56 = vmul.f32 %v5754_v6, %v11112_v12  ;;  %8721 = vrot.lane.b32.xlu0 %v8720_v38, %s8819_s28 }
0x2cc0   :  { %v8725_v21 = vpack.i.bf16 %v5810_v0, %v5809_v55  ;;  %v8488_v10 = vpack.c.bf16 %v5798_v58, %v5797_v56  ;;  %v7968_v62 = vpop.f32.mrb[82].mxu0 }
0x2cc1   :  { %v5800_v5 = vmul.f32 %v7968_v62, %v11113_v35  ;;  %v5812_v8 = vmul.f32 %v7968_v62, %v11114_v61  ;;  %v5764_v27 = vpop.f32.mrb[83].mxu0 }
0x2cc2   :  { %v5811_v19 = vmul.f32 %v5764_v27, %v11115_v50  ;;  %v5799_v46 = vmul.f32 %v5764_v27, %v11116_v40  ;;  %8486 = vmatpush3.bf16.xpose.msk.msra.mxu1 %vm9577_vm14, %v8484_v63  ;;  %8726 = vrot.lane.b32.xlu0 %v8725_v21, %s8819_s28  ;;  %v5498_v27 = vld [vmem:[%s10808_s1 + $0xe0] sm:$0xff] }
0x2cc3   :  { %8487 = vmatprep.subr.bf16.mxu1 %v11013_v9 }
0x2cc4   :  { %v8730_v28 = vpack.i.bf16 %v5812_v8, %v5811_v19  ;;  %v8492_v16 = vpack.c.bf16 %v5800_v5, %v5799_v46  ;;  %v7971_v11 = vpop.f32.mrb[84].mxu0  ;;  %v5497_v8 = vld [vmem:[%s10808_s1 + $0xd8] sm:$0xff] }
0x2cc5   :  { %v5802_v7 = vmul.f32 %v7971_v11, %v11117_v49  ;;  %v5814_v17 = vmul.f32 %v7971_v11, %v11073_v1  ;;  %v5774_v33 = vpop.f32.mrb[85].mxu0  ;;  %v8540_v50 = vpack.c.bf16 %v5498_v27, %v5497_v8  ;;  %v6843_v49 = vld [vmem:[%s10808_s1 + $0xe9] ss:$0 sm:$0xff] }
0x2cc6   :  { %v5813_v45 = vmul.f32 %v5774_v33, %v11074_v51  ;;  %v5801_v30 = vmul.f32 %v5774_v33, %v11075_v2  ;;  %8731 = vrot.lane.b32.xlu0 %v8730_v28, %s8819_s28 }
0x2cc8   :  { %v8735_v53 = vpack.i.bf16 %v5814_v17, %v5813_v45  ;;  %v8496_v13 = vpack.c.bf16 %v5802_v7, %v5801_v30  ;;  %v7974_v23 = vpop.f32.mrb[86].mxu0 }
0x2cc9   :  { %v5804_v36 = vmul.f32 %v7974_v23, %v11076_v32  ;;  %v5816_v52 = vmul.f32 %v7974_v23, %v11077_v41  ;;  %v5784_v3 = vpop.f32.mrb[87].mxu0  ;;  %v5575_v41 = vadd.f32 %v10613_v44, %v10669_v43 }
0x2cca   :  { %v5815_v24 = vmul.f32 %v5784_v3, %v11078_v60  ;;  %v5803_v31 = vmul.f32 %v5784_v3, %v11079_v15  ;;  %8490 = vmatpush3.bf16.xpose.msk.msra.mxu1 %vm9577_vm14, %v8488_v10  ;;  %8736 = vrot.lane.b32.xlu0 %v8735_v53, %s8819_s28  ;;  %v6845_v3 = vld [vmem:[%s10808_s1 + $0x172] ss:$0 sm:$0xff] }
0x2ccb   :  { %8491 = vmatprep.subr.bf16.mxu1 %v11013_v9 }
0x2ccc   :  { %v8740_v51 = vpack.i.bf16 %v5816_v52, %v5815_v24  ;;  %v8500_v2 = vpack.c.bf16 %v5804_v36, %v5803_v31  ;;  %v6233_v24 = vld [vmem:[%s10808_s1 + $0x158] sm:$0xff] }
0x2cce   :  { %8741 = vrot.lane.b32.xlu0 %v8740_v51, %s8819_s28  ;;  %v6846_v51 = vld [vmem:[%s10808_s1 + $0x168] ss:$0 sm:$0xff] }
0x2cd2   :  { %8494 = vmatpush3.bf16.xpose.msk.msra.mxu1 %vm9577_vm14, %v8492_v16 }
0x2cd3   :  { %8495 = vmatprep.subr.bf16.mxu1 %v11013_v9 }
0x2cda   :  { %8498 = vmatpush3.bf16.xpose.msk.msra.mxu1 %vm9577_vm14, %v8496_v13 }
0x2cdb   :  { %8499 = vmatprep.subr.bf16.mxu1 %v11013_v9 }
0x2ce2   :  { %8502 = vmatpush3.bf16.xpose.msk.msra.mxu1 %vm9577_vm14, %v8500_v2 }
0x2ce3   :  { %8539 = vmatprep.subr.bf16.mxu1 %v11013_v9 }
0x2ce9   :  { %8000 = vmatmul.mubr.msk.f32.vlgmr.msra.gmra.mrb[92].mxu1 %vm1331_vm0, %v5575_v41 }
0x2cea   :  { %8060 = vmatprep.mubr.msk.f32.mxu1 %vm8818_vm7, %v11012_v57  ;;  %8541 = vmatpush3.bf16.msra.mxu1 %v8540_v50  ;;  %v6850_v50 = vld [vmem:[%s10808_s1 + $0x174] ss:$0 sm:$0xff] }
0x2ceb   :  { %8070 = vmatprep.subr.mxu1 %v11012_v57 }
0x2d2c   :  { %v8717_v48 = vpop.permute.xlu0 %8716 }
0x2d2d   :  { %v8719_v43 = vunpack.i.h.bf16 %v8717_v48  ;;  %v8718_v59 = vunpack.i.l.bf16 %v8717_v48 }
0x2d2f   :  { %v8522_v25 = vpack.c.bf16 %v8719_v43, %v8718_v59 }
0x2d30   :  { %v8722_v54 = vpop.permute.xlu0 %8721 }
0x2d31   :  { %v8724_v42 = vunpack.i.h.bf16 %v8722_v54  ;;  %v8723_v38 = vunpack.i.l.bf16 %v8722_v54 }
0x2d33   :  { %v8525_v37 = vpack.c.bf16 %v8724_v42, %v8723_v38 }
0x2d34   :  { %v8727_v44 = vpop.permute.xlu0 %8726 }
0x2d35   :  { %v8729_v58 = vunpack.i.h.bf16 %v8727_v44  ;;  %v8728_v4 = vunpack.i.l.bf16 %v8727_v44 }
0x2d37   :  { %v8528_v6 = vpack.c.bf16 %v8729_v58, %v8728_v4  ;;  %v6849_v4 = vld [vmem:[%s10808_s1 + $0x173] ss:$0 sm:$0xff] }
0x2d38   :  { %v8732_v47 = vpop.permute.xlu0 %8731 }
0x2d39   :  { %v8734_v34 = vunpack.i.h.bf16 %v8732_v47  ;;  %v8733_v55 = vunpack.i.l.bf16 %v8732_v47 }
0x2d3b   :  { %v8531_v12 = vpack.c.bf16 %v8734_v34, %v8733_v55 }
0x2d3c   :  { %v8737_v0 = vpop.permute.xlu0 %8736 }
0x2d3d   :  { %v8739_v56 = vunpack.i.h.bf16 %v8737_v0  ;;  %v8738_v21 = vunpack.i.l.bf16 %v8737_v0 }
0x2d3f   :  { %v8534_v62 = vpack.c.bf16 %v8739_v56, %v8738_v21 }
0x2d40   :  { %v8742_v10 = vpop.permute.xlu0 %8741 }
0x2d41   :  { %v8744_v35 = vunpack.i.h.bf16 %v8742_v10  ;;  %v8743_v5 = vunpack.i.l.bf16 %v8742_v10 }
0x2d43   :  { %v8537_v61 = vpack.c.bf16 %v8744_v35, %v8743_v5 }
0x2dbc   :  { %v5922_v15 = vpop.f32.mrb[92].mxu1 }
0x2dbd   :  { %v5926_v32 = vsel %vm922_vm10, %v5922_v15, -1e+30  ;;  %v8001_v60 = vpop.f32.mrb[93].mxu1 }
0x2dbe   :  { %v5927_v22 = vsel %vm517_vm15, %v5926_v32, -inf }
0x2dbf   :  { %5928 = vmax.xlane.f32.xlu1 %v5927_v22 }
0x2e4c   :  { %v5929_v18 = vpop.xlane.xlu1 %5928 }
0x2e4d   :  { %v5930_v39 = vsub.f32 %v5922_v15, %v5929_v18  ;;  %v11119_v18 = vld [vmem:[#allocation10_spill] sm:$0xff] }
0x2e4f   :  { %v5931_v20 = vmul.f32 1.442695, %v5930_v39  ;;  %v6234_v39 = vld [vmem:[%s10808_s1 + $0x160] sm:$0xff] }
0x2e51   :  { %8803 = vpow2.f32 %v5931_v20 }
0x2e5b   :  { %v8804_v26 = vpop.eup %8803 }
0x2e5c   :  { %v5933_v63 = vsel %vm922_vm10, %v8804_v26, 0.0 }
0x2e5d   :  { %8027 = vmatmul.mubr.msk.f32.vlgmr.msra.gmra.mrb[88].mxu0 %vm517_vm15, %v5933_v63 }
0x2e5e   :  { %8523 = vmatpush3.bf16.msra.mxu0 %v8522_v25  ;;  %8053 = vmatprep.mubr.msk.f32.mxu0 %vm8818_vm7, %v11012_v57 }
0x2e5f   :  { %8524 = vmatprep.subr.bf16.mxu0 %v11013_v9 }
0x2e62   :  { %8526 = vmatpush3.bf16.msra.mxu0 %v8525_v37 }
0x2e63   :  { %8527 = vmatprep.subr.bf16.mxu0 %v11013_v9 }
0x2e66   :  { %8529 = vmatpush3.bf16.msra.mxu0 %v8528_v6 }
0x2e67   :  { %8530 = vmatprep.subr.bf16.mxu0 %v11013_v9 }
0x2e6a   :  { %8532 = vmatpush3.bf16.msra.mxu0 %v8531_v12 }
0x2e6b   :  { %8533 = vmatprep.subr.bf16.mxu0 %v11013_v9 }
0x2e6e   :  { %8535 = vmatpush3.bf16.msra.mxu0 %v8534_v62 }
0x2e6f   :  { %8536 = vmatprep.subr.bf16.mxu0 %v11013_v9 }
0x2e72   :  { %8538 = vmatpush3.bf16.msra.mxu0 %v8537_v61 }
0x2e73   :  { %8542 = vmatprep.subr.bf16.mxu0 %v11013_v9 }
0x2f30   :  { %v6003_v19 = vpop.f32.mrb[88].mxu0 }
0x2f31   :  { %8805 = vrcp.f32 %v6003_v19  ;;  %v8028_v40 = vpop.f32.mrb[89].mxu0 }
0x2f3b   :  { %v8806_v46 = vpop.eup %8805 }
0x2f3c   :  { %v6008_v28 = vmul.f32 %v8806_v46, %v5933_v63 }
0x2f3e   :  { %8054 = vmatmul.mubr.msk.f32.vlgmr.msra.gmra.mrb[90].mxu0 %vm517_vm15, %v6008_v28 }
0x2f3f   :  { %8067 = vmatprep.mubr.msk.f32.mxu0 %vm8818_vm7, %v11012_v57 }
0x3011   :  { %v6126_v16 = vpop.f32.mrb[90].mxu0 }
0x3012   :  { %v8055_v11 = vpop.f32.mrb[91].mxu0  ;;  %8061 = vmatmul.mubr.msk.f32.vlgmr.msra.gmra.mrb[94].mxu1 %vm1331_vm0, %v6126_v16 }
0x3013   :  { %8072 = vmatprep.mubr.msk.f32.mxu1 %vm8818_vm7, %v11012_v57  ;;  %8071 = vmatpush3.msra.mxu1 %v6234_v39 }
0x30e5   :  { %v6203_v7 = vpop.f32.mrb[94].mxu1 }
0x30e6   :  { %v6204_v17 = vadd.f32 %v6843_v49, %v6203_v7  ;;  %v8062_v33 = vpop.f32.mrb[95].mxu1 }
0x30e8   :  { %v6207_v45 = vadd.f32 %v6204_v17, %v10624_v14  ;;  %v6232_v14 = vld [vmem:[%s10808_s1 + $0x150] sm:$0xff] }
0x30e9   :  { %v8543_v31 = vpack.c.bf16 %v6233_v24, %v6232_v14  ;;  %v6851_v17 = vld [vmem:[%s10808_s1 + $0x190] ss:$0 sm:$0xff] }
0x30ea   :  { %v6209_v30 = vsel %vm1331_vm0, %v6207_v45, 0.0 }
0x30eb   :  { %6210 = vadd.xlane.f32.xlu0 %v6209_v30  ;;  %8544 = vmatpush3.bf16.msra.mxu0 %v8543_v31 }
0x30ec   :  { %8545 = vmatprep.subr.bf16.mxu0 %v11013_v9  ;;  %v8813_v9 = vld [vmem:[%s10808_s1 + $0x188] sm:$0x7f] }
0x3178   :  { %v6211_v53 = vpop.xlane.xlu0 %6210 }
0x3179   :  { %v6212_v13 = vmul.f32 0.0625, %v6211_v53 }
0x317b   :  { %v6213_v23 = vsub.f32 %v6207_v45, %v6212_v13 }
0x317d   :  { %v6214_v36 = vmul.f32 %v6213_v23, %v6213_v23 }
0x317f   :  { %v6215_v52 = vsel %vm1331_vm0, %v6214_v36, 0.0 }
0x3180   :  { %6216 = vadd.xlane.f32.xlu1 %v6215_v52 }
0x3191   :  { %6228 = vrot.lane.b32.xlu1 %v6845_v3, %s8819_s28 }
0x3195   :  { %6315 = vrot.lane.b32.xlu1 %v6846_v51, %s8822_s17 }
0x320d   :  { %v6217_v2 = vpop.xlane.xlu1 %6216 }
0x320e   :  { %v6218_v41 = vmul.f32 0.0625, %v6217_v2 }
0x3210   :  { %v6219_v15 = vadd.f32 1e-05, %v6218_v41 }
0x3211   :  { %v6229_v60 = vpop.permute.xlu1 %6228 }
0x3212   :  { %8807 = vrsqrt.f32 %v6219_v15 }
0x3215   :  { %v6316_v43 = vpop.permute.xlu1 %6315 }
0x321c   :  { %v8808_v1 = vpop.eup %8807 }
0x321d   :  { %v6221_v32 = vmul.f32 %v8808_v1, %v6213_v23 }
0x321f   :  { %v6226_v22 = vmul.f32 %v6845_v3, %v6221_v32 }
0x3221   :  { %v6231_v48 = vadd.f32 %v6229_v60, %v6226_v22 }
0x3223   :  { %8068 = vmatmul.mubr.msk.f32.vlgmr.msra.gmra.mrb[92].mxu0 %vm1331_vm0, %v6231_v48 }
0x3224   :  { %8548 = vmatpush3.bf16.xpose.msk.msra.mxu0 %vm9577_vm14, %v11119_v18  ;;  %8081 = vmatprep.mubr.msk.f32.mxu0 %vm8818_vm7, %v11012_v57 }
0x3225   :  { %8079 = vmatprep.subr.mxu0 %v11012_v57 }
0x322c   :  { %8080 = vmatpush3.xpose.msk.msra.mxu0 %vm1331_vm0, %v8813_v9 }
0x32f6   :  { %v6309_v20 = vpop.f32.mrb[92].mxu0 }
0x32f7   :  { %v6310_v54 = vadd.f32 %v6846_v51, %v6309_v20  ;;  %v8069_v29 = vpop.f32.mrb[93].mxu0 }
0x32f9   :  { %v6313_v44 = vmax.f32 %v6310_v54, 0.0 }
0x32fb   :  { %8073 = vmatmul.mubr.msk.f32.vlgmr.msra.gmra.mrb[96].mxu1 %vm97_vm4, %v6313_v44 }
0x33ce   :  { %v6387_v59 = vpop.f32.mrb[96].mxu1 }
0x33cf   :  { %v6388_v57 = vadd.f32 %v6387_v59, %v6316_v43  ;;  %v8074_v26 = vpop.f32.mrb[97].mxu1 }
0x33d1   :  { %v6391_v25 = vadd.f32 %v6388_v57, %v6231_v48 }
0x33d3   :  { %v6393_v42 = vsel %vm1331_vm0, %v6391_v25, 0.0 }
0x33d4   :  { %6394 = vadd.xlane.f32.xlu1 %v6393_v42 }
0x3461   :  { %v6395_v38 = vpop.xlane.xlu1 %6394 }
0x3462   :  { %v6396_v63 = vmul.f32 0.0625, %v6395_v38 }
0x3464   :  { %v6397_v47 = vsub.f32 %v6391_v25, %v6396_v63 }
0x3466   :  { %v6398_v37 = vmul.f32 %v6397_v47, %v6397_v47 }
0x3468   :  { %v6399_v58 = vsel %vm1331_vm0, %v6398_v37, 0.0 }
0x3469   :  { %6400 = vadd.xlane.f32.xlu0 %v6399_v58 }
0x347f   :  { %6412 = vrot.lane.b32.xlu0 %v6849_v4, %s8819_s28 }
0x34f6   :  { %v6401_v0 = vpop.xlane.xlu0 %6400 }
0x34f7   :  { %v6402_v6 = vmul.f32 0.0625, %v6401_v0 }
0x34f9   :  { %v6403_v34 = vadd.f32 1e-05, %v6402_v6 }
0x34fa   :  { %v6413_v56 = vpop.permute.xlu0 %6412 }
0x34fb   :  { %8809 = vrsqrt.f32 %v6403_v34 }
0x3505   :  { %v8810_v55 = vpop.eup %8809 }
0x3506   :  { %v6405_v12 = vmul.f32 %v8810_v55, %v6397_v47 }
0x3508   :  { %v6410_v21 = vmul.f32 %v6849_v4, %v6405_v12 }
0x350a   :  { %v6415_v10 = vadd.f32 %v6413_v56, %v6410_v21 }
0x350c   :  { %v6417_v62 = vsel %vm1331_vm0, %v6415_v10, 0.0 }
0x350d   :  { %6418 = vadd.xlane.f32.xlu0 %v6417_v62 }
0x359a   :  { %v6419_v35 = vpop.xlane.xlu0 %6418 }
0x359b   :  { %v6420_v5 = vmul.f32 0.0625, %v6419_v35 }
0x359d   :  { %v6421_v61 = vsub.f32 %v6415_v10, %v6420_v5 }
0x359f   :  { %v6422_v8 = vmul.f32 %v6421_v61, %v6421_v61 }
0x35a1   :  { %v6423_v27 = vsel %vm1331_vm0, %v6422_v8, 0.0 }
0x35a2   :  { %6424 = vadd.xlane.f32.xlu1 %v6423_v27 }
0x35b3   :  { %6436 = vrot.lane.b32.xlu1 %v6850_v50, %s8819_s28 }
0x362f   :  { %v6425_v19 = vpop.xlane.xlu1 %6424 }
0x3630   :  { %v6426_v40 = vmul.f32 0.0625, %v6425_v19 }
0x3632   :  { %v6427_v46 = vadd.f32 1e-05, %v6426_v40 }
0x3633   :  { %v6437_v11 = vpop.permute.xlu1 %6436 }
0x3634   :  { %8811 = vrsqrt.f32 %v6427_v46 }
0x363e   :  { %v8812_v28 = vpop.eup %8811 }
0x363f   :  { %v6429_v16 = vmul.f32 %v8812_v28, %v6421_v61 }
0x3641   :  { %v6434_v49 = vmul.f32 %v6850_v50, %v6429_v16 }
0x3643   :  { %v6439_v7 = vadd.f32 %v6437_v11, %v6434_v49 }
0x3645   :  { %8082 = vmatmul.mubr.msk.f32.vlgmr.msra.gmra.mrb[94].mxu0 %vm1331_vm0, %v6439_v7 }
0x3718   :  { %v6522_v33 = vpop.f32.mrb[94].mxu0 }
0x3719   :  { %v6523_v45 = vadd.f32 %v6851_v17, %v6522_v33  ;;  %v8083_v30 = vpop.f32.mrb[95].mxu0 }
0x371b   :  { %6526 = vst.msk [vmem:[%s10809_s2] sm:$0xff] %vm962_vm8, %v6523_v45 }

</bundles_post_ra>
